<compile_context>
chip_gen: v5e
topology: v5e:2x2
jax: 0.10.0
libtpu: 0.0.40
codegen_flags: <defaults>
</compile_context>

<pallas_src>
import functools
import math

import jax
import jax.numpy as jnp
from jax.experimental import pallas as pl
from jax.experimental.pallas import tpu as pltpu

_VMEM_LIMIT = 48 * 1024 * 1024
# Flip to jnp.bfloat16 on v6e/v7x to feed the fast MXU path; softmax / forget /
# LayerNorm math stays f32 either way (keep f32 on v5e: no bf16 VPU/EUP there).
_MXU_DTYPE = jnp.float32


def _pick_tile(dim, pref):
    """Largest tile <= pref that divides dim (small dims fall back to the full dim)."""
    if dim <= pref:
        return dim
    t = pref
    while t > 1 and dim % t != 0:
        t //= 2
    return t


# ----------------------------------------------------------------------------
# Tiled linear:  y = x @ w_t (+ b) (+ relu)        w_t stored as (d_in, d_out)
# ----------------------------------------------------------------------------
def _linear_bias_kernel(x_ref, w_ref, b_ref, o_ref, acc_ref, *, activation):
    kk = pl.program_id(2)

    @pl.when(kk == 0)
    def _():
        acc_ref[...] = jnp.zeros_like(acc_ref)

    acc_ref[...] += jnp.dot(x_ref[...].astype(_MXU_DTYPE),
                            w_ref[...].astype(_MXU_DTYPE),
                            preferred_element_type=jnp.float32)

    @pl.when(kk == pl.num_programs(2) - 1)
    def _():
        y = acc_ref[...] + b_ref[...]
        if activation == "relu":
            y = jnp.maximum(y, 0.0)
        o_ref[...] = y.astype(o_ref.dtype)


def _linear_nobias_kernel(x_ref, w_ref, o_ref, acc_ref, *, activation):
    kk = pl.program_id(2)

    @pl.when(kk == 0)
    def _():
        acc_ref[...] = jnp.zeros_like(acc_ref)

    acc_ref[...] += jnp.dot(x_ref[...].astype(_MXU_DTYPE),
                            w_ref[...].astype(_MXU_DTYPE),
                            preferred_element_type=jnp.float32)

    @pl.when(kk == pl.num_programs(2) - 1)
    def _():
        y = acc_ref[...]
        if activation == "relu":
            y = jnp.maximum(y, 0.0)
        o_ref[...] = y.astype(o_ref.dtype)


def linear(x2d, w_t, b=None, *, activation=None, tm=256, tn=256, tk=512):
    M, K = x2d.shape
    N = w_t.shape[1]
    tm, tn, tk = _pick_tile(M, tm), _pick_tile(N, tn), _pick_tile(K, tk)
    grid = (M // tm, N // tn, K // tk)

    in_specs = [
        pl.BlockSpec((tm, tk), lambda i, j, kk: (i, kk)),
        pl.BlockSpec((tk, tn), lambda i, j, kk: (kk, j)),
    ]
    args = [x2d, w_t]
    if b is not None:
        in_specs.append(pl.BlockSpec((1, tn), lambda i, j, kk: (0, j)))
        args.append(b.reshape(1, N))
        kernel = functools.partial(_linear_bias_kernel, activation=activation)
    else:
        kernel = functools.partial(_linear_nobias_kernel, activation=activation)

    return pl.pallas_call(
        kernel,
        out_shape=jax.ShapeDtypeStruct((M, N), jnp.float32),
        grid_spec=pltpu.PrefetchScalarGridSpec(
            num_scalar_prefetch=0,
            grid=grid,
            in_specs=in_specs,
            out_specs=pl.BlockSpec((tm, tn), lambda i, j, kk: (i, j)),
            scratch_shapes=[pltpu.VMEM((tm, tn), jnp.float32)],
        ),
        compiler_params=pltpu.CompilerParams(
            dimension_semantics=("parallel", "parallel", "arbitrary"),
            vmem_limit_bytes=_VMEM_LIMIT,
        ),
        cost_estimate=pl.CostEstimate(
            flops=2 * M * N * K,
            transcendentals=0,
            bytes_accessed=4 * (M * K + K * N + M * N),
        ),
    )(*args)


# ----------------------------------------------------------------------------
# Fused QKV projection (self-attention): y = x @ [Wq^T | Wk^T | Wv^T] + b,
# split into three lane-dense (M, d_model) outputs inside the kernel.
# ----------------------------------------------------------------------------
def _qkv_proj_kernel(x_ref, w_ref, b_ref, q_ref, k_ref, v_ref, acc_ref, *, d_model):
    kk = pl.program_id(1)

    @pl.when(kk == 0)
    def _():
        acc_ref[...] = jnp.zeros_like(acc_ref)

    acc_ref[...] += jnp.dot(x_ref[...].astype(_MXU_DTYPE),
                            w_ref[...].astype(_MXU_DTYPE),
                            preferred_element_type=jnp.float32)

    @pl.when(kk == pl.num_programs(1) - 1)
    def _():
        y = acc_ref[...] + b_ref[...]
        q_ref[...] = y[:, :d_model].astype(q_ref.dtype)
        k_ref[...] = y[:, d_model:2 * d_model].astype(k_ref.dtype)
        v_ref[...] = y[:, 2 * d_model:].astype(v_ref.dtype)


def qkv_projection(x2d, w_qkv_t, b_qkv, d_model, *, tm=256, tk=512):
    M, K = x2d.shape
    N3 = w_qkv_t.shape[1]
    tm, tk = _pick_tile(M, tm), _pick_tile(K, tk)
    grid = (M // tm, K // tk)

    out_sds = jax.ShapeDtypeStruct((M, d_model), jnp.float32)
    out_spec = pl.BlockSpec((tm, d_model), lambda i, kk: (i, 0))

    return pl.pallas_call(
        functools.partial(_qkv_proj_kernel, d_model=d_model),
        out_shape=(out_sds, out_sds, out_sds),
        grid_spec=pltpu.PrefetchScalarGridSpec(
            num_scalar_prefetch=0,
            grid=grid,
            in_specs=[
                pl.BlockSpec((tm, tk), lambda i, kk: (i, kk)),
                pl.BlockSpec((tk, N3), lambda i, kk: (kk, 0)),
                pl.BlockSpec((1, N3), lambda i, kk: (0, 0)),
            ],
            out_specs=[out_spec, out_spec, out_spec],
            scratch_shapes=[pltpu.VMEM((tm, N3), jnp.float32)],
        ),
        compiler_params=pltpu.CompilerParams(
            dimension_semantics=("parallel", "arbitrary"),
            vmem_limit_bytes=_VMEM_LIMIT,
        ),
        cost_estimate=pl.CostEstimate(
            flops=2 * M * N3 * K,
            transcendentals=0,
            bytes_accessed=4 * (M * K + K * N3 + M * N3),
        ),
    )(x2d, w_qkv_t, b_qkv.reshape(1, N3))


# ----------------------------------------------------------------------------
# Attention with "forget effect" — one batch (all heads) per grid step.
# q/k/v blocks are (1, S, H*D) lane-dense; output written as (1, S, H*D).
# ----------------------------------------------------------------------------
def _mha_kernel(q_ref, k_ref, v_ref, mask_ref, nsin_ref, gamma_ref, out_ref, *maybe_attn,
                n_heads, d_head, is_effect, need_weights):
    attn_ref = maybe_attn[0] if need_weights else None
    H, D = n_heads, d_head
    neg = jnp.float32(-1e32)
    inv_sqrt_d = jnp.float32(1.0 / math.sqrt(D))

    q = q_ref[0]            # (Sq, H*D)
    k = k_ref[0]            # (Sk, H*D)
    v = v_ref[0]            # (Sk, H*D)
    mask = mask_ref[0]      # (Sq, Sk) f32 {0,1}
    keep = mask > 0
    nsin = nsin_ref[...] if is_effect else None   # (Sq, Sk): -sin(rel/40), precomputed

    def masked_softmax(s):
        s = jnp.where(keep, s, neg)
        m = jnp.max(s, axis=-1, keepdims=True)
        e = jnp.exp(s - m)
        return e * pl.reciprocal(jnp.sum(e, axis=-1, keepdims=True), approx=True) * mask

    head_outs = []
    for h in range(H):            # static unrolled loop over heads
        lo, hi = h * D, (h + 1) * D
        qh = q[:, lo:hi]
        kh = k[:, lo:hi]
        vh = v[:, lo:hi]
        score = jnp.dot(qh.astype(_MXU_DTYPE), kh.astype(_MXU_DTYPE).T,
                        preferred_element_type=jnp.float32) * inv_sqrt_d
        if is_effect:
            # first softmax is under torch.no_grad()/detach: forward values identical
            s_ = masked_softmax(score)
            forget = jnp.exp(nsin * pl.reciprocal(gamma_ref[h] * s_ + 1.0, approx=True))
            score = score * forget
        attn = masked_softmax(score)
        head_outs.append(jnp.dot(attn.astype(_MXU_DTYPE), vh.astype(_MXU_DTYPE),
                                 preferred_element_type=jnp.float32))
        if need_weights:
            attn_ref[0, h] = attn

    out_ref[0] = jnp.concatenate(head_outs, axis=-1)   # lane-dense (Sq, H*D) store


def mha_attention(q, k, v, mask_f, neg_sin, gamma, *, n_heads, is_effect=True,
                  need_weights=True):
    B, Sq, dm = q.shape
    Sk = k.shape[1]
    D = dm // n_heads

    kernel = functools.partial(_mha_kernel, n_heads=n_heads, d_head=D,
                               is_effect=is_effect, need_weights=need_weights)

    out_shape = [jax.ShapeDtypeStruct((B, Sq, dm), jnp.float32)]
    out_specs = [pl.BlockSpec((1, Sq, dm), lambda b: (b, 0, 0))]
    if need_weights:
        out_shape.append(jax.ShapeDtypeStruct((B, n_heads, Sq, Sk), jnp.float32))
        out_specs.append(pl.BlockSpec((1, n_heads, Sq, Sk), lambda b: (b, 0, 0, 0)))

    flops = 4 * B * n_heads * Sq * Sk * D
    transcend = B * n_heads * Sq * Sk * (3 if is_effect else 1)
    bytes_acc = 4 * (2 * B * Sq * dm + 2 * B * Sk * dm + B * Sq * Sk + Sq * Sk
                     + (B * n_heads * Sq * Sk if need_weights else 0))

    # TODO(synk): for long sequences (where the (S,S) f32 score tiles no longer fit
    # v7x's 64 MiB VMEM) tile the KV axis with a two-pass softmax; the forget effect
    # needs the fully-normalized first softmax, so single-pass flash does not apply.
    return pl.pallas_call(
        kernel,
        out_shape=tuple(out_shape) if need_weights else out_shape[0],
        grid_spec=pltpu.PrefetchScalarGridSpec(
            num_scalar_prefetch=0,
            grid=(B,),
            in_specs=[
                pl.BlockSpec((1, Sq, dm), lambda b: (b, 0, 0)),      # q
                pl.BlockSpec((1, Sk, dm), lambda b: (b, 0, 0)),      # k
                pl.BlockSpec((1, Sk, dm), lambda b: (b, 0, 0)),      # v
                pl.BlockSpec((1, Sq, Sk), lambda b: (b, 0, 0)),      # mask (f32)
                pl.BlockSpec((Sq, Sk), lambda b: (0, 0)),            # -sin(rel/40)
                pl.BlockSpec(memory_space=pltpu.MemorySpace.SMEM),   # gamma (H,)
            ],
            out_specs=out_specs if need_weights else out_specs[0],
        ),
        compiler_params=pltpu.CompilerParams(
            dimension_semantics=("parallel",),
            vmem_limit_bytes=_VMEM_LIMIT,
        ),
        cost_estimate=pl.CostEstimate(
            flops=flops, transcendentals=transcend, bytes_accessed=bytes_acc),
    )(q, k, v, mask_f, neg_sin, gamma)


# ----------------------------------------------------------------------------
# Fused residual-add + LayerNorm (eps = 1e-12, matching nn.LayerNorm)
# ----------------------------------------------------------------------------
def _add_ln_kernel(x_ref, r_ref, g_ref, b_ref, o_ref, *, eps):
    y = x_ref[...] + r_ref[...]
    mu = jnp.mean(y, axis=-1, keepdims=True)
    yc = y - mu
    var = jnp.mean(yc * yc, axis=-1, keepdims=True)
    o_ref[...] = yc * jax.lax.rsqrt(var + jnp.float32(eps)) * g_ref[...] + b_ref[...]


def add_layernorm(x2d, r2d, gain, bias, *, eps=1e-12, tm=512):
    M, N = x2d.shape
    tm = _pick_tile(M, tm)
    return pl.pallas_call(
        functools.partial(_add_ln_kernel, eps=eps),
        out_shape=jax.ShapeDtypeStruct((M, N), jnp.float32),
        grid_spec=pltpu.PrefetchScalarGridSpec(
            num_scalar_prefetch=0,
            grid=(M // tm,),
            in_specs=[
                pl.BlockSpec((tm, N), lambda i: (i, 0)),
                pl.BlockSpec((tm, N), lambda i: (i, 0)),
                pl.BlockSpec((1, N), lambda i: (0, 0)),
                pl.BlockSpec((1, N), lambda i: (0, 0)),
            ],
            out_specs=pl.BlockSpec((tm, N), lambda i: (i, 0)),
        ),
        compiler_params=pltpu.CompilerParams(
            dimension_semantics=("parallel",),
            vmem_limit_bytes=_VMEM_LIMIT,
        ),
    )(x2d, r2d, gain.reshape(1, N), bias.reshape(1, N))


# ----------------------------------------------------------------------------
# relation-position table (hoisted sin, no device sync)
# ----------------------------------------------------------------------------
def neg_sin_table(s_q, s_k, qk_identical=False):
    i = jnp.arange(s_q, dtype=jnp.float32)[:, None]
    j = jnp.arange(s_k, dtype=jnp.float32)[None, :]
    absdiff = jnp.abs(j - i)
    if qk_identical:
        rel = jnp.minimum(absdiff, 40.0)
    else:  # torch.equal on the *projected* q/k is false in practice (w_q != w_k)
        rel = jnp.minimum(absdiff, 39.0) + 1.0
    return -jnp.sin(rel * (1.0 / 40.0))


# ----------------------------------------------------------------------------
# Parameter init (torch shapes; weights stored pre-transposed (d_in, d_out) once)
# ----------------------------------------------------------------------------
def init_decoder_params(key, d_model, d_q, d_k, d_v, n_heads, d_ff):
    assert d_q == d_k == d_v, "fused self-attention QKV requires equal input dims"

    def xavier(k_, out_dim, in_dim):
        a = math.sqrt(6.0 / (in_dim + out_dim))
        return jax.random.uniform(k_, (out_dim, in_dim), jnp.float32, -a, a)

    def kaiming_uniform(k_, out_dim, in_dim):   # nn.Linear default init (bias=False FFN)
        a = 1.0 / math.sqrt(in_dim)
        return jax.random.uniform(k_, (out_dim, in_dim), jnp.float32, -a, a)

    zeros = lambda n: jnp.zeros((n,), jnp.float32)
    ones = lambda n: jnp.ones((n,), jnp.float32)
    ks = jax.random.split(key, 10)

    wq, wk, wv = (xavier(ks[0], d_model, d_q), xavier(ks[1], d_model, d_k),
                  xavier(ks[2], d_model, d_v))
    sa = dict(
        w_qkv_t=jnp.concatenate([wq.T, wk.T, wv.T], axis=1),   # (d_q, 3*d_model)
        b_qkv=zeros(3 * d_model),
        w_o_t=xavier(ks[3], d_model, d_model).T,
        b_o=zeros(d_model),
        gamma=ones(n_heads),                                    # torch: (1, H, 1, 1)
    )
    mha = dict(
        w_q_t=xavier(ks[4], d_model, d_q).T, b_q=zeros(d_model),
        w_k_t=xavier(ks[5], d_model, d_k).T, b_k=zeros(d_model),
        w_v_t=xavier(ks[6], d_model, d_v).T, b_v=zeros(d_model),
        w_o_t=xavier(ks[7], d_model, d_model).T, b_o=zeros(d_model),
        gamma=ones(n_heads),
    )
    return dict(
        sa=sa, mha=mha,
        ln_sa_g=ones(d_model), ln_sa_b=zeros(d_model),
        ln_mha_g=ones(d_model), ln_mha_b=zeros(d_model),
        w_fc_in_t=kaiming_uniform(ks[8], d_ff, d_model).T,      # (d_model, d_ff)
        w_fc_out_t=kaiming_uniform(ks[9], d_model, d_ff).T,     # (d_ff, d_model)
        ln_fc_g=ones(d_model), ln_fc_b=zeros(d_model),
    )


# ----------------------------------------------------------------------------
# Full TransformerDecoderLayer forward (eval mode: dropout = identity)
# ----------------------------------------------------------------------------
@functools.partial(jax.jit, static_argnames=("n_heads", "is_effect"))
def decoder_layer_forward(params, q, mem_k, mem_v, mask_sa, mask_mha, *, n_heads,
                          is_effect=True):
    B, Sq, dm = q.shape
    Sk = mem_k.shape[1]
    q2d = q.reshape(B * Sq, dm)

    # ---- masked self-attention (fused QKV projection) ----
    sa = params["sa"]
    qp, kp, vp = qkv_projection(q2d, sa["w_qkv_t"], sa["b_qkv"], dm)
    nsin_sa = neg_sin_table(Sq, Sq)
    mask_sa_f = mask_sa.astype(jnp.float32).reshape(B, Sq, Sq)
    sa_out, attn_sa = mha_attention(
        qp.reshape(B, Sq, dm), kp.reshape(B, Sq, dm), vp.reshape(B, Sq, dm),
        mask_sa_f, nsin_sa, sa["gamma"],
        n_heads=n_heads, is_effect=is_effect, need_weights=True)
    sa_proj = linear(sa_out.reshape(B * Sq, dm), sa["w_o_t"], sa["b_o"])
    # dropout_sa: identity (inference)
    q1 = add_layernorm(q2d, sa_proj, params["ln_sa_g"], params["ln_sa_b"])

    # ---- masked cross-attention (attention probs not needed -> no O(S^2) writeback) ----
    m = params["mha"]
    qc = linear(q1, m["w_q_t"], m["b_q"])
    kc = linear(mem_k.reshape(B * Sk, -1), m["w_k_t"], m["b_k"])
    vc = linear(mem_v.reshape(B * Sk, -1), m["w_v_t"], m["b_v"])
    nsin_x = neg_sin_table(Sq, Sk)
    mask_mha_f = mask_mha.astype(jnp.float32).reshape(B, Sq, Sk)
    mha_out = mha_attention(
        qc.reshape(B, Sq, dm), kc.reshape(B, Sk, dm), vc.reshape(B, Sk, dm),
        mask_mha_f, nsin_x, m["gamma"],
        n_heads=n_heads, is_effect=is_effect, need_weights=False)
    mha_proj = linear(mha_out.reshape(B * Sq, dm), m["w_o_t"], m["b_o"])
    q2 = add_layernorm(q1, mha_proj, params["ln_mha_g"], params["ln_mha_b"])

    # ---- feed-forward (relu fused into the first matmul epilogue) ----
    h = linear(q2, params["w_fc_in_t"], None, activation="relu")
    ff = linear(h, params["w_fc_out_t"], None)
    q3 = add_layernorm(q2, ff, params["ln_fc_g"], params["ln_fc_b"])

    return q3.reshape(B, Sq, dm), attn_sa


# ----------------------------------------------------------------------------
# Plain-JAX reference mirroring the PyTorch math (eval mode) for verification
# ----------------------------------------------------------------------------
def _ref_layer(params, q, mem_k, mem_v, mask_sa, mask_mha, n_heads, is_effect=True):
    dm = q.shape[-1]
    D = dm // n_heads

    def lin(x, w_t, b=None):
        y = x @ w_t
        return y + b if b is not None else y

    def attention_ref(qh, kh, vh, mask_b, gamma):
        Sq, Sk = qh.shape[2], kh.shape[2]
        maskf = mask_b.astype(jnp.float32)
        score = jnp.einsum("bhqd,bhkd->bhqk", qh, kh) / math.sqrt(D)
        if is_effect:
            i = jnp.arange(Sq, dtype=jnp.float32)[:, None]
            j = jnp.arange(Sk, dtype=jnp.float32)[None, :]
            rel = jnp.minimum(jnp.abs(j - i), 39.0) + 1.0
            s_ = jax.nn.softmax(jnp.where(mask_b, score, -1e32), axis=-1) * maskf
            forget = jnp.exp(-jnp.sin(rel / 40.0)[None, None] / (gamma * s_ + 1.0))
            score = score * forget
        score = jax.nn.softmax(jnp.where(mask_b, score, -1e32), axis=-1) * maskf
        return jnp.einsum("bhqk,bhkd->bhqd", score, vh), score

    def mha_ref(query, key, value, mask_b, wq_t, bq, wk_t, bk, wv_t, bv, wo_t, bo, gamma):
        B, Sq, _ = query.shape
        Sk = key.shape[1]
        qh = lin(query, wq_t, bq).reshape(B, Sq, n_heads, D).transpose(0, 2, 1, 3)
        kh = lin(key, wk_t, bk).reshape(B, Sk, n_heads, D).transpose(0, 2, 1, 3)
        vh = lin(value, wv_t, bv).reshape(B, Sk, n_heads, D).transpose(0, 2, 1, 3)
        out, attn = attention_ref(qh, kh, vh, mask_b, gamma.reshape(1, n_heads, 1, 1))
        out = lin(out.transpose(0, 2, 1, 3).reshape(B, Sq, dm), wo_t, bo)
        return out, attn

    def ln(x, g, b):
        mu = jnp.mean(x, axis=-1, keepdims=True)
        var = jnp.mean((x - mu) ** 2, axis=-1, keepdims=True)
        return (x - mu) / jnp.sqrt(var + 1e-12) * g + b

    sa = params["sa"]
    wq_t, wk_t, wv_t = (sa["w_qkv_t"][:, :dm], sa["w_qkv_t"][:, dm:2 * dm],
                        sa["w_qkv_t"][:, 2 * dm:])
    bq, bk, bv = sa["b_qkv"][:dm], sa["b_qkv"][dm:2 * dm], sa["b_qkv"][2 * dm:]
    q_sa, attn_sa = mha_ref(q, q, q, mask_sa, wq_t, bq, wk_t, bk, wv_t, bv,
                            sa["w_o_t"], sa["b_o"], sa["gamma"])
    q1 = ln(q + q_sa, params["ln_sa_g"], params["ln_sa_b"])

    m = params["mha"]
    q_mha, _ = mha_ref(q1, mem_k, mem_v, mask_mha, m["w_q_t"], m["b_q"], m["w_k_t"],
                       m["b_k"], m["w_v_t"], m["b_v"], m["w_o_t"], m["b_o"], m["gamma"])
    q2 = ln(q1 + q_mha, params["ln_mha_g"], params["ln_mha_b"])

    h = jnp.maximum(q2 @ params["w_fc_in_t"], 0.0)
    ff = h @ params["w_fc_out_t"]
    q3 = ln(q2 + ff, params["ln_fc_g"], params["ln_fc_b"])
    return q3, attn_sa


if __name__ == "__main__":
    B, S = 2, 8
    d_model, n_heads, d_ff = 32, 4, 64
    d_q = d_k = d_v = d_model

    root = jax.random.PRNGKey(0)
    kparam, kq, kk_, kv_ = jax.random.split(root, 4)
    params = init_decoder_params(kparam, d_model, d_q, d_k, d_v, n_heads, d_ff)

    q = jax.random.normal(kq, (B, S, d_model), jnp.float32)
    mem_k = jax.random.normal(kk_, (B, S, d_k), jnp.float32)
    mem_v = jax.random.normal(kv_, (B, S, d_v), jnp.float32)

    mask_sa = jnp.broadcast_to(jnp.tril(jnp.ones((S, S), jnp.bool_))[None, None],
                               (B, 1, S, S))
    mask_mha = jnp.ones((B, 1, S, S), jnp.bool_)

    out, attn_sa = decoder_layer_forward(params, q, mem_k, mem_v, mask_sa, mask_mha,
                                         n_heads=n_heads, is_effect=True)
    out = jax.block_until_ready(out)
    attn_sa = jax.block_until_ready(attn_sa)

    ref_out, ref_attn = _ref_layer(params, q, mem_k, mem_v, mask_sa, mask_mha,
                                   n_heads, is_effect=True)

    assert out.shape == (B, S, d_model) and attn_sa.shape == (B, n_heads, S, S)
    assert jnp.allclose(attn_sa, ref_attn, atol=5e-3, rtol=5e-3), "attention mismatch"
    assert jnp.allclose(out, ref_out, atol=5e-3, rtol=5e-3), "output mismatch"
    print("KERNEL_OK")
</pallas_src>

<mosaic_0001>
module attributes {stable_mosaic.version = 11 : i64} {
  func.func @_qkv_proj_kernel(%arg0: i32, %arg1: i32, %arg2: memref<16x32xf32, #tpu.memory_space<vmem>>, %arg3: memref<32x96xf32, #tpu.memory_space<vmem>>, %arg4: memref<1x96xf32, #tpu.memory_space<vmem>>, %arg5: memref<16x32xf32, #tpu.memory_space<vmem>>, %arg6: memref<16x32xf32, #tpu.memory_space<vmem>>, %arg7: memref<16x32xf32, #tpu.memory_space<vmem>>, %arg8: memref<16x96xf32, #tpu.memory_space<vmem>>) attributes {dimension_semantics = [#tpu.dimension_semantics<parallel>, #tpu.dimension_semantics<arbitrary>], iteration_bounds = array<i64: 1, 1>, scalar_prefetch = 0 : i64, scratch_operands = 1 : i64, tpu.core_type = #tpu.core_type<tc>, window_params = [{transform_indices = @transform_0, window_bounds = array<i64: 16, 32>}, {transform_indices = @transform_1, window_bounds = array<i64: 32, 96>}, {pipeline_mode = #tpu.pipeline_mode<synchronous>, transform_indices = @transform_2, window_bounds = array<i64: 1, 96>}, {transform_indices = @transform_3, window_bounds = array<i64: 16, 32>}, {transform_indices = @transform_4, window_bounds = array<i64: 16, 32>}, {transform_indices = @transform_5, window_bounds = array<i64: 16, 32>}]} {
    %c0_i32 = arith.constant 0 : i32
    %0 = arith.cmpi eq, %arg1, %c0_i32 : i32
    %1 = arith.extui %0 : i1 to i32
    %c0_i32_0 = arith.constant 0 : i32
    %2 = arith.cmpi ne, %1, %c0_i32_0 : i32
    scf.if %2 {
      %cst_10 = arith.constant 0.000000e+00 : f32
      %12 = vector.broadcast %cst_10 : f32 to vector<16x96xf32>
      %c0_11 = arith.constant 0 : index
      %c0_12 = arith.constant 0 : index
      %13 = vector.load %arg8[%c0_11, %c0_12] : memref<16x96xf32, #tpu.memory_space<vmem>>, vector<16x96xf32>
      tpu.vector_store %arg8[%c0_11, %c0_12], %12 {strides = array<i32>} : memref<16x96xf32, #tpu.memory_space<vmem>>, vector<16x96xf32>,
    } else {
    }
    %c0 = arith.constant 0 : index
    %c0_1 = arith.constant 0 : index
    %3 = vector.load %arg8[%c0, %c0_1] : memref<16x96xf32, #tpu.memory_space<vmem>>, vector<16x96xf32>
    %c0_2 = arith.constant 0 : index
    %c0_3 = arith.constant 0 : index
    %4 = vector.load %arg2[%c0_2, %c0_3] : memref<16x32xf32, #tpu.memory_space<vmem>>, vector<16x32xf32>
    %c0_4 = arith.constant 0 : index
    %c0_5 = arith.constant 0 : index
    %5 = vector.load %arg3[%c0_4, %c0_5] : memref<32x96xf32, #tpu.memory_space<vmem>>, vector<32x96xf32>
    %cst = arith.constant dense<0.000000e+00> : vector<16x96xf32>
    %6 = tpu.matmul %4, %5, %cst {dimension_numbers = #tpu.dot_dimension_numbers<[1], [0], [0], [1], [0, 0, 1, 1], [], []>} : vector<16x32xf32>, vector<32x96xf32>, vector<16x96xf32> -> vector<16x96xf32>
    %7 = arith.addf %3, %6 : vector<16x96xf32>
    %c0_6 = arith.constant 0 : index
    %c0_7 = arith.constant 0 : index
    %8 = vector.load %arg8[%c0_6, %c0_7] : memref<16x96xf32, #tpu.memory_space<vmem>>, vector<16x96xf32>
    tpu.vector_store %arg8[%c0_6, %c0_7], %7 {strides = array<i32>} : memref<16x96xf32, #tpu.memory_space<vmem>>, vector<16x96xf32>,
    %c0_i32_8 = arith.constant 0 : i32
    %9 = arith.cmpi eq, %arg1, %c0_i32_8 : i32
    %10 = arith.extui %9 : i1 to i32
    %c0_i32_9 = arith.constant 0 : i32
    %11 = arith.cmpi ne, %10, %c0_i32_9 : i32
    scf.if %11 {
      %c0_10 = arith.constant 0 : index
      %c0_11 = arith.constant 0 : index
      %12 = vector.load %arg8[%c0_10, %c0_11] : memref<16x96xf32, #tpu.memory_space<vmem>>, vector<16x96xf32>
      %c0_12 = arith.constant 0 : index
      %c0_13 = arith.constant 0 : index
      %13 = vector.load %arg4[%c0_12, %c0_13] : memref<1x96xf32, #tpu.memory_space<vmem>>, vector<1x96xf32>
      %14 = vector.broadcast %13 : vector<1x96xf32> to vector<16x96xf32>
      %15 = arith.addf %12, %14 : vector<16x96xf32>
      %16 = vector.extract_strided_slice %15 {offsets = [0, 0], sizes = [16, 32], strides = [1, 1]} : vector<16x96xf32> to vector<16x32xf32>
      %c0_14 = arith.constant 0 : index
      %c0_15 = arith.constant 0 : index
      %17 = vector.load %arg5[%c0_14, %c0_15] : memref<16x32xf32, #tpu.memory_space<vmem>>, vector<16x32xf32>
      tpu.vector_store %arg5[%c0_14, %c0_15], %16 {strides = array<i32>} : memref<16x32xf32, #tpu.memory_space<vmem>>, vector<16x32xf32>,
      %18 = vector.extract_strided_slice %15 {offsets = [0, 32], sizes = [16, 32], strides = [1, 1]} : vector<16x96xf32> to vector<16x32xf32>
      %c0_16 = arith.constant 0 : index
      %c0_17 = arith.constant 0 : index
      %19 = vector.load %arg6[%c0_16, %c0_17] : memref<16x32xf32, #tpu.memory_space<vmem>>, vector<16x32xf32>
      tpu.vector_store %arg6[%c0_16, %c0_17], %18 {strides = array<i32>} : memref<16x32xf32, #tpu.memory_space<vmem>>, vector<16x32xf32>,
      %20 = vector.extract_strided_slice %15 {offsets = [0, 64], sizes = [16, 32], strides = [1, 1]} : vector<16x96xf32> to vector<16x32xf32>
      %c0_18 = arith.constant 0 : index
      %c0_19 = arith.constant 0 : index
      %21 = vector.load %arg7[%c0_18, %c0_19] : memref<16x32xf32, #tpu.memory_space<vmem>>, vector<16x32xf32>
      tpu.vector_store %arg7[%c0_18, %c0_19], %20 {strides = array<i32>} : memref<16x32xf32, #tpu.memory_space<vmem>>, vector<16x32xf32>,
    } else {
    }
    return
  }
  func.func @transform_0(%arg0: i32, %arg1: i32) -> (i32, i32) {
    %c0_i32 = arith.constant 0 : i32
    return %arg0, %arg1 : i32, i32
  }
  func.func @transform_1(%arg0: i32, %arg1: i32) -> (i32, i32) {
    %c0_i32 = arith.constant 0 : i32
    %c0_i32_0 = arith.constant 0 : i32
    return %arg1, %c0_i32 : i32, i32
  }
  func.func @transform_2(%arg0: i32, %arg1: i32) -> (i32, i32) {
    %c0_i32 = arith.constant 0 : i32
    %c0_i32_0 = arith.constant 0 : i32
    %c0_i32_1 = arith.constant 0 : i32
    return %c0_i32, %c0_i32_0 : i32, i32
  }
  func.func @transform_3(%arg0: i32, %arg1: i32) -> (i32, i32) {
    %c0_i32 = arith.constant 0 : i32
    %c0_i32_0 = arith.constant 0 : i32
    return %arg0, %c0_i32 : i32, i32
  }
  func.func @transform_4(%arg0: i32, %arg1: i32) -> (i32, i32) {
    %c0_i32 = arith.constant 0 : i32
    %c0_i32_0 = arith.constant 0 : i32
    return %arg0, %c0_i32 : i32, i32
  }
  func.func @transform_5(%arg0: i32, %arg1: i32) -> (i32, i32) {
    %c0_i32 = arith.constant 0 : i32
    %c0_i32_0 = arith.constant 0 : i32
    return %arg0, %c0_i32 : i32, i32
  }
}

module attributes {stable_mosaic.version = 11 : i64} {
  func.func @_mha_kernel(%arg0: i32, %arg1: memref<1x8x32xf32, #tpu.memory_space<vmem>>, %arg2: memref<1x8x32xf32, #tpu.memory_space<vmem>>, %arg3: memref<1x8x32xf32, #tpu.memory_space<vmem>>, %arg4: memref<1x8x8xf32, #tpu.memory_space<vmem>>, %arg5: memref<8x8xf32, #tpu.memory_space<vmem>>, %arg6: memref<4xf32, #tpu.memory_space<smem>>, %arg7: memref<1x8x32xf32, #tpu.memory_space<vmem>>, %arg8: memref<1x4x8x8xf32, #tpu.memory_space<vmem>>) attributes {dimension_semantics = [#tpu.dimension_semantics<parallel>], iteration_bounds = array<i64: 2>, scalar_prefetch = 0 : i64, scratch_operands = 0 : i64, tpu.core_type = #tpu.core_type<tc>, window_params = [{transform_indices = @transform_0, window_bounds = array<i64: 1, 8, 32>}, {transform_indices = @transform_1, window_bounds = array<i64: 1, 8, 32>}, {transform_indices = @transform_2, window_bounds = array<i64: 1, 8, 32>}, {transform_indices = @transform_3, window_bounds = array<i64: 1, 8, 8>}, {pipeline_mode = #tpu.pipeline_mode<synchronous>, transform_indices = @transform_4, window_bounds = array<i64: 8, 8>}, {transform_indices = @transform_5, window_bounds = array<i64: 4>}, {transform_indices = @transform_6, window_bounds = array<i64: 1, 8, 32>}, {transform_indices = @transform_7, window_bounds = array<i64: 1, 4, 8, 8>}]} {
    %c0 = arith.constant 0 : index
    %c0_0 = arith.constant 0 : index
    %c0_1 = arith.constant 0 : index
    %0 = vector.load %arg1[%c0, %c0_0, %c0_1] : memref<1x8x32xf32, #tpu.memory_space<vmem>>, vector<1x8x32xf32>
    %1 = vector.shape_cast %0 : vector<1x8x32xf32> to vector<8x32xf32>
    %c0_2 = arith.constant 0 : index
    %c0_3 = arith.constant 0 : index
    %c0_4 = arith.constant 0 : index
    %2 = vector.load %arg2[%c0_2, %c0_3, %c0_4] : memref<1x8x32xf32, #tpu.memory_space<vmem>>, vector<1x8x32xf32>
    %3 = vector.shape_cast %2 : vector<1x8x32xf32> to vector<8x32xf32>
    %c0_5 = arith.constant 0 : index
    %c0_6 = arith.constant 0 : index
    %c0_7 = arith.constant 0 : index
    %4 = vector.load %arg3[%c0_5, %c0_6, %c0_7] : memref<1x8x32xf32, #tpu.memory_space<vmem>>, vector<1x8x32xf32>
    %5 = vector.shape_cast %4 : vector<1x8x32xf32> to vector<8x32xf32>
    %c0_8 = arith.constant 0 : index
    %c0_9 = arith.constant 0 : index
    %c0_10 = arith.constant 0 : index
    %6 = vector.load %arg4[%c0_8, %c0_9, %c0_10] : memref<1x8x8xf32, #tpu.memory_space<vmem>>, vector<1x8x8xf32>
    %7 = vector.shape_cast %6 : vector<1x8x8xf32> to vector<8x8xf32>
    %cst = arith.constant 0.000000e+00 : f32
    %8 = vector.broadcast %cst : f32 to vector<8x8xf32>
    %9 = arith.cmpf ogt, %7, %8 : vector<8x8xf32>
    %c0_11 = arith.constant 0 : index
    %c0_12 = arith.constant 0 : index
    %10 = vector.load %arg5[%c0_11, %c0_12] : memref<8x8xf32, #tpu.memory_space<vmem>>, vector<8x8xf32>
    %11 = vector.extract_strided_slice %1 {offsets = [0, 0], sizes = [8, 8], strides = [1, 1]} : vector<8x32xf32> to vector<8x8xf32>
    %12 = vector.extract_strided_slice %3 {offsets = [0, 0], sizes = [8, 8], strides = [1, 1]} : vector<8x32xf32> to vector<8x8xf32>
    %13 = vector.extract_strided_slice %5 {offsets = [0, 0], sizes = [8, 8], strides = [1, 1]} : vector<8x32xf32> to vector<8x8xf32>
    %14 = tpu.transpose %12, [1, 0] : vector<8x8xf32> -> vector<8x8xf32>
    %cst_13 = arith.constant dense<0.000000e+00> : vector<8x8xf32>
    %15 = tpu.matmul %11, %14, %cst_13 {dimension_numbers = #tpu.dot_dimension_numbers<[1], [0], [0], [1], [0, 0, 1, 1], [], []>} : vector<8x8xf32>, vector<8x8xf32>, vector<8x8xf32> -> vector<8x8xf32>
    %cst_14 = arith.constant 0.353553385 : f32
    %16 = vector.broadcast %cst_14 : f32 to vector<8x8xf32>
    %17 = arith.mulf %15, %16 : vector<8x8xf32>
    %cst_15 = arith.constant -1.000000e+32 : f32
    %18 = vector.broadcast %cst_15 : f32 to vector<8x8xf32>
    %19 = arith.select %9, %17, %18 : vector<8x8xi1>, vector<8x8xf32>
    %cst_16 = arith.constant dense<0xFF800000> : vector<8xf32>
    %20 = vector.multi_reduction <maximumf>, %19, %cst_16 [1] : vector<8x8xf32> to vector<8xf32>
    %21 = vector.shape_cast %20 : vector<8xf32> to vector<8x1xf32>
    %22 = vector.broadcast %21 : vector<8x1xf32> to vector<8x8xf32>
    %23 = arith.subf %19, %22 : vector<8x8xf32>
    %24 = math.exp %23 : vector<8x8xf32>
    %cst_17 = arith.constant dense<0.000000e+00> : vector<8xf32>
    %25 = vector.multi_reduction <add>, %24, %cst_17 [1] : vector<8x8xf32> to vector<8xf32>
    %26 = vector.shape_cast %25 : vector<8xf32> to vector<8x1xf32>
    %27 = tpu.reciprocal %26 {approx = true} : vector<8x1xf32> -> vector<8x1xf32>
    %28 = vector.broadcast %27 : vector<8x1xf32> to vector<8x8xf32>
    %29 = arith.mulf %24, %28 : vector<8x8xf32>
    %30 = arith.mulf %29, %7 : vector<8x8xf32>
    %c0_18 = arith.constant 0 : index
    %31 = memref.load %arg6[%c0_18] : memref<4xf32, #tpu.memory_space<smem>>
    %32 = vector.broadcast %31 : f32 to vector<8x8xf32>
    %33 = arith.mulf %32, %30 : vector<8x8xf32>
    %cst_19 = arith.constant 1.000000e+00 : f32
    %34 = vector.broadcast %cst_19 : f32 to vector<8x8xf32>
    %35 = arith.addf %33, %34 : vector<8x8xf32>
    %36 = tpu.reciprocal %35 {approx = true} : vector<8x8xf32> -> vector<8x8xf32>
    %37 = arith.mulf %10, %36 : vector<8x8xf32>
    %38 = math.exp %37 : vector<8x8xf32>
    %39 = arith.mulf %17, %38 : vector<8x8xf32>
    %cst_20 = arith.constant -1.000000e+32 : f32
    %40 = vector.broadcast %cst_20 : f32 to vector<8x8xf32>
    %41 = arith.select %9, %39, %40 : vector<8x8xi1>, vector<8x8xf32>
    %cst_21 = arith.constant dense<0xFF800000> : vector<8xf32>
    %42 = vector.multi_reduction <maximumf>, %41, %cst_21 [1] : vector<8x8xf32> to vector<8xf32>
    %43 = vector.shape_cast %42 : vector<8xf32> to vector<8x1xf32>
    %44 = vector.broadcast %43 : vector<8x1xf32> to vector<8x8xf32>
    %45 = arith.subf %41, %44 : vector<8x8xf32>
    %46 = math.exp %45 : vector<8x8xf32>
    %cst_22 = arith.constant dense<0.000000e+00> : vector<8xf32>
    %47 = vector.multi_reduction <add>, %46, %cst_22 [1] : vector<8x8xf32> to vector<8xf32>
    %48 = vector.shape_cast %47 : vector<8xf32> to vector<8x1xf32>
    %49 = tpu.reciprocal %48 {approx = true} : vector<8x1xf32> -> vector<8x1xf32>
    %50 = vector.broadcast %49 : vector<8x1xf32> to vector<8x8xf32>
    %51 = arith.mulf %46, %50 : vector<8x8xf32>
    %52 = arith.mulf %51, %7 : vector<8x8xf32>
    %cst_23 = arith.constant dense<0.000000e+00> : vector<8x8xf32>
    %53 = tpu.matmul %52, %13, %cst_23 {dimension_numbers = #tpu.dot_dimension_numbers<[1], [0], [0], [1], [0, 0, 1, 1], [], []>} : vector<8x8xf32>, vector<8x8xf32>, vector<8x8xf32> -> vector<8x8xf32>
    %c0_24 = arith.constant 0 : index
    %c0_25 = arith.constant 0 : index
    %c0_26 = arith.constant 0 : index
    %c0_27 = arith.constant 0 : index
    %54 = vector.load %arg8[%c0_24, %c0_25, %c0_26, %c0_27] : memref<1x4x8x8xf32, #tpu.memory_space<vmem>>, vector<1x1x8x8xf32>
    %55 = vector.shape_cast %54 : vector<1x1x8x8xf32> to vector<8x8xf32>
    %56 = vector.shape_cast %52 : vector<8x8xf32> to vector<1x1x8x8xf32>
    tpu.vector_store %arg8[%c0_24, %c0_25, %c0_26, %c0_27], %56 {strides = array<i32>} : memref<1x4x8x8xf32, #tpu.memory_space<vmem>>, vector<1x1x8x8xf32>,
    %57 = vector.extract_strided_slice %1 {offsets = [0, 8], sizes = [8, 8], strides = [1, 1]} : vector<8x32xf32> to vector<8x8xf32>
    %58 = vector.extract_strided_slice %3 {offsets = [0, 8], sizes = [8, 8], strides = [1, 1]} : vector<8x32xf32> to vector<8x8xf32>
    %59 = vector.extract_strided_slice %5 {offsets = [0, 8], sizes = [8, 8], strides = [1, 1]} : vector<8x32xf32> to vector<8x8xf32>
    %60 = tpu.transpose %58, [1, 0] : vector<8x8xf32> -> vector<8x8xf32>
    %cst_28 = arith.constant dense<0.000000e+00> : vector<8x8xf32>
    %61 = tpu.matmul %57, %60, %cst_28 {dimension_numbers = #tpu.dot_dimension_numbers<[1], [0], [0], [1], [0, 0, 1, 1], [], []>} : vector<8x8xf32>, vector<8x8xf32>, vector<8x8xf32> -> vector<8x8xf32>
    %cst_29 = arith.constant 0.353553385 : f32
    %62 = vector.broadcast %cst_29 : f32 to vector<8x8xf32>
    %63 = arith.mulf %61, %62 : vector<8x8xf32>
    %cst_30 = arith.constant -1.000000e+32 : f32
    %64 = vector.broadcast %cst_30 : f32 to vector<8x8xf32>
    %65 = arith.select %9, %63, %64 : vector<8x8xi1>, vector<8x8xf32>
    %cst_31 = arith.constant dense<0xFF800000> : vector<8xf32>
    %66 = vector.multi_reduction <maximumf>, %65, %cst_31 [1] : vector<8x8xf32> to vector<8xf32>
    %67 = vector.shape_cast %66 : vector<8xf32> to vector<8x1xf32>
    %68 = vector.broadcast %67 : vector<8x1xf32> to vector<8x8xf32>
    %69 = arith.subf %65, %68 : vector<8x8xf32>
    %70 = math.exp %69 : vector<8x8xf32>
    %cst_32 = arith.constant dense<0.000000e+00> : vector<8xf32>
    %71 = vector.multi_reduction <add>, %70, %cst_32 [1] : vector<8x8xf32> to vector<8xf32>
    %72 = vector.shape_cast %71 : vector<8xf32> to vector<8x1xf32>
    %73 = tpu.reciprocal %72 {approx = true} : vector<8x1xf32> -> vector<8x1xf32>
    %74 = vector.broadcast %73 : vector<8x1xf32> to vector<8x8xf32>
    %75 = arith.mulf %70, %74 : vector<8x8xf32>
    %76 = arith.mulf %75, %7 : vector<8x8xf32>
    %c1 = arith.constant 1 : index
    %77 = memref.load %arg6[%c1] : memref<4xf32, #tpu.memory_space<smem>>
    %78 = vector.broadcast %77 : f32 to vector<8x8xf32>
    %79 = arith.mulf %78, %76 : vector<8x8xf32>
    %cst_33 = arith.constant 1.000000e+00 : f32
    %80 = vector.broadcast %cst_33 : f32 to vector<8x8xf32>
    %81 = arith.addf %79, %80 : vector<8x8xf32>
    %82 = tpu.reciprocal %81 {approx = true} : vector<8x8xf32> -> vector<8x8xf32>
    %83 = arith.mulf %10, %82 : vector<8x8xf32>
    %84 = math.exp %83 : vector<8x8xf32>
    %85 = arith.mulf %63, %84 : vector<8x8xf32>
    %cst_34 = arith.constant -1.000000e+32 : f32
    %86 = vector.broadcast %cst_34 : f32 to vector<8x8xf32>
    %87 = arith.select %9, %85, %86 : vector<8x8xi1>, vector<8x8xf32>
    %cst_35 = arith.constant dense<0xFF800000> : vector<8xf32>
    %88 = vector.multi_reduction <maximumf>, %87, %cst_35 [1] : vector<8x8xf32> to vector<8xf32>
    %89 = vector.shape_cast %88 : vector<8xf32> to vector<8x1xf32>
    %90 = vector.broadcast %89 : vector<8x1xf32> to vector<8x8xf32>
    %91 = arith.subf %87, %90 : vector<8x8xf32>
    %92 = math.exp %91 : vector<8x8xf32>
    %cst_36 = arith.constant dense<0.000000e+00> : vector<8xf32>
    %93 = vector.multi_reduction <add>, %92, %cst_36 [1] : vector<8x8xf32> to vector<8xf32>
    %94 = vector.shape_cast %93 : vector<8xf32> to vector<8x1xf32>
    %95 = tpu.reciprocal %94 {approx = true} : vector<8x1xf32> -> vector<8x1xf32>
    %96 = vector.broadcast %95 : vector<8x1xf32> to vector<8x8xf32>
    %97 = arith.mulf %92, %96 : vector<8x8xf32>
    %98 = arith.mulf %97, %7 : vector<8x8xf32>
    %cst_37 = arith.constant dense<0.000000e+00> : vector<8x8xf32>
    %99 = tpu.matmul %98, %59, %cst_37 {dimension_numbers = #tpu.dot_dimension_numbers<[1], [0], [0], [1], [0, 0, 1, 1], [], []>} : vector<8x8xf32>, vector<8x8xf32>, vector<8x8xf32> -> vector<8x8xf32>
    %c0_38 = arith.constant 0 : index
    %c1_39 = arith.constant 1 : index
    %c0_40 = arith.constant 0 : index
    %c0_41 = arith.constant 0 : index
    %100 = vector.load %arg8[%c0_38, %c1_39, %c0_40, %c0_41] : memref<1x4x8x8xf32, #tpu.memory_space<vmem>>, vector<1x1x8x8xf32>
    %101 = vector.shape_cast %100 : vector<1x1x8x8xf32> to vector<8x8xf32>
    %102 = vector.shape_cast %98 : vector<8x8xf32> to vector<1x1x8x8xf32>
    tpu.vector_store %arg8[%c0_38, %c1_39, %c0_40, %c0_41], %102 {strides = array<i32>} : memref<1x4x8x8xf32, #tpu.memory_space<vmem>>, vector<1x1x8x8xf32>,
    %103 = vector.extract_strided_slice %1 {offsets = [0, 16], sizes = [8, 8], strides = [1, 1]} : vector<8x32xf32> to vector<8x8xf32>
    %104 = vector.extract_strided_slice %3 {offsets = [0, 16], sizes = [8, 8], strides = [1, 1]} : vector<8x32xf32> to vector<8x8xf32>
    %105 = vector.extract_strided_slice %5 {offsets = [0, 16], sizes = [8, 8], strides = [1, 1]} : vector<8x32xf32> to vector<8x8xf32>
    %106 = tpu.transpose %104, [1, 0] : vector<8x8xf32> -> vector<8x8xf32>
    %cst_42 = arith.constant dense<0.000000e+00> : vector<8x8xf32>
    %107 = tpu.matmul %103, %106, %cst_42 {dimension_numbers = #tpu.dot_dimension_numbers<[1], [0], [0], [1], [0, 0, 1, 1], [], []>} : vector<8x8xf32>, vector<8x8xf32>, vector<8x8xf32> -> vector<8x8xf32>
    %cst_43 = arith.constant 0.353553385 : f32
    %108 = vector.broadcast %cst_43 : f32 to vector<8x8xf32>
    %109 = arith.mulf %107, %108 : vector<8x8xf32>
    %cst_44 = arith.constant -1.000000e+32 : f32
    %110 = vector.broadcast %cst_44 : f32 to vector<8x8xf32>
    %111 = arith.select %9, %109, %110 : vector<8x8xi1>, vector<8x8xf32>
    %cst_45 = arith.constant dense<0xFF800000> : vector<8xf32>
    %112 = vector.multi_reduction <maximumf>, %111, %cst_45 [1] : vector<8x8xf32> to vector<8xf32>
    %113 = vector.shape_cast %112 : vector<8xf32> to vector<8x1xf32>
    %114 = vector.broadcast %113 : vector<8x1xf32> to vector<8x8xf32>
    %115 = arith.subf %111, %114 : vector<8x8xf32>
    %116 = math.exp %115 : vector<8x8xf32>
    %cst_46 = arith.constant dense<0.000000e+00> : vector<8xf32>
    %117 = vector.multi_reduction <add>, %116, %cst_46 [1] : vector<8x8xf32> to vector<8xf32>
    %118 = vector.shape_cast %117 : vector<8xf32> to vector<8x1xf32>
    %119 = tpu.reciprocal %118 {approx = true} : vector<8x1xf32> -> vector<8x1xf32>
    %120 = vector.broadcast %119 : vector<8x1xf32> to vector<8x8xf32>
    %121 = arith.mulf %116, %120 : vector<8x8xf32>
    %122 = arith.mulf %121, %7 : vector<8x8xf32>
    %c2 = arith.constant 2 : index
    %123 = memref.load %arg6[%c2] : memref<4xf32, #tpu.memory_space<smem>>
    %124 = vector.broadcast %123 : f32 to vector<8x8xf32>
    %125 = arith.mulf %124, %122 : vector<8x8xf32>
    %cst_47 = arith.constant 1.000000e+00 : f32
    %126 = vector.broadcast %cst_47 : f32 to vector<8x8xf32>
    %127 = arith.addf %125, %126 : vector<8x8xf32>
    %128 = tpu.reciprocal %127 {approx = true} : vector<8x8xf32> -> vector<8x8xf32>
    %129 = arith.mulf %10, %128 : vector<8x8xf32>
    %130 = math.exp %129 : vector<8x8xf32>
    %131 = arith.mulf %109, %130 : vector<8x8xf32>
    %cst_48 = arith.constant -1.000000e+32 : f32
    %132 = vector.broadcast %cst_48 : f32 to vector<8x8xf32>
    %133 = arith.select %9, %131, %132 : vector<8x8xi1>, vector<8x8xf32>
    %cst_49 = arith.constant dense<0xFF800000> : vector<8xf32>
    %134 = vector.multi_reduction <maximumf>, %133, %cst_49 [1] : vector<8x8xf32> to vector<8xf32>
    %135 = vector.shape_cast %134 : vector<8xf32> to vector<8x1xf32>
    %136 = vector.broadcast %135 : vector<8x1xf32> to vector<8x8xf32>
    %137 = arith.subf %133, %136 : vector<8x8xf32>
    %138 = math.exp %137 : vector<8x8xf32>
    %cst_50 = arith.constant dense<0.000000e+00> : vector<8xf32>
    %139 = vector.multi_reduction <add>, %138, %cst_50 [1] : vector<8x8xf32> to vector<8xf32>
    %140 = vector.shape_cast %139 : vector<8xf32> to vector<8x1xf32>
    %141 = tpu.reciprocal %140 {approx = true} : vector<8x1xf32> -> vector<8x1xf32>
    %142 = vector.broadcast %141 : vector<8x1xf32> to vector<8x8xf32>
    %143 = arith.mulf %138, %142 : vector<8x8xf32>
    %144 = arith.mulf %143, %7 : vector<8x8xf32>
    %cst_51 = arith.constant dense<0.000000e+00> : vector<8x8xf32>
    %145 = tpu.matmul %144, %105, %cst_51 {dimension_numbers = #tpu.dot_dimension_numbers<[1], [0], [0], [1], [0, 0, 1, 1], [], []>} : vector<8x8xf32>, vector<8x8xf32>, vector<8x8xf32> -> vector<8x8xf32>
    %c0_52 = arith.constant 0 : index
    %c2_53 = arith.constant 2 : index
    %c0_54 = arith.constant 0 : index
    %c0_55 = arith.constant 0 : index
    %146 = vector.load %arg8[%c0_52, %c2_53, %c0_54, %c0_55] : memref<1x4x8x8xf32, #tpu.memory_space<vmem>>, vector<1x1x8x8xf32>
    %147 = vector.shape_cast %146 : vector<1x1x8x8xf32> to vector<8x8xf32>
    %148 = vector.shape_cast %144 : vector<8x8xf32> to vector<1x1x8x8xf32>
    tpu.vector_store %arg8[%c0_52, %c2_53, %c0_54, %c0_55], %148 {strides = array<i32>} : memref<1x4x8x8xf32, #tpu.memory_space<vmem>>, vector<1x1x8x8xf32>,
    %149 = vector.extract_strided_slice %1 {offsets = [0, 24], sizes = [8, 8], strides = [1, 1]} : vector<8x32xf32> to vector<8x8xf32>
    %150 = vector.extract_strided_slice %3 {offsets = [0, 24], sizes = [8, 8], strides = [1, 1]} : vector<8x32xf32> to vector<8x8xf32>
    %151 = vector.extract_strided_slice %5 {offsets = [0, 24], sizes = [8, 8], strides = [1, 1]} : vector<8x32xf32> to vector<8x8xf32>
    %152 = tpu.transpose %150, [1, 0] : vector<8x8xf32> -> vector<8x8xf32>
    %cst_56 = arith.constant dense<0.000000e+00> : vector<8x8xf32>
    %153 = tpu.matmul %149, %152, %cst_56 {dimension_numbers = #tpu.dot_dimension_numbers<[1], [0], [0], [1], [0, 0, 1, 1], [], []>} : vector<8x8xf32>, vector<8x8xf32>, vector<8x8xf32> -> vector<8x8xf32>
    %cst_57 = arith.constant 0.353553385 : f32
    %154 = vector.broadcast %cst_57 : f32 to vector<8x8xf32>
    %155 = arith.mulf %153, %154 : vector<8x8xf32>
    %cst_58 = arith.constant -1.000000e+32 : f32
    %156 = vector.broadcast %cst_58 : f32 to vector<8x8xf32>
    %157 = arith.select %9, %155, %156 : vector<8x8xi1>, vector<8x8xf32>
    %cst_59 = arith.constant dense<0xFF800000> : vector<8xf32>
    %158 = vector.multi_reduction <maximumf>, %157, %cst_59 [1] : vector<8x8xf32> to vector<8xf32>
    %159 = vector.shape_cast %158 : vector<8xf32> to vector<8x1xf32>
    %160 = vector.broadcast %159 : vector<8x1xf32> to vector<8x8xf32>
    %161 = arith.subf %157, %160 : vector<8x8xf32>
    %162 = math.exp %161 : vector<8x8xf32>
    %cst_60 = arith.constant dense<0.000000e+00> : vector<8xf32>
    %163 = vector.multi_reduction <add>, %162, %cst_60 [1] : vector<8x8xf32> to vector<8xf32>
    %164 = vector.shape_cast %163 : vector<8xf32> to vector<8x1xf32>
    %165 = tpu.reciprocal %164 {approx = true} : vector<8x1xf32> -> vector<8x1xf32>
    %166 = vector.broadcast %165 : vector<8x1xf32> to vector<8x8xf32>
    %167 = arith.mulf %162, %166 : vector<8x8xf32>
    %168 = arith.mulf %167, %7 : vector<8x8xf32>
    %c3 = arith.constant 3 : index
    %169 = memref.load %arg6[%c3] : memref<4xf32, #tpu.memory_space<smem>>
    %170 = vector.broadcast %169 : f32 to vector<8x8xf32>
    %171 = arith.mulf %170, %168 : vector<8x8xf32>
    %cst_61 = arith.constant 1.000000e+00 : f32
    %172 = vector.broadcast %cst_61 : f32 to vector<8x8xf32>
    %173 = arith.addf %171, %172 : vector<8x8xf32>
    %174 = tpu.reciprocal %173 {approx = true} : vector<8x8xf32> -> vector<8x8xf32>
    %175 = arith.mulf %10, %174 : vector<8x8xf32>
    %176 = math.exp %175 : vector<8x8xf32>
    %177 = arith.mulf %155, %176 : vector<8x8xf32>
    %cst_62 = arith.constant -1.000000e+32 : f32
    %178 = vector.broadcast %cst_62 : f32 to vector<8x8xf32>
    %179 = arith.select %9, %177, %178 : vector<8x8xi1>, vector<8x8xf32>
    %cst_63 = arith.constant dense<0xFF800000> : vector<8xf32>
    %180 = vector.multi_reduction <maximumf>, %179, %cst_63 [1] : vector<8x8xf32> to vector<8xf32>
    %181 = vector.shape_cast %180 : vector<8xf32> to vector<8x1xf32>
    %182 = vector.broadcast %181 : vector<8x1xf32> to vector<8x8xf32>
    %183 = arith.subf %179, %182 : vector<8x8xf32>
    %184 = math.exp %183 : vector<8x8xf32>
    %cst_64 = arith.constant dense<0.000000e+00> : vector<8xf32>
    %185 = vector.multi_reduction <add>, %184, %cst_64 [1] : vector<8x8xf32> to vector<8xf32>
    %186 = vector.shape_cast %185 : vector<8xf32> to vector<8x1xf32>
    %187 = tpu.reciprocal %186 {approx = true} : vector<8x1xf32> -> vector<8x1xf32>
    %188 = vector.broadcast %187 : vector<8x1xf32> to vector<8x8xf32>
    %189 = arith.mulf %184, %188 : vector<8x8xf32>
    %190 = arith.mulf %189, %7 : vector<8x8xf32>
    %cst_65 = arith.constant dense<0.000000e+00> : vector<8x8xf32>
    %191 = tpu.matmul %190, %151, %cst_65 {dimension_numbers = #tpu.dot_dimension_numbers<[1], [0], [0], [1], [0, 0, 1, 1], [], []>} : vector<8x8xf32>, vector<8x8xf32>, vector<8x8xf32> -> vector<8x8xf32>
    %c0_66 = arith.constant 0 : index
    %c3_67 = arith.constant 3 : index
    %c0_68 = arith.constant 0 : index
    %c0_69 = arith.constant 0 : index
    %192 = vector.load %arg8[%c0_66, %c3_67, %c0_68, %c0_69] : memref<1x4x8x8xf32, #tpu.memory_space<vmem>>, vector<1x1x8x8xf32>
    %193 = vector.shape_cast %192 : vector<1x1x8x8xf32> to vector<8x8xf32>
    %194 = vector.shape_cast %190 : vector<8x8xf32> to vector<1x1x8x8xf32>
    tpu.vector_store %arg8[%c0_66, %c3_67, %c0_68, %c0_69], %194 {strides = array<i32>} : memref<1x4x8x8xf32, #tpu.memory_space<vmem>>, vector<1x1x8x8xf32>,
    %195 = tpu.concatenate %53, %99, %145, %191 in 1 : vector<8x8xf32>, vector<8x8xf32>, vector<8x8xf32>, vector<8x8xf32> -> vector<8x32xf32>
    %c0_70 = arith.constant 0 : index
    %c0_71 = arith.constant 0 : index
    %c0_72 = arith.constant 0 : index
    %196 = vector.load %arg7[%c0_70, %c0_71, %c0_72] : memref<1x8x32xf32, #tpu.memory_space<vmem>>, vector<1x8x32xf32>
    %197 = vector.shape_cast %196 : vector<1x8x32xf32> to vector<8x32xf32>
    %198 = vector.shape_cast %195 : vector<8x32xf32> to vector<1x8x32xf32>
    tpu.vector_store %arg7[%c0_70, %c0_71, %c0_72], %198 {strides = array<i32>} : memref<1x8x32xf32, #tpu.memory_space<vmem>>, vector<1x8x32xf32>,
    return
  }
  func.func @transform_0(%arg0: i32) -> (i32, i32, i32) {
    %c0_i32 = arith.constant 0 : i32
    %c0_i32_0 = arith.constant 0 : i32
    %c0_i32_1 = arith.constant 0 : i32
    return %arg0, %c0_i32, %c0_i32_0 : i32, i32, i32
  }
  func.func @transform_1(%arg0: i32) -> (i32, i32, i32) {
    %c0_i32 = arith.constant 0 : i32
    %c0_i32_0 = arith.constant 0 : i32
    %c0_i32_1 = arith.constant 0 : i32
    return %arg0, %c0_i32, %c0_i32_0 : i32, i32, i32
  }
  func.func @transform_2(%arg0: i32) -> (i32, i32, i32) {
    %c0_i32 = arith.constant 0 : i32
    %c0_i32_0 = arith.constant 0 : i32
    %c0_i32_1 = arith.constant 0 : i32
    return %arg0, %c0_i32, %c0_i32_0 : i32, i32, i32
  }
  func.func @transform_3(%arg0: i32) -> (i32, i32, i32) {
    %c0_i32 = arith.constant 0 : i32
    %c0_i32_0 = arith.constant 0 : i32
    %c0_i32_1 = arith.constant 0 : i32
    return %arg0, %c0_i32, %c0_i32_0 : i32, i32, i32
  }
  func.func @transform_4(%arg0: i32) -> (i32, i32) {
    %c0_i32 = arith.constant 0 : i32
    %c0_i32_0 = arith.constant 0 : i32
    %c0_i32_1 = arith.constant 0 : i32
    return %c0_i32, %c0_i32_0 : i32, i32
  }
  func.func @transform_5(%arg0: i32) -> i32 {
    %c0_i32 = arith.constant 0 : i32
    %c0_i32_0 = arith.constant 0 : i32
    return %c0_i32 : i32
  }
  func.func @transform_6(%arg0: i32) -> (i32, i32, i32) {
    %c0_i32 = arith.constant 0 : i32
    %c0_i32_0 = arith.constant 0 : i32
    %c0_i32_1 = arith.constant 0 : i32
    return %arg0, %c0_i32, %c0_i32_0 : i32, i32, i32
  }
  func.func @transform_7(%arg0: i32) -> (i32, i32, i32, i32) {
    %c0_i32 = arith.constant 0 : i32
    %c0_i32_0 = arith.constant 0 : i32
    %c0_i32_1 = arith.constant 0 : i32
    %c0_i32_2 = arith.constant 0 : i32
    return %arg0, %c0_i32, %c0_i32_0, %c0_i32_1 : i32, i32, i32, i32
  }
}

module attributes {stable_mosaic.version = 11 : i64} {
  func.func @_linear_bias_kernel(%arg0: i32, %arg1: i32, %arg2: i32, %arg3: memref<16x32xf32, #tpu.memory_space<vmem>>, %arg4: memref<32x32xf32, #tpu.memory_space<vmem>>, %arg5: memref<1x32xf32, #tpu.memory_space<vmem>>, %arg6: memref<16x32xf32, #tpu.memory_space<vmem>>, %arg7: memref<16x32xf32, #tpu.memory_space<vmem>>) attributes {dimension_semantics = [#tpu.dimension_semantics<parallel>, #tpu.dimension_semantics<parallel>, #tpu.dimension_semantics<arbitrary>], iteration_bounds = array<i64: 1, 1, 1>, scalar_prefetch = 0 : i64, scratch_operands = 1 : i64, tpu.core_type = #tpu.core_type<tc>, window_params = [{transform_indices = @transform_0, window_bounds = array<i64: 16, 32>}, {transform_indices = @transform_1, window_bounds = array<i64: 32, 32>}, {transform_indices = @transform_2, window_bounds = array<i64: 1, 32>}, {transform_indices = @transform_3, window_bounds = array<i64: 16, 32>}]} {
    %c0_i32 = arith.constant 0 : i32
    %0 = arith.cmpi eq, %arg2, %c0_i32 : i32
    %1 = arith.extui %0 : i1 to i32
    %c0_i32_0 = arith.constant 0 : i32
    %2 = arith.cmpi ne, %1, %c0_i32_0 : i32
    scf.if %2 {
      %cst_10 = arith.constant 0.000000e+00 : f32
      %12 = vector.broadcast %cst_10 : f32 to vector<16x32xf32>
      %c0_11 = arith.constant 0 : index
      %c0_12 = arith.constant 0 : index
      %13 = vector.load %arg7[%c0_11, %c0_12] : memref<16x32xf32, #tpu.memory_space<vmem>>, vector<16x32xf32>
      tpu.vector_store %arg7[%c0_11, %c0_12], %12 {strides = array<i32>} : memref<16x32xf32, #tpu.memory_space<vmem>>, vector<16x32xf32>,
    } else {
    }
    %c0 = arith.constant 0 : index
    %c0_1 = arith.constant 0 : index
    %3 = vector.load %arg7[%c0, %c0_1] : memref<16x32xf32, #tpu.memory_space<vmem>>, vector<16x32xf32>
    %c0_2 = arith.constant 0 : index
    %c0_3 = arith.constant 0 : index
    %4 = vector.load %arg3[%c0_2, %c0_3] : memref<16x32xf32, #tpu.memory_space<vmem>>, vector<16x32xf32>
    %c0_4 = arith.constant 0 : index
    %c0_5 = arith.constant 0 : index
    %5 = vector.load %arg4[%c0_4, %c0_5] : memref<32x32xf32, #tpu.memory_space<vmem>>, vector<32x32xf32>
    %cst = arith.constant dense<0.000000e+00> : vector<16x32xf32>
    %6 = tpu.matmul %4, %5, %cst {dimension_numbers = #tpu.dot_dimension_numbers<[1], [0], [0], [1], [0, 0, 1, 1], [], []>} : vector<16x32xf32>, vector<32x32xf32>, vector<16x32xf32> -> vector<16x32xf32>
    %7 = arith.addf %3, %6 : vector<16x32xf32>
    %c0_6 = arith.constant 0 : index
    %c0_7 = arith.constant 0 : index
    %8 = vector.load %arg7[%c0_6, %c0_7] : memref<16x32xf32, #tpu.memory_space<vmem>>, vector<16x32xf32>
    tpu.vector_store %arg7[%c0_6, %c0_7], %7 {strides = array<i32>} : memref<16x32xf32, #tpu.memory_space<vmem>>, vector<16x32xf32>,
    %c0_i32_8 = arith.constant 0 : i32
    %9 = arith.cmpi eq, %arg2, %c0_i32_8 : i32
    %10 = arith.extui %9 : i1 to i32
    %c0_i32_9 = arith.constant 0 : i32
    %11 = arith.cmpi ne, %10, %c0_i32_9 : i32
    scf.if %11 {
      %c0_10 = arith.constant 0 : index
      %c0_11 = arith.constant 0 : index
      %12 = vector.load %arg7[%c0_10, %c0_11] : memref<16x32xf32, #tpu.memory_space<vmem>>, vector<16x32xf32>
      %c0_12 = arith.constant 0 : index
      %c0_13 = arith.constant 0 : index
      %13 = vector.load %arg5[%c0_12, %c0_13] : memref<1x32xf32, #tpu.memory_space<vmem>>, vector<1x32xf32>
      %14 = vector.broadcast %13 : vector<1x32xf32> to vector<16x32xf32>
      %15 = arith.addf %12, %14 : vector<16x32xf32>
      %c0_14 = arith.constant 0 : index
      %c0_15 = arith.constant 0 : index
      %16 = vector.load %arg6[%c0_14, %c0_15] : memref<16x32xf32, #tpu.memory_space<vmem>>, vector<16x32xf32>
      tpu.vector_store %arg6[%c0_14, %c0_15], %15 {strides = array<i32>} : memref<16x32xf32, #tpu.memory_space<vmem>>, vector<16x32xf32>,
    } else {
    }
    return
  }
  func.func @transform_0(%arg0: i32, %arg1: i32, %arg2: i32) -> (i32, i32) {
    %c0_i32 = arith.constant 0 : i32
    return %arg0, %arg2 : i32, i32
  }
  func.func @transform_1(%arg0: i32, %arg1: i32, %arg2: i32) -> (i32, i32) {
    %c0_i32 = arith.constant 0 : i32
    return %arg2, %arg1 : i32, i32
  }
  func.func @transform_2(%arg0: i32, %arg1: i32, %arg2: i32) -> (i32, i32) {
    %c0_i32 = arith.constant 0 : i32
    %c0_i32_0 = arith.constant 0 : i32
    return %c0_i32, %arg1 : i32, i32
  }
  func.func @transform_3(%arg0: i32, %arg1: i32, %arg2: i32) -> (i32, i32) {
    %c0_i32 = arith.constant 0 : i32
    return %arg0, %arg1 : i32, i32
  }
}

module attributes {stable_mosaic.version = 11 : i64} {
  func.func @_add_ln_kernel(%arg0: i32, %arg1: memref<16x32xf32, #tpu.memory_space<vmem>>, %arg2: memref<16x32xf32, #tpu.memory_space<vmem>>, %arg3: memref<1x32xf32, #tpu.memory_space<vmem>>, %arg4: memref<1x32xf32, #tpu.memory_space<vmem>>, %arg5: memref<16x32xf32, #tpu.memory_space<vmem>>) attributes {dimension_semantics = [#tpu.dimension_semantics<parallel>], iteration_bounds = array<i64: 1>, scalar_prefetch = 0 : i64, scratch_operands = 0 : i64, tpu.core_type = #tpu.core_type<tc>, window_params = [{transform_indices = @transform_0, window_bounds = array<i64: 16, 32>}, {transform_indices = @transform_1, window_bounds = array<i64: 16, 32>}, {pipeline_mode = #tpu.pipeline_mode<synchronous>, transform_indices = @transform_2, window_bounds = array<i64: 1, 32>}, {pipeline_mode = #tpu.pipeline_mode<synchronous>, transform_indices = @transform_3, window_bounds = array<i64: 1, 32>}, {transform_indices = @transform_4, window_bounds = array<i64: 16, 32>}]} {
    %c0 = arith.constant 0 : index
    %c0_0 = arith.constant 0 : index
    %0 = vector.load %arg1[%c0, %c0_0] : memref<16x32xf32, #tpu.memory_space<vmem>>, vector<16x32xf32>
    %c0_1 = arith.constant 0 : index
    %c0_2 = arith.constant 0 : index
    %1 = vector.load %arg2[%c0_1, %c0_2] : memref<16x32xf32, #tpu.memory_space<vmem>>, vector<16x32xf32>
    %2 = arith.addf %0, %1 : vector<16x32xf32>
    %cst = arith.constant dense<0.000000e+00> : vector<16xf32>
    %3 = vector.multi_reduction <add>, %2, %cst [1] : vector<16x32xf32> to vector<16xf32>
    %4 = vector.shape_cast %3 : vector<16xf32> to vector<16x1xf32>
    %cst_3 = arith.constant 3.200000e+01 : f32
    %5 = vector.broadcast %cst_3 : f32 to vector<16x1xf32>
    %6 = arith.divf %4, %5 : vector<16x1xf32>
    %7 = vector.broadcast %6 : vector<16x1xf32> to vector<16x32xf32>
    %8 = arith.subf %2, %7 : vector<16x32xf32>
    %9 = arith.mulf %8, %8 : vector<16x32xf32>
    %cst_4 = arith.constant dense<0.000000e+00> : vector<16xf32>
    %10 = vector.multi_reduction <add>, %9, %cst_4 [1] : vector<16x32xf32> to vector<16xf32>
    %11 = vector.shape_cast %10 : vector<16xf32> to vector<16x1xf32>
    %cst_5 = arith.constant 3.200000e+01 : f32
    %12 = vector.broadcast %cst_5 : f32 to vector<16x1xf32>
    %13 = arith.divf %11, %12 : vector<16x1xf32>
    %cst_6 = arith.constant 9.99999996E-13 : f32
    %14 = vector.broadcast %cst_6 : f32 to vector<16x1xf32>
    %15 = arith.addf %13, %14 : vector<16x1xf32>
    %16 = math.rsqrt %15 : vector<16x1xf32>
    %17 = vector.broadcast %16 : vector<16x1xf32> to vector<16x32xf32>
    %18 = arith.mulf %8, %17 : vector<16x32xf32>
    %c0_7 = arith.constant 0 : index
    %c0_8 = arith.constant 0 : index
    %19 = vector.load %arg3[%c0_7, %c0_8] : memref<1x32xf32, #tpu.memory_space<vmem>>, vector<1x32xf32>
    %20 = vector.broadcast %19 : vector<1x32xf32> to vector<16x32xf32>
    %21 = arith.mulf %18, %20 : vector<16x32xf32>
    %c0_9 = arith.constant 0 : index
    %c0_10 = arith.constant 0 : index
    %22 = vector.load %arg4[%c0_9, %c0_10] : memref<1x32xf32, #tpu.memory_space<vmem>>, vector<1x32xf32>
    %23 = vector.broadcast %22 : vector<1x32xf32> to vector<16x32xf32>
    %24 = arith.addf %21, %23 : vector<16x32xf32>
    %c0_11 = arith.constant 0 : index
    %c0_12 = arith.constant 0 : index
    %25 = vector.load %arg5[%c0_11, %c0_12] : memref<16x32xf32, #tpu.memory_space<vmem>>, vector<16x32xf32>
    tpu.vector_store %arg5[%c0_11, %c0_12], %24 {strides = array<i32>} : memref<16x32xf32, #tpu.memory_space<vmem>>, vector<16x32xf32>,
    return
  }
  func.func @transform_0(%arg0: i32) -> (i32, i32) {
    %c0_i32 = arith.constant 0 : i32
    %c0_i32_0 = arith.constant 0 : i32
    return %arg0, %c0_i32 : i32, i32
  }
  func.func @transform_1(%arg0: i32) -> (i32, i32) {
    %c0_i32 = arith.constant 0 : i32
    %c0_i32_0 = arith.constant 0 : i32
    return %arg0, %c0_i32 : i32, i32
  }
  func.func @transform_2(%arg0: i32) -> (i32, i32) {
    %c0_i32 = arith.constant 0 : i32
    %c0_i32_0 = arith.constant 0 : i32
    %c0_i32_1 = arith.constant 0 : i32
    return %c0_i32, %c0_i32_0 : i32, i32
  }
  func.func @transform_3(%arg0: i32) -> (i32, i32) {
    %c0_i32 = arith.constant 0 : i32
    %c0_i32_0 = arith.constant 0 : i32
    %c0_i32_1 = arith.constant 0 : i32
    return %c0_i32, %c0_i32_0 : i32, i32
  }
  func.func @transform_4(%arg0: i32) -> (i32, i32) {
    %c0_i32 = arith.constant 0 : i32
    %c0_i32_0 = arith.constant 0 : i32
    return %arg0, %c0_i32 : i32, i32
  }
}

module attributes {stable_mosaic.version = 11 : i64} {
  func.func @_linear_bias_kernel(%arg0: i32, %arg1: i32, %arg2: i32, %arg3: memref<16x32xf32, #tpu.memory_space<vmem>>, %arg4: memref<32x32xf32, #tpu.memory_space<vmem>>, %arg5: memref<1x32xf32, #tpu.memory_space<vmem>>, %arg6: memref<16x32xf32, #tpu.memory_space<vmem>>, %arg7: memref<16x32xf32, #tpu.memory_space<vmem>>) attributes {dimension_semantics = [#tpu.dimension_semantics<parallel>, #tpu.dimension_semantics<parallel>, #tpu.dimension_semantics<arbitrary>], iteration_bounds = array<i64: 1, 1, 1>, scalar_prefetch = 0 : i64, scratch_operands = 1 : i64, tpu.core_type = #tpu.core_type<tc>, window_params = [{transform_indices = @transform_0, window_bounds = array<i64: 16, 32>}, {transform_indices = @transform_1, window_bounds = array<i64: 32, 32>}, {transform_indices = @transform_2, window_bounds = array<i64: 1, 32>}, {transform_indices = @transform_3, window_bounds = array<i64: 16, 32>}]} {
    %c0_i32 = arith.constant 0 : i32
    %0 = arith.cmpi eq, %arg2, %c0_i32 : i32
    %1 = arith.extui %0 : i1 to i32
    %c0_i32_0 = arith.constant 0 : i32
    %2 = arith.cmpi ne, %1, %c0_i32_0 : i32
    scf.if %2 {
      %cst_10 = arith.constant 0.000000e+00 : f32
      %12 = vector.broadcast %cst_10 : f32 to vector<16x32xf32>
      %c0_11 = arith.constant 0 : index
      %c0_12 = arith.constant 0 : index
      %13 = vector.load %arg7[%c0_11, %c0_12] : memref<16x32xf32, #tpu.memory_space<vmem>>, vector<16x32xf32>
      tpu.vector_store %arg7[%c0_11, %c0_12], %12 {strides = array<i32>} : memref<16x32xf32, #tpu.memory_space<vmem>>, vector<16x32xf32>,
    } else {
    }
    %c0 = arith.constant 0 : index
    %c0_1 = arith.constant 0 : index
    %3 = vector.load %arg7[%c0, %c0_1] : memref<16x32xf32, #tpu.memory_space<vmem>>, vector<16x32xf32>
    %c0_2 = arith.constant 0 : index
    %c0_3 = arith.constant 0 : index
    %4 = vector.load %arg3[%c0_2, %c0_3] : memref<16x32xf32, #tpu.memory_space<vmem>>, vector<16x32xf32>
    %c0_4 = arith.constant 0 : index
    %c0_5 = arith.constant 0 : index
    %5 = vector.load %arg4[%c0_4, %c0_5] : memref<32x32xf32, #tpu.memory_space<vmem>>, vector<32x32xf32>
    %cst = arith.constant dense<0.000000e+00> : vector<16x32xf32>
    %6 = tpu.matmul %4, %5, %cst {dimension_numbers = #tpu.dot_dimension_numbers<[1], [0], [0], [1], [0, 0, 1, 1], [], []>} : vector<16x32xf32>, vector<32x32xf32>, vector<16x32xf32> -> vector<16x32xf32>
    %7 = arith.addf %3, %6 : vector<16x32xf32>
    %c0_6 = arith.constant 0 : index
    %c0_7 = arith.constant 0 : index
    %8 = vector.load %arg7[%c0_6, %c0_7] : memref<16x32xf32, #tpu.memory_space<vmem>>, vector<16x32xf32>
    tpu.vector_store %arg7[%c0_6, %c0_7], %7 {strides = array<i32>} : memref<16x32xf32, #tpu.memory_space<vmem>>, vector<16x32xf32>,
    %c0_i32_8 = arith.constant 0 : i32
    %9 = arith.cmpi eq, %arg2, %c0_i32_8 : i32
    %10 = arith.extui %9 : i1 to i32
    %c0_i32_9 = arith.constant 0 : i32
    %11 = arith.cmpi ne, %10, %c0_i32_9 : i32
    scf.if %11 {
      %c0_10 = arith.constant 0 : index
      %c0_11 = arith.constant 0 : index
      %12 = vector.load %arg7[%c0_10, %c0_11] : memref<16x32xf32, #tpu.memory_space<vmem>>, vector<16x32xf32>
      %c0_12 = arith.constant 0 : index
      %c0_13 = arith.constant 0 : index
      %13 = vector.load %arg5[%c0_12, %c0_13] : memref<1x32xf32, #tpu.memory_space<vmem>>, vector<1x32xf32>
      %14 = vector.broadcast %13 : vector<1x32xf32> to vector<16x32xf32>
      %15 = arith.addf %12, %14 : vector<16x32xf32>
      %c0_14 = arith.constant 0 : index
      %c0_15 = arith.constant 0 : index
      %16 = vector.load %arg6[%c0_14, %c0_15] : memref<16x32xf32, #tpu.memory_space<vmem>>, vector<16x32xf32>
      tpu.vector_store %arg6[%c0_14, %c0_15], %15 {strides = array<i32>} : memref<16x32xf32, #tpu.memory_space<vmem>>, vector<16x32xf32>,
    } else {
    }
    return
  }
  func.func @transform_0(%arg0: i32, %arg1: i32, %arg2: i32) -> (i32, i32) {
    %c0_i32 = arith.constant 0 : i32
    return %arg0, %arg2 : i32, i32
  }
  func.func @transform_1(%arg0: i32, %arg1: i32, %arg2: i32) -> (i32, i32) {
    %c0_i32 = arith.constant 0 : i32
    return %arg2, %arg1 : i32, i32
  }
  func.func @transform_2(%arg0: i32, %arg1: i32, %arg2: i32) -> (i32, i32) {
    %c0_i32 = arith.constant 0 : i32
    %c0_i32_0 = arith.constant 0 : i32
    return %c0_i32, %arg1 : i32, i32
  }
  func.func @transform_3(%arg0: i32, %arg1: i32, %arg2: i32) -> (i32, i32) {
    %c0_i32 = arith.constant 0 : i32
    return %arg0, %arg1 : i32, i32
  }
}

module attributes {stable_mosaic.version = 11 : i64} {
  func.func @_mha_kernel(%arg0: i32, %arg1: memref<1x8x32xf32, #tpu.memory_space<vmem>>, %arg2: memref<1x8x32xf32, #tpu.memory_space<vmem>>, %arg3: memref<1x8x32xf32, #tpu.memory_space<vmem>>, %arg4: memref<1x8x8xf32, #tpu.memory_space<vmem>>, %arg5: memref<8x8xf32, #tpu.memory_space<vmem>>, %arg6: memref<4xf32, #tpu.memory_space<smem>>, %arg7: memref<1x8x32xf32, #tpu.memory_space<vmem>>) attributes {dimension_semantics = [#tpu.dimension_semantics<parallel>], iteration_bounds = array<i64: 2>, scalar_prefetch = 0 : i64, scratch_operands = 0 : i64, tpu.core_type = #tpu.core_type<tc>, window_params = [{transform_indices = @transform_0, window_bounds = array<i64: 1, 8, 32>}, {transform_indices = @transform_1, window_bounds = array<i64: 1, 8, 32>}, {transform_indices = @transform_2, window_bounds = array<i64: 1, 8, 32>}, {transform_indices = @transform_3, window_bounds = array<i64: 1, 8, 8>}, {pipeline_mode = #tpu.pipeline_mode<synchronous>, transform_indices = @transform_4, window_bounds = array<i64: 8, 8>}, {transform_indices = @transform_5, window_bounds = array<i64: 4>}, {transform_indices = @transform_6, window_bounds = array<i64: 1, 8, 32>}]} {
    %c0 = arith.constant 0 : index
    %c0_0 = arith.constant 0 : index
    %c0_1 = arith.constant 0 : index
    %0 = vector.load %arg1[%c0, %c0_0, %c0_1] : memref<1x8x32xf32, #tpu.memory_space<vmem>>, vector<1x8x32xf32>
    %1 = vector.shape_cast %0 : vector<1x8x32xf32> to vector<8x32xf32>
    %c0_2 = arith.constant 0 : index
    %c0_3 = arith.constant 0 : index
    %c0_4 = arith.constant 0 : index
    %2 = vector.load %arg2[%c0_2, %c0_3, %c0_4] : memref<1x8x32xf32, #tpu.memory_space<vmem>>, vector<1x8x32xf32>
    %3 = vector.shape_cast %2 : vector<1x8x32xf32> to vector<8x32xf32>
    %c0_5 = arith.constant 0 : index
    %c0_6 = arith.constant 0 : index
    %c0_7 = arith.constant 0 : index
    %4 = vector.load %arg3[%c0_5, %c0_6, %c0_7] : memref<1x8x32xf32, #tpu.memory_space<vmem>>, vector<1x8x32xf32>
    %5 = vector.shape_cast %4 : vector<1x8x32xf32> to vector<8x32xf32>
    %c0_8 = arith.constant 0 : index
    %c0_9 = arith.constant 0 : index
    %c0_10 = arith.constant 0 : index
    %6 = vector.load %arg4[%c0_8, %c0_9, %c0_10] : memref<1x8x8xf32, #tpu.memory_space<vmem>>, vector<1x8x8xf32>
    %7 = vector.shape_cast %6 : vector<1x8x8xf32> to vector<8x8xf32>
    %cst = arith.constant 0.000000e+00 : f32
    %8 = vector.broadcast %cst : f32 to vector<8x8xf32>
    %9 = arith.cmpf ogt, %7, %8 : vector<8x8xf32>
    %c0_11 = arith.constant 0 : index
    %c0_12 = arith.constant 0 : index
    %10 = vector.load %arg5[%c0_11, %c0_12] : memref<8x8xf32, #tpu.memory_space<vmem>>, vector<8x8xf32>
    %11 = vector.extract_strided_slice %1 {offsets = [0, 0], sizes = [8, 8], strides = [1, 1]} : vector<8x32xf32> to vector<8x8xf32>
    %12 = vector.extract_strided_slice %3 {offsets = [0, 0], sizes = [8, 8], strides = [1, 1]} : vector<8x32xf32> to vector<8x8xf32>
    %13 = vector.extract_strided_slice %5 {offsets = [0, 0], sizes = [8, 8], strides = [1, 1]} : vector<8x32xf32> to vector<8x8xf32>
    %14 = tpu.transpose %12, [1, 0] : vector<8x8xf32> -> vector<8x8xf32>
    %cst_13 = arith.constant dense<0.000000e+00> : vector<8x8xf32>
    %15 = tpu.matmul %11, %14, %cst_13 {dimension_numbers = #tpu.dot_dimension_numbers<[1], [0], [0], [1], [0, 0, 1, 1], [], []>} : vector<8x8xf32>, vector<8x8xf32>, vector<8x8xf32> -> vector<8x8xf32>
    %cst_14 = arith.constant 0.353553385 : f32
    %16 = vector.broadcast %cst_14 : f32 to vector<8x8xf32>
    %17 = arith.mulf %15, %16 : vector<8x8xf32>
    %cst_15 = arith.constant -1.000000e+32 : f32
    %18 = vector.broadcast %cst_15 : f32 to vector<8x8xf32>
    %19 = arith.select %9, %17, %18 : vector<8x8xi1>, vector<8x8xf32>
    %cst_16 = arith.constant dense<0xFF800000> : vector<8xf32>
    %20 = vector.multi_reduction <maximumf>, %19, %cst_16 [1] : vector<8x8xf32> to vector<8xf32>
    %21 = vector.shape_cast %20 : vector<8xf32> to vector<8x1xf32>
    %22 = vector.broadcast %21 : vector<8x1xf32> to vector<8x8xf32>
    %23 = arith.subf %19, %22 : vector<8x8xf32>
    %24 = math.exp %23 : vector<8x8xf32>
    %cst_17 = arith.constant dense<0.000000e+00> : vector<8xf32>
    %25 = vector.multi_reduction <add>, %24, %cst_17 [1] : vector<8x8xf32> to vector<8xf32>
    %26 = vector.shape_cast %25 : vector<8xf32> to vector<8x1xf32>
    %27 = tpu.reciprocal %26 {approx = true} : vector<8x1xf32> -> vector<8x1xf32>
    %28 = vector.broadcast %27 : vector<8x1xf32> to vector<8x8xf32>
    %29 = arith.mulf %24, %28 : vector<8x8xf32>
    %30 = arith.mulf %29, %7 : vector<8x8xf32>
    %c0_18 = arith.constant 0 : index
    %31 = memref.load %arg6[%c0_18] : memref<4xf32, #tpu.memory_space<smem>>
    %32 = vector.broadcast %31 : f32 to vector<8x8xf32>
    %33 = arith.mulf %32, %30 : vector<8x8xf32>
    %cst_19 = arith.constant 1.000000e+00 : f32
    %34 = vector.broadcast %cst_19 : f32 to vector<8x8xf32>
    %35 = arith.addf %33, %34 : vector<8x8xf32>
    %36 = tpu.reciprocal %35 {approx = true} : vector<8x8xf32> -> vector<8x8xf32>
    %37 = arith.mulf %10, %36 : vector<8x8xf32>
    %38 = math.exp %37 : vector<8x8xf32>
    %39 = arith.mulf %17, %38 : vector<8x8xf32>
    %cst_20 = arith.constant -1.000000e+32 : f32
    %40 = vector.broadcast %cst_20 : f32 to vector<8x8xf32>
    %41 = arith.select %9, %39, %40 : vector<8x8xi1>, vector<8x8xf32>
    %cst_21 = arith.constant dense<0xFF800000> : vector<8xf32>
    %42 = vector.multi_reduction <maximumf>, %41, %cst_21 [1] : vector<8x8xf32> to vector<8xf32>
    %43 = vector.shape_cast %42 : vector<8xf32> to vector<8x1xf32>
    %44 = vector.broadcast %43 : vector<8x1xf32> to vector<8x8xf32>
    %45 = arith.subf %41, %44 : vector<8x8xf32>
    %46 = math.exp %45 : vector<8x8xf32>
    %cst_22 = arith.constant dense<0.000000e+00> : vector<8xf32>
    %47 = vector.multi_reduction <add>, %46, %cst_22 [1] : vector<8x8xf32> to vector<8xf32>
    %48 = vector.shape_cast %47 : vector<8xf32> to vector<8x1xf32>
    %49 = tpu.reciprocal %48 {approx = true} : vector<8x1xf32> -> vector<8x1xf32>
    %50 = vector.broadcast %49 : vector<8x1xf32> to vector<8x8xf32>
    %51 = arith.mulf %46, %50 : vector<8x8xf32>
    %52 = arith.mulf %51, %7 : vector<8x8xf32>
    %cst_23 = arith.constant dense<0.000000e+00> : vector<8x8xf32>
    %53 = tpu.matmul %52, %13, %cst_23 {dimension_numbers = #tpu.dot_dimension_numbers<[1], [0], [0], [1], [0, 0, 1, 1], [], []>} : vector<8x8xf32>, vector<8x8xf32>, vector<8x8xf32> -> vector<8x8xf32>
    %54 = vector.extract_strided_slice %1 {offsets = [0, 8], sizes = [8, 8], strides = [1, 1]} : vector<8x32xf32> to vector<8x8xf32>
    %55 = vector.extract_strided_slice %3 {offsets = [0, 8], sizes = [8, 8], strides = [1, 1]} : vector<8x32xf32> to vector<8x8xf32>
    %56 = vector.extract_strided_slice %5 {offsets = [0, 8], sizes = [8, 8], strides = [1, 1]} : vector<8x32xf32> to vector<8x8xf32>
    %57 = tpu.transpose %55, [1, 0] : vector<8x8xf32> -> vector<8x8xf32>
    %cst_24 = arith.constant dense<0.000000e+00> : vector<8x8xf32>
    %58 = tpu.matmul %54, %57, %cst_24 {dimension_numbers = #tpu.dot_dimension_numbers<[1], [0], [0], [1], [0, 0, 1, 1], [], []>} : vector<8x8xf32>, vector<8x8xf32>, vector<8x8xf32> -> vector<8x8xf32>
    %cst_25 = arith.constant 0.353553385 : f32
    %59 = vector.broadcast %cst_25 : f32 to vector<8x8xf32>
    %60 = arith.mulf %58, %59 : vector<8x8xf32>
    %cst_26 = arith.constant -1.000000e+32 : f32
    %61 = vector.broadcast %cst_26 : f32 to vector<8x8xf32>
    %62 = arith.select %9, %60, %61 : vector<8x8xi1>, vector<8x8xf32>
    %cst_27 = arith.constant dense<0xFF800000> : vector<8xf32>
    %63 = vector.multi_reduction <maximumf>, %62, %cst_27 [1] : vector<8x8xf32> to vector<8xf32>
    %64 = vector.shape_cast %63 : vector<8xf32> to vector<8x1xf32>
    %65 = vector.broadcast %64 : vector<8x1xf32> to vector<8x8xf32>
    %66 = arith.subf %62, %65 : vector<8x8xf32>
    %67 = math.exp %66 : vector<8x8xf32>
    %cst_28 = arith.constant dense<0.000000e+00> : vector<8xf32>
    %68 = vector.multi_reduction <add>, %67, %cst_28 [1] : vector<8x8xf32> to vector<8xf32>
    %69 = vector.shape_cast %68 : vector<8xf32> to vector<8x1xf32>
    %70 = tpu.reciprocal %69 {approx = true} : vector<8x1xf32> -> vector<8x1xf32>
    %71 = vector.broadcast %70 : vector<8x1xf32> to vector<8x8xf32>
    %72 = arith.mulf %67, %71 : vector<8x8xf32>
    %73 = arith.mulf %72, %7 : vector<8x8xf32>
    %c1 = arith.constant 1 : index
    %74 = memref.load %arg6[%c1] : memref<4xf32, #tpu.memory_space<smem>>
    %75 = vector.broadcast %74 : f32 to vector<8x8xf32>
    %76 = arith.mulf %75, %73 : vector<8x8xf32>
    %cst_29 = arith.constant 1.000000e+00 : f32
    %77 = vector.broadcast %cst_29 : f32 to vector<8x8xf32>
    %78 = arith.addf %76, %77 : vector<8x8xf32>
    %79 = tpu.reciprocal %78 {approx = true} : vector<8x8xf32> -> vector<8x8xf32>
    %80 = arith.mulf %10, %79 : vector<8x8xf32>
    %81 = math.exp %80 : vector<8x8xf32>
    %82 = arith.mulf %60, %81 : vector<8x8xf32>
    %cst_30 = arith.constant -1.000000e+32 : f32
    %83 = vector.broadcast %cst_30 : f32 to vector<8x8xf32>
    %84 = arith.select %9, %82, %83 : vector<8x8xi1>, vector<8x8xf32>
    %cst_31 = arith.constant dense<0xFF800000> : vector<8xf32>
    %85 = vector.multi_reduction <maximumf>, %84, %cst_31 [1] : vector<8x8xf32> to vector<8xf32>
    %86 = vector.shape_cast %85 : vector<8xf32> to vector<8x1xf32>
    %87 = vector.broadcast %86 : vector<8x1xf32> to vector<8x8xf32>
    %88 = arith.subf %84, %87 : vector<8x8xf32>
    %89 = math.exp %88 : vector<8x8xf32>
    %cst_32 = arith.constant dense<0.000000e+00> : vector<8xf32>
    %90 = vector.multi_reduction <add>, %89, %cst_32 [1] : vector<8x8xf32> to vector<8xf32>
    %91 = vector.shape_cast %90 : vector<8xf32> to vector<8x1xf32>
    %92 = tpu.reciprocal %91 {approx = true} : vector<8x1xf32> -> vector<8x1xf32>
    %93 = vector.broadcast %92 : vector<8x1xf32> to vector<8x8xf32>
    %94 = arith.mulf %89, %93 : vector<8x8xf32>
    %95 = arith.mulf %94, %7 : vector<8x8xf32>
    %cst_33 = arith.constant dense<0.000000e+00> : vector<8x8xf32>
    %96 = tpu.matmul %95, %56, %cst_33 {dimension_numbers = #tpu.dot_dimension_numbers<[1], [0], [0], [1], [0, 0, 1, 1], [], []>} : vector<8x8xf32>, vector<8x8xf32>, vector<8x8xf32> -> vector<8x8xf32>
    %97 = vector.extract_strided_slice %1 {offsets = [0, 16], sizes = [8, 8], strides = [1, 1]} : vector<8x32xf32> to vector<8x8xf32>
    %98 = vector.extract_strided_slice %3 {offsets = [0, 16], sizes = [8, 8], strides = [1, 1]} : vector<8x32xf32> to vector<8x8xf32>
    %99 = vector.extract_strided_slice %5 {offsets = [0, 16], sizes = [8, 8], strides = [1, 1]} : vector<8x32xf32> to vector<8x8xf32>
    %100 = tpu.transpose %98, [1, 0] : vector<8x8xf32> -> vector<8x8xf32>
    %cst_34 = arith.constant dense<0.000000e+00> : vector<8x8xf32>
    %101 = tpu.matmul %97, %100, %cst_34 {dimension_numbers = #tpu.dot_dimension_numbers<[1], [0], [0], [1], [0, 0, 1, 1], [], []>} : vector<8x8xf32>, vector<8x8xf32>, vector<8x8xf32> -> vector<8x8xf32>
    %cst_35 = arith.constant 0.353553385 : f32
    %102 = vector.broadcast %cst_35 : f32 to vector<8x8xf32>
    %103 = arith.mulf %101, %102 : vector<8x8xf32>
    %cst_36 = arith.constant -1.000000e+32 : f32
    %104 = vector.broadcast %cst_36 : f32 to vector<8x8xf32>
    %105 = arith.select %9, %103, %104 : vector<8x8xi1>, vector<8x8xf32>
    %cst_37 = arith.constant dense<0xFF800000> : vector<8xf32>
    %106 = vector.multi_reduction <maximumf>, %105, %cst_37 [1] : vector<8x8xf32> to vector<8xf32>
    %107 = vector.shape_cast %106 : vector<8xf32> to vector<8x1xf32>
    %108 = vector.broadcast %107 : vector<8x1xf32> to vector<8x8xf32>
    %109 = arith.subf %105, %108 : vector<8x8xf32>
    %110 = math.exp %109 : vector<8x8xf32>
    %cst_38 = arith.constant dense<0.000000e+00> : vector<8xf32>
    %111 = vector.multi_reduction <add>, %110, %cst_38 [1] : vector<8x8xf32> to vector<8xf32>
    %112 = vector.shape_cast %111 : vector<8xf32> to vector<8x1xf32>
    %113 = tpu.reciprocal %112 {approx = true} : vector<8x1xf32> -> vector<8x1xf32>
    %114 = vector.broadcast %113 : vector<8x1xf32> to vector<8x8xf32>
    %115 = arith.mulf %110, %114 : vector<8x8xf32>
    %116 = arith.mulf %115, %7 : vector<8x8xf32>
    %c2 = arith.constant 2 : index
    %117 = memref.load %arg6[%c2] : memref<4xf32, #tpu.memory_space<smem>>
    %118 = vector.broadcast %117 : f32 to vector<8x8xf32>
    %119 = arith.mulf %118, %116 : vector<8x8xf32>
    %cst_39 = arith.constant 1.000000e+00 : f32
    %120 = vector.broadcast %cst_39 : f32 to vector<8x8xf32>
    %121 = arith.addf %119, %120 : vector<8x8xf32>
    %122 = tpu.reciprocal %121 {approx = true} : vector<8x8xf32> -> vector<8x8xf32>
    %123 = arith.mulf %10, %122 : vector<8x8xf32>
    %124 = math.exp %123 : vector<8x8xf32>
    %125 = arith.mulf %103, %124 : vector<8x8xf32>
    %cst_40 = arith.constant -1.000000e+32 : f32
    %126 = vector.broadcast %cst_40 : f32 to vector<8x8xf32>
    %127 = arith.select %9, %125, %126 : vector<8x8xi1>, vector<8x8xf32>
    %cst_41 = arith.constant dense<0xFF800000> : vector<8xf32>
    %128 = vector.multi_reduction <maximumf>, %127, %cst_41 [1] : vector<8x8xf32> to vector<8xf32>
    %129 = vector.shape_cast %128 : vector<8xf32> to vector<8x1xf32>
    %130 = vector.broadcast %129 : vector<8x1xf32> to vector<8x8xf32>
    %131 = arith.subf %127, %130 : vector<8x8xf32>
    %132 = math.exp %131 : vector<8x8xf32>
    %cst_42 = arith.constant dense<0.000000e+00> : vector<8xf32>
    %133 = vector.multi_reduction <add>, %132, %cst_42 [1] : vector<8x8xf32> to vector<8xf32>
    %134 = vector.shape_cast %133 : vector<8xf32> to vector<8x1xf32>
    %135 = tpu.reciprocal %134 {approx = true} : vector<8x1xf32> -> vector<8x1xf32>
    %136 = vector.broadcast %135 : vector<8x1xf32> to vector<8x8xf32>
    %137 = arith.mulf %132, %136 : vector<8x8xf32>
    %138 = arith.mulf %137, %7 : vector<8x8xf32>
    %cst_43 = arith.constant dense<0.000000e+00> : vector<8x8xf32>
    %139 = tpu.matmul %138, %99, %cst_43 {dimension_numbers = #tpu.dot_dimension_numbers<[1], [0], [0], [1], [0, 0, 1, 1], [], []>} : vector<8x8xf32>, vector<8x8xf32>, vector<8x8xf32> -> vector<8x8xf32>
    %140 = vector.extract_strided_slice %1 {offsets = [0, 24], sizes = [8, 8], strides = [1, 1]} : vector<8x32xf32> to vector<8x8xf32>
    %141 = vector.extract_strided_slice %3 {offsets = [0, 24], sizes = [8, 8], strides = [1, 1]} : vector<8x32xf32> to vector<8x8xf32>
    %142 = vector.extract_strided_slice %5 {offsets = [0, 24], sizes = [8, 8], strides = [1, 1]} : vector<8x32xf32> to vector<8x8xf32>
    %143 = tpu.transpose %141, [1, 0] : vector<8x8xf32> -> vector<8x8xf32>
    %cst_44 = arith.constant dense<0.000000e+00> : vector<8x8xf32>
    %144 = tpu.matmul %140, %143, %cst_44 {dimension_numbers = #tpu.dot_dimension_numbers<[1], [0], [0], [1], [0, 0, 1, 1], [], []>} : vector<8x8xf32>, vector<8x8xf32>, vector<8x8xf32> -> vector<8x8xf32>
    %cst_45 = arith.constant 0.353553385 : f32
    %145 = vector.broadcast %cst_45 : f32 to vector<8x8xf32>
    %146 = arith.mulf %144, %145 : vector<8x8xf32>
    %cst_46 = arith.constant -1.000000e+32 : f32
    %147 = vector.broadcast %cst_46 : f32 to vector<8x8xf32>
    %148 = arith.select %9, %146, %147 : vector<8x8xi1>, vector<8x8xf32>
    %cst_47 = arith.constant dense<0xFF800000> : vector<8xf32>
    %149 = vector.multi_reduction <maximumf>, %148, %cst_47 [1] : vector<8x8xf32> to vector<8xf32>
    %150 = vector.shape_cast %149 : vector<8xf32> to vector<8x1xf32>
    %151 = vector.broadcast %150 : vector<8x1xf32> to vector<8x8xf32>
    %152 = arith.subf %148, %151 : vector<8x8xf32>
    %153 = math.exp %152 : vector<8x8xf32>
    %cst_48 = arith.constant dense<0.000000e+00> : vector<8xf32>
    %154 = vector.multi_reduction <add>, %153, %cst_48 [1] : vector<8x8xf32> to vector<8xf32>
    %155 = vector.shape_cast %154 : vector<8xf32> to vector<8x1xf32>
    %156 = tpu.reciprocal %155 {approx = true} : vector<8x1xf32> -> vector<8x1xf32>
    %157 = vector.broadcast %156 : vector<8x1xf32> to vector<8x8xf32>
    %158 = arith.mulf %153, %157 : vector<8x8xf32>
    %159 = arith.mulf %158, %7 : vector<8x8xf32>
    %c3 = arith.constant 3 : index
    %160 = memref.load %arg6[%c3] : memref<4xf32, #tpu.memory_space<smem>>
    %161 = vector.broadcast %160 : f32 to vector<8x8xf32>
    %162 = arith.mulf %161, %159 : vector<8x8xf32>
    %cst_49 = arith.constant 1.000000e+00 : f32
    %163 = vector.broadcast %cst_49 : f32 to vector<8x8xf32>
    %164 = arith.addf %162, %163 : vector<8x8xf32>
    %165 = tpu.reciprocal %164 {approx = true} : vector<8x8xf32> -> vector<8x8xf32>
    %166 = arith.mulf %10, %165 : vector<8x8xf32>
    %167 = math.exp %166 : vector<8x8xf32>
    %168 = arith.mulf %146, %167 : vector<8x8xf32>
    %cst_50 = arith.constant -1.000000e+32 : f32
    %169 = vector.broadcast %cst_50 : f32 to vector<8x8xf32>
    %170 = arith.select %9, %168, %169 : vector<8x8xi1>, vector<8x8xf32>
    %cst_51 = arith.constant dense<0xFF800000> : vector<8xf32>
    %171 = vector.multi_reduction <maximumf>, %170, %cst_51 [1] : vector<8x8xf32> to vector<8xf32>
    %172 = vector.shape_cast %171 : vector<8xf32> to vector<8x1xf32>
    %173 = vector.broadcast %172 : vector<8x1xf32> to vector<8x8xf32>
    %174 = arith.subf %170, %173 : vector<8x8xf32>
    %175 = math.exp %174 : vector<8x8xf32>
    %cst_52 = arith.constant dense<0.000000e+00> : vector<8xf32>
    %176 = vector.multi_reduction <add>, %175, %cst_52 [1] : vector<8x8xf32> to vector<8xf32>
    %177 = vector.shape_cast %176 : vector<8xf32> to vector<8x1xf32>
    %178 = tpu.reciprocal %177 {approx = true} : vector<8x1xf32> -> vector<8x1xf32>
    %179 = vector.broadcast %178 : vector<8x1xf32> to vector<8x8xf32>
    %180 = arith.mulf %175, %179 : vector<8x8xf32>
    %181 = arith.mulf %180, %7 : vector<8x8xf32>
    %cst_53 = arith.constant dense<0.000000e+00> : vector<8x8xf32>
    %182 = tpu.matmul %181, %142, %cst_53 {dimension_numbers = #tpu.dot_dimension_numbers<[1], [0], [0], [1], [0, 0, 1, 1], [], []>} : vector<8x8xf32>, vector<8x8xf32>, vector<8x8xf32> -> vector<8x8xf32>
    %183 = tpu.concatenate %53, %96, %139, %182 in 1 : vector<8x8xf32>, vector<8x8xf32>, vector<8x8xf32>, vector<8x8xf32> -> vector<8x32xf32>
    %c0_54 = arith.constant 0 : index
    %c0_55 = arith.constant 0 : index
    %c0_56 = arith.constant 0 : index
    %184 = vector.load %arg7[%c0_54, %c0_55, %c0_56] : memref<1x8x32xf32, #tpu.memory_space<vmem>>, vector<1x8x32xf32>
    %185 = vector.shape_cast %184 : vector<1x8x32xf32> to vector<8x32xf32>
    %186 = vector.shape_cast %183 : vector<8x32xf32> to vector<1x8x32xf32>
    tpu.vector_store %arg7[%c0_54, %c0_55, %c0_56], %186 {strides = array<i32>} : memref<1x8x32xf32, #tpu.memory_space<vmem>>, vector<1x8x32xf32>,
    return
  }
  func.func @transform_0(%arg0: i32) -> (i32, i32, i32) {
    %c0_i32 = arith.constant 0 : i32
    %c0_i32_0 = arith.constant 0 : i32
    %c0_i32_1 = arith.constant 0 : i32
    return %arg0, %c0_i32, %c0_i32_0 : i32, i32, i32
  }
  func.func @transform_1(%arg0: i32) -> (i32, i32, i32) {
    %c0_i32 = arith.constant 0 : i32
    %c0_i32_0 = arith.constant 0 : i32
    %c0_i32_1 = arith.constant 0 : i32
    return %arg0, %c0_i32, %c0_i32_0 : i32, i32, i32
  }
  func.func @transform_2(%arg0: i32) -> (i32, i32, i32) {
    %c0_i32 = arith.constant 0 : i32
    %c0_i32_0 = arith.constant 0 : i32
    %c0_i32_1 = arith.constant 0 : i32
    return %arg0, %c0_i32, %c0_i32_0 : i32, i32, i32
  }
  func.func @transform_3(%arg0: i32) -> (i32, i32, i32) {
    %c0_i32 = arith.constant 0 : i32
    %c0_i32_0 = arith.constant 0 : i32
    %c0_i32_1 = arith.constant 0 : i32
    return %arg0, %c0_i32, %c0_i32_0 : i32, i32, i32
  }
  func.func @transform_4(%arg0: i32) -> (i32, i32) {
    %c0_i32 = arith.constant 0 : i32
    %c0_i32_0 = arith.constant 0 : i32
    %c0_i32_1 = arith.constant 0 : i32
    return %c0_i32, %c0_i32_0 : i32, i32
  }
  func.func @transform_5(%arg0: i32) -> i32 {
    %c0_i32 = arith.constant 0 : i32
    %c0_i32_0 = arith.constant 0 : i32
    return %c0_i32 : i32
  }
  func.func @transform_6(%arg0: i32) -> (i32, i32, i32) {
    %c0_i32 = arith.constant 0 : i32
    %c0_i32_0 = arith.constant 0 : i32
    %c0_i32_1 = arith.constant 0 : i32
    return %arg0, %c0_i32, %c0_i32_0 : i32, i32, i32
  }
}

module attributes {stable_mosaic.version = 11 : i64} {
  func.func @_add_ln_kernel(%arg0: i32, %arg1: memref<16x32xf32, #tpu.memory_space<vmem>>, %arg2: memref<16x32xf32, #tpu.memory_space<vmem>>, %arg3: memref<1x32xf32, #tpu.memory_space<vmem>>, %arg4: memref<1x32xf32, #tpu.memory_space<vmem>>, %arg5: memref<16x32xf32, #tpu.memory_space<vmem>>) attributes {dimension_semantics = [#tpu.dimension_semantics<parallel>], iteration_bounds = array<i64: 1>, scalar_prefetch = 0 : i64, scratch_operands = 0 : i64, tpu.core_type = #tpu.core_type<tc>, window_params = [{transform_indices = @transform_0, window_bounds = array<i64: 16, 32>}, {transform_indices = @transform_1, window_bounds = array<i64: 16, 32>}, {pipeline_mode = #tpu.pipeline_mode<synchronous>, transform_indices = @transform_2, window_bounds = array<i64: 1, 32>}, {pipeline_mode = #tpu.pipeline_mode<synchronous>, transform_indices = @transform_3, window_bounds = array<i64: 1, 32>}, {transform_indices = @transform_4, window_bounds = array<i64: 16, 32>}]} {
    %c0 = arith.constant 0 : index
    %c0_0 = arith.constant 0 : index
    %0 = vector.load %arg1[%c0, %c0_0] : memref<16x32xf32, #tpu.memory_space<vmem>>, vector<16x32xf32>
    %c0_1 = arith.constant 0 : index
    %c0_2 = arith.constant 0 : index
    %1 = vector.load %arg2[%c0_1, %c0_2] : memref<16x32xf32, #tpu.memory_space<vmem>>, vector<16x32xf32>
    %2 = arith.addf %0, %1 : vector<16x32xf32>
    %cst = arith.constant dense<0.000000e+00> : vector<16xf32>
    %3 = vector.multi_reduction <add>, %2, %cst [1] : vector<16x32xf32> to vector<16xf32>
    %4 = vector.shape_cast %3 : vector<16xf32> to vector<16x1xf32>
    %cst_3 = arith.constant 3.200000e+01 : f32
    %5 = vector.broadcast %cst_3 : f32 to vector<16x1xf32>
    %6 = arith.divf %4, %5 : vector<16x1xf32>
    %7 = vector.broadcast %6 : vector<16x1xf32> to vector<16x32xf32>
    %8 = arith.subf %2, %7 : vector<16x32xf32>
    %9 = arith.mulf %8, %8 : vector<16x32xf32>
    %cst_4 = arith.constant dense<0.000000e+00> : vector<16xf32>
    %10 = vector.multi_reduction <add>, %9, %cst_4 [1] : vector<16x32xf32> to vector<16xf32>
    %11 = vector.shape_cast %10 : vector<16xf32> to vector<16x1xf32>
    %cst_5 = arith.constant 3.200000e+01 : f32
    %12 = vector.broadcast %cst_5 : f32 to vector<16x1xf32>
    %13 = arith.divf %11, %12 : vector<16x1xf32>
    %cst_6 = arith.constant 9.99999996E-13 : f32
    %14 = vector.broadcast %cst_6 : f32 to vector<16x1xf32>
    %15 = arith.addf %13, %14 : vector<16x1xf32>
    %16 = math.rsqrt %15 : vector<16x1xf32>
    %17 = vector.broadcast %16 : vector<16x1xf32> to vector<16x32xf32>
    %18 = arith.mulf %8, %17 : vector<16x32xf32>
    %c0_7 = arith.constant 0 : index
    %c0_8 = arith.constant 0 : index
    %19 = vector.load %arg3[%c0_7, %c0_8] : memref<1x32xf32, #tpu.memory_space<vmem>>, vector<1x32xf32>
    %20 = vector.broadcast %19 : vector<1x32xf32> to vector<16x32xf32>
    %21 = arith.mulf %18, %20 : vector<16x32xf32>
    %c0_9 = arith.constant 0 : index
    %c0_10 = arith.constant 0 : index
    %22 = vector.load %arg4[%c0_9, %c0_10] : memref<1x32xf32, #tpu.memory_space<vmem>>, vector<1x32xf32>
    %23 = vector.broadcast %22 : vector<1x32xf32> to vector<16x32xf32>
    %24 = arith.addf %21, %23 : vector<16x32xf32>
    %c0_11 = arith.constant 0 : index
    %c0_12 = arith.constant 0 : index
    %25 = vector.load %arg5[%c0_11, %c0_12] : memref<16x32xf32, #tpu.memory_space<vmem>>, vector<16x32xf32>
    tpu.vector_store %arg5[%c0_11, %c0_12], %24 {strides = array<i32>} : memref<16x32xf32, #tpu.memory_space<vmem>>, vector<16x32xf32>,
    return
  }
  func.func @transform_0(%arg0: i32) -> (i32, i32) {
    %c0_i32 = arith.constant 0 : i32
    %c0_i32_0 = arith.constant 0 : i32
    return %arg0, %c0_i32 : i32, i32
  }
  func.func @transform_1(%arg0: i32) -> (i32, i32) {
    %c0_i32 = arith.constant 0 : i32
    %c0_i32_0 = arith.constant 0 : i32
    return %arg0, %c0_i32 : i32, i32
  }
  func.func @transform_2(%arg0: i32) -> (i32, i32) {
    %c0_i32 = arith.constant 0 : i32
    %c0_i32_0 = arith.constant 0 : i32
    %c0_i32_1 = arith.constant 0 : i32
    return %c0_i32, %c0_i32_0 : i32, i32
  }
  func.func @transform_3(%arg0: i32) -> (i32, i32) {
    %c0_i32 = arith.constant 0 : i32
    %c0_i32_0 = arith.constant 0 : i32
    %c0_i32_1 = arith.constant 0 : i32
    return %c0_i32, %c0_i32_0 : i32, i32
  }
  func.func @transform_4(%arg0: i32) -> (i32, i32) {
    %c0_i32 = arith.constant 0 : i32
    %c0_i32_0 = arith.constant 0 : i32
    return %arg0, %c0_i32 : i32, i32
  }
}

module attributes {stable_mosaic.version = 11 : i64} {
  func.func @_linear_nobias_kernel(%arg0: i32, %arg1: i32, %arg2: i32, %arg3: memref<16x32xf32, #tpu.memory_space<vmem>>, %arg4: memref<32x64xf32, #tpu.memory_space<vmem>>, %arg5: memref<16x64xf32, #tpu.memory_space<vmem>>, %arg6: memref<16x64xf32, #tpu.memory_space<vmem>>) attributes {dimension_semantics = [#tpu.dimension_semantics<parallel>, #tpu.dimension_semantics<parallel>, #tpu.dimension_semantics<arbitrary>], iteration_bounds = array<i64: 1, 1, 1>, scalar_prefetch = 0 : i64, scratch_operands = 1 : i64, tpu.core_type = #tpu.core_type<tc>, window_params = [{transform_indices = @transform_0, window_bounds = array<i64: 16, 32>}, {transform_indices = @transform_1, window_bounds = array<i64: 32, 64>}, {transform_indices = @transform_2, window_bounds = array<i64: 16, 64>}]} {
    %c0_i32 = arith.constant 0 : i32
    %0 = arith.cmpi eq, %arg2, %c0_i32 : i32
    %1 = arith.extui %0 : i1 to i32
    %c0_i32_0 = arith.constant 0 : i32
    %2 = arith.cmpi ne, %1, %c0_i32_0 : i32
    scf.if %2 {
      %cst_10 = arith.constant 0.000000e+00 : f32
      %12 = vector.broadcast %cst_10 : f32 to vector<16x64xf32>
      %c0_11 = arith.constant 0 : index
      %c0_12 = arith.constant 0 : index
      %13 = vector.load %arg6[%c0_11, %c0_12] : memref<16x64xf32, #tpu.memory_space<vmem>>, vector<16x64xf32>
      tpu.vector_store %arg6[%c0_11, %c0_12], %12 {strides = array<i32>} : memref<16x64xf32, #tpu.memory_space<vmem>>, vector<16x64xf32>,
    } else {
    }
    %c0 = arith.constant 0 : index
    %c0_1 = arith.constant 0 : index
    %3 = vector.load %arg6[%c0, %c0_1] : memref<16x64xf32, #tpu.memory_space<vmem>>, vector<16x64xf32>
    %c0_2 = arith.constant 0 : index
    %c0_3 = arith.constant 0 : index
    %4 = vector.load %arg3[%c0_2, %c0_3] : memref<16x32xf32, #tpu.memory_space<vmem>>, vector<16x32xf32>
    %c0_4 = arith.constant 0 : index
    %c0_5 = arith.constant 0 : index
    %5 = vector.load %arg4[%c0_4, %c0_5] : memref<32x64xf32, #tpu.memory_space<vmem>>, vector<32x64xf32>
    %cst = arith.constant dense<0.000000e+00> : vector<16x64xf32>
    %6 = tpu.matmul %4, %5, %cst {dimension_numbers = #tpu.dot_dimension_numbers<[1], [0], [0], [1], [0, 0, 1, 1], [], []>} : vector<16x32xf32>, vector<32x64xf32>, vector<16x64xf32> -> vector<16x64xf32>
    %7 = arith.addf %3, %6 : vector<16x64xf32>
    %c0_6 = arith.constant 0 : index
    %c0_7 = arith.constant 0 : index
    %8 = vector.load %arg6[%c0_6, %c0_7] : memref<16x64xf32, #tpu.memory_space<vmem>>, vector<16x64xf32>
    tpu.vector_store %arg6[%c0_6, %c0_7], %7 {strides = array<i32>} : memref<16x64xf32, #tpu.memory_space<vmem>>, vector<16x64xf32>,
    %c0_i32_8 = arith.constant 0 : i32
    %9 = arith.cmpi eq, %arg2, %c0_i32_8 : i32
    %10 = arith.extui %9 : i1 to i32
    %c0_i32_9 = arith.constant 0 : i32
    %11 = arith.cmpi ne, %10, %c0_i32_9 : i32
    scf.if %11 {
      %c0_10 = arith.constant 0 : index
      %c0_11 = arith.constant 0 : index
      %12 = vector.load %arg6[%c0_10, %c0_11] : memref<16x64xf32, #tpu.memory_space<vmem>>, vector<16x64xf32>
      %cst_12 = arith.constant 0.000000e+00 : f32
      %13 = vector.broadcast %cst_12 : f32 to vector<16x64xf32>
      %14 = arith.maximumf %12, %13 : vector<16x64xf32>
      %c0_13 = arith.constant 0 : index
      %c0_14 = arith.constant 0 : index
      %15 = vector.load %arg5[%c0_13, %c0_14] : memref<16x64xf32, #tpu.memory_space<vmem>>, vector<16x64xf32>
      tpu.vector_store %arg5[%c0_13, %c0_14], %14 {strides = array<i32>} : memref<16x64xf32, #tpu.memory_space<vmem>>, vector<16x64xf32>,
    } else {
    }
    return
  }
  func.func @transform_0(%arg0: i32, %arg1: i32, %arg2: i32) -> (i32, i32) {
    %c0_i32 = arith.constant 0 : i32
    return %arg0, %arg2 : i32, i32
  }
  func.func @transform_1(%arg0: i32, %arg1: i32, %arg2: i32) -> (i32, i32) {
    %c0_i32 = arith.constant 0 : i32
    return %arg2, %arg1 : i32, i32
  }
  func.func @transform_2(%arg0: i32, %arg1: i32, %arg2: i32) -> (i32, i32) {
    %c0_i32 = arith.constant 0 : i32
    return %arg0, %arg1 : i32, i32
  }
}

module attributes {stable_mosaic.version = 11 : i64} {
  func.func @_linear_nobias_kernel(%arg0: i32, %arg1: i32, %arg2: i32, %arg3: memref<16x64xf32, #tpu.memory_space<vmem>>, %arg4: memref<64x32xf32, #tpu.memory_space<vmem>>, %arg5: memref<16x32xf32, #tpu.memory_space<vmem>>, %arg6: memref<16x32xf32, #tpu.memory_space<vmem>>) attributes {dimension_semantics = [#tpu.dimension_semantics<parallel>, #tpu.dimension_semantics<parallel>, #tpu.dimension_semantics<arbitrary>], iteration_bounds = array<i64: 1, 1, 1>, scalar_prefetch = 0 : i64, scratch_operands = 1 : i64, tpu.core_type = #tpu.core_type<tc>, window_params = [{transform_indices = @transform_0, window_bounds = array<i64: 16, 64>}, {transform_indices = @transform_1, window_bounds = array<i64: 64, 32>}, {transform_indices = @transform_2, window_bounds = array<i64: 16, 32>}]} {
    %c0_i32 = arith.constant 0 : i32
    %0 = arith.cmpi eq, %arg2, %c0_i32 : i32
    %1 = arith.extui %0 : i1 to i32
    %c0_i32_0 = arith.constant 0 : i32
    %2 = arith.cmpi ne, %1, %c0_i32_0 : i32
    scf.if %2 {
      %cst_10 = arith.constant 0.000000e+00 : f32
      %12 = vector.broadcast %cst_10 : f32 to vector<16x32xf32>
      %c0_11 = arith.constant 0 : index
      %c0_12 = arith.constant 0 : index
      %13 = vector.load %arg6[%c0_11, %c0_12] : memref<16x32xf32, #tpu.memory_space<vmem>>, vector<16x32xf32>
      tpu.vector_store %arg6[%c0_11, %c0_12], %12 {strides = array<i32>} : memref<16x32xf32, #tpu.memory_space<vmem>>, vector<16x32xf32>,
    } else {
    }
    %c0 = arith.constant 0 : index
    %c0_1 = arith.constant 0 : index
    %3 = vector.load %arg6[%c0, %c0_1] : memref<16x32xf32, #tpu.memory_space<vmem>>, vector<16x32xf32>
    %c0_2 = arith.constant 0 : index
    %c0_3 = arith.constant 0 : index
    %4 = vector.load %arg3[%c0_2, %c0_3] : memref<16x64xf32, #tpu.memory_space<vmem>>, vector<16x64xf32>
    %c0_4 = arith.constant 0 : index
    %c0_5 = arith.constant 0 : index
    %5 = vector.load %arg4[%c0_4, %c0_5] : memref<64x32xf32, #tpu.memory_space<vmem>>, vector<64x32xf32>
    %cst = arith.constant dense<0.000000e+00> : vector<16x32xf32>
    %6 = tpu.matmul %4, %5, %cst {dimension_numbers = #tpu.dot_dimension_numbers<[1], [0], [0], [1], [0, 0, 1, 1], [], []>} : vector<16x64xf32>, vector<64x32xf32>, vector<16x32xf32> -> vector<16x32xf32>
    %7 = arith.addf %3, %6 : vector<16x32xf32>
    %c0_6 = arith.constant 0 : index
    %c0_7 = arith.constant 0 : index
    %8 = vector.load %arg6[%c0_6, %c0_7] : memref<16x32xf32, #tpu.memory_space<vmem>>, vector<16x32xf32>
    tpu.vector_store %arg6[%c0_6, %c0_7], %7 {strides = array<i32>} : memref<16x32xf32, #tpu.memory_space<vmem>>, vector<16x32xf32>,
    %c0_i32_8 = arith.constant 0 : i32
    %9 = arith.cmpi eq, %arg2, %c0_i32_8 : i32
    %10 = arith.extui %9 : i1 to i32
    %c0_i32_9 = arith.constant 0 : i32
    %11 = arith.cmpi ne, %10, %c0_i32_9 : i32
    scf.if %11 {
      %c0_10 = arith.constant 0 : index
      %c0_11 = arith.constant 0 : index
      %12 = vector.load %arg6[%c0_10, %c0_11] : memref<16x32xf32, #tpu.memory_space<vmem>>, vector<16x32xf32>
      %c0_12 = arith.constant 0 : index
      %c0_13 = arith.constant 0 : index
      %13 = vector.load %arg5[%c0_12, %c0_13] : memref<16x32xf32, #tpu.memory_space<vmem>>, vector<16x32xf32>
      tpu.vector_store %arg5[%c0_12, %c0_13], %12 {strides = array<i32>} : memref<16x32xf32, #tpu.memory_space<vmem>>, vector<16x32xf32>,
    } else {
    }
    return
  }
  func.func @transform_0(%arg0: i32, %arg1: i32, %arg2: i32) -> (i32, i32) {
    %c0_i32 = arith.constant 0 : i32
    return %arg0, %arg2 : i32, i32
  }
  func.func @transform_1(%arg0: i32, %arg1: i32, %arg2: i32) -> (i32, i32) {
    %c0_i32 = arith.constant 0 : i32
    return %arg2, %arg1 : i32, i32
  }
  func.func @transform_2(%arg0: i32, %arg1: i32, %arg2: i32) -> (i32, i32) {
    %c0_i32 = arith.constant 0 : i32
    return %arg0, %arg1 : i32, i32
  }
}

module attributes {stable_mosaic.version = 11 : i64} {
  func.func @_add_ln_kernel(%arg0: i32, %arg1: memref<16x32xf32, #tpu.memory_space<vmem>>, %arg2: memref<16x32xf32, #tpu.memory_space<vmem>>, %arg3: memref<1x32xf32, #tpu.memory_space<vmem>>, %arg4: memref<1x32xf32, #tpu.memory_space<vmem>>, %arg5: memref<16x32xf32, #tpu.memory_space<vmem>>) attributes {dimension_semantics = [#tpu.dimension_semantics<parallel>], iteration_bounds = array<i64: 1>, scalar_prefetch = 0 : i64, scratch_operands = 0 : i64, tpu.core_type = #tpu.core_type<tc>, window_params = [{transform_indices = @transform_0, window_bounds = array<i64: 16, 32>}, {transform_indices = @transform_1, window_bounds = array<i64: 16, 32>}, {pipeline_mode = #tpu.pipeline_mode<synchronous>, transform_indices = @transform_2, window_bounds = array<i64: 1, 32>}, {pipeline_mode = #tpu.pipeline_mode<synchronous>, transform_indices = @transform_3, window_bounds = array<i64: 1, 32>}, {transform_indices = @transform_4, window_bounds = array<i64: 16, 32>}]} {
    %c0 = arith.constant 0 : index
    %c0_0 = arith.constant 0 : index
    %0 = vector.load %arg1[%c0, %c0_0] : memref<16x32xf32, #tpu.memory_space<vmem>>, vector<16x32xf32>
    %c0_1 = arith.constant 0 : index
    %c0_2 = arith.constant 0 : index
    %1 = vector.load %arg2[%c0_1, %c0_2] : memref<16x32xf32, #tpu.memory_space<vmem>>, vector<16x32xf32>
    %2 = arith.addf %0, %1 : vector<16x32xf32>
    %cst = arith.constant dense<0.000000e+00> : vector<16xf32>
    %3 = vector.multi_reduction <add>, %2, %cst [1] : vector<16x32xf32> to vector<16xf32>
    %4 = vector.shape_cast %3 : vector<16xf32> to vector<16x1xf32>
    %cst_3 = arith.constant 3.200000e+01 : f32
    %5 = vector.broadcast %cst_3 : f32 to vector<16x1xf32>
    %6 = arith.divf %4, %5 : vector<16x1xf32>
    %7 = vector.broadcast %6 : vector<16x1xf32> to vector<16x32xf32>
    %8 = arith.subf %2, %7 : vector<16x32xf32>
    %9 = arith.mulf %8, %8 : vector<16x32xf32>
    %cst_4 = arith.constant dense<0.000000e+00> : vector<16xf32>
    %10 = vector.multi_reduction <add>, %9, %cst_4 [1] : vector<16x32xf32> to vector<16xf32>
    %11 = vector.shape_cast %10 : vector<16xf32> to vector<16x1xf32>
    %cst_5 = arith.constant 3.200000e+01 : f32
    %12 = vector.broadcast %cst_5 : f32 to vector<16x1xf32>
    %13 = arith.divf %11, %12 : vector<16x1xf32>
    %cst_6 = arith.constant 9.99999996E-13 : f32
    %14 = vector.broadcast %cst_6 : f32 to vector<16x1xf32>
    %15 = arith.addf %13, %14 : vector<16x1xf32>
    %16 = math.rsqrt %15 : vector<16x1xf32>
    %17 = vector.broadcast %16 : vector<16x1xf32> to vector<16x32xf32>
    %18 = arith.mulf %8, %17 : vector<16x32xf32>
    %c0_7 = arith.constant 0 : index
    %c0_8 = arith.constant 0 : index
    %19 = vector.load %arg3[%c0_7, %c0_8] : memref<1x32xf32, #tpu.memory_space<vmem>>, vector<1x32xf32>
    %20 = vector.broadcast %19 : vector<1x32xf32> to vector<16x32xf32>
    %21 = arith.mulf %18, %20 : vector<16x32xf32>
    %c0_9 = arith.constant 0 : index
    %c0_10 = arith.constant 0 : index
    %22 = vector.load %arg4[%c0_9, %c0_10] : memref<1x32xf32, #tpu.memory_space<vmem>>, vector<1x32xf32>
    %23 = vector.broadcast %22 : vector<1x32xf32> to vector<16x32xf32>
    %24 = arith.addf %21, %23 : vector<16x32xf32>
    %c0_11 = arith.constant 0 : index
    %c0_12 = arith.constant 0 : index
    %25 = vector.load %arg5[%c0_11, %c0_12] : memref<16x32xf32, #tpu.memory_space<vmem>>, vector<16x32xf32>
    tpu.vector_store %arg5[%c0_11, %c0_12], %24 {strides = array<i32>} : memref<16x32xf32, #tpu.memory_space<vmem>>, vector<16x32xf32>,
    return
  }
  func.func @transform_0(%arg0: i32) -> (i32, i32) {
    %c0_i32 = arith.constant 0 : i32
    %c0_i32_0 = arith.constant 0 : i32
    return %arg0, %c0_i32 : i32, i32
  }
  func.func @transform_1(%arg0: i32) -> (i32, i32) {
    %c0_i32 = arith.constant 0 : i32
    %c0_i32_0 = arith.constant 0 : i32
    return %arg0, %c0_i32 : i32, i32
  }
  func.func @transform_2(%arg0: i32) -> (i32, i32) {
    %c0_i32 = arith.constant 0 : i32
    %c0_i32_0 = arith.constant 0 : i32
    %c0_i32_1 = arith.constant 0 : i32
    return %c0_i32, %c0_i32_0 : i32, i32
  }
  func.func @transform_3(%arg0: i32) -> (i32, i32) {
    %c0_i32 = arith.constant 0 : i32
    %c0_i32_0 = arith.constant 0 : i32
    %c0_i32_1 = arith.constant 0 : i32
    return %c0_i32, %c0_i32_0 : i32, i32
  }
  func.func @transform_4(%arg0: i32) -> (i32, i32) {
    %c0_i32 = arith.constant 0 : i32
    %c0_i32_0 = arith.constant 0 : i32
    return %arg0, %c0_i32 : i32, i32
  }
}

</mosaic_0001>

<bundles_post_ra>
// kernel: decoder_layer_forward.13
= control target key start
LH: loop header
LB: loop body
LE: loop exit
PB: predicated region body
PF: predicated region fallthrough
CT: control target
= control target key end

     0   :  { %11 = vsyncpa [#allocation4], 0  ;;  %s166_s21 = smov [#allocation3]   ;;  %s167_s23 = smov 128   ;;  %s244_s0 = inlined_call_operand.vmem [shape: f32[16,32], index: 0, kind: input, shape index: {}]   ;;  %s245_s1 = inlined_call_operand.hbm [shape: f32[32,96], index: 1, kind: input, shape index: {}]   ;;  %s246_s2 = inlined_call_operand.vmem [shape: f32[1,96], index: 2, kind: input, shape index: {}]   ;;  %s247_s3 = inlined_call_operand.vmem [shape: f32[16,32], index: 3, kind: output, shape index: {0}]   ;;  %s248_s4 = inlined_call_operand.vmem [shape: f32[16,32], index: 4, kind: output, shape index: {1}]   ;;  %s249_s5 = inlined_call_operand.vmem [shape: f32[16,32], index: 5, kind: output, shape index: {2}]  }
   0x1   :  { %s18_s20 = sshll.u32 %s245_s1, 4  ;;  %s20_s22 = sshll.u32 %s166_s21, 4  ;;  %s19_s20 = int_to_ptr.hbm [resolvable:$true] %s18_s20  ;;  %s21_s22 = int_to_ptr.vmem [resolvable:$true] %s20_s22 }
   0x2   :  { %s168_s24 = smov 8  }
   0x3   :  { %26 = dma.hbm_to_vmem [thread:$0]  %s19_s20, 512, %s21_s22, [#allocation4], %s167_s23, %s167_s23, %s168_s24  }
   0x4   :  { %164 = dma.done.wait [#allocation4], 512  }
   0x5   :  { %165 = vsyncadd [#allocation4], 4294966784  ;;  %vm37_vm0 = vcmask 785408   ;;  %v169_v0 = vmov 0.0   ;;  %v47_v1 = vld [vmem:[#allocation3 + $0x18] sm:$0xff]  ;;  %v46_v2 = vld [vmem:[#allocation3 + $0x10] sm:$0xff] }
   0x6   :  { %38 = vst.msk [vmem:[#allocation2] sm:$0xff] %vm37_vm0, %v169_v0  ;;  %67 = vmatpush.msra.mxu0 %v47_v1  ;;  %129 = vmatpush.msra.mxu1 %v47_v1  ;;  %v45_v3 = vld [vmem:[#allocation3 + $0x8] sm:$0xff]  ;;  %v44_v4 = vld [vmem:[#allocation3] sm:$0xff]  ;;  %v42_v5 = vld [vmem:[%s244_s0] sm:$0xff]  ;;  %vm48_vm1 = vcmask 261120   ;;  %s171_s7 = smov 96  }
   0x7   :  { %39 = vst.msk [vmem:[#allocation2 + $0x8] sm:$0xff] %vm37_vm0, %v169_v0  ;;  %v43_v6 = vld [vmem:[%s244_s0 + $0x8] sm:$0xff]  ;;  %v139_v13 = vld [vmem:[%s246_s2] ss:$0 sm:$0xff]  ;;  %s170_s0 = smov 64  }
   0x8   :  { %68 = vmatpush.msra.mxu0 %v46_v2  ;;  %130 = vmatpush.msra.mxu1 %v46_v2 }
   0xa   :  { %69 = vmatpush.msra.mxu0 %v45_v3  ;;  %131 = vmatpush.msra.mxu1 %v45_v3 }
   0xc   :  { %70 = vmatpush.msra.mxu0 %v44_v4  ;;  %132 = vmatpush.msra.mxu1 %v44_v4 }
   0xd   :  { %127 = vmatmul.msk.f32.vlgmr.msra.gmra.mxu0 %vm48_vm1, %v42_v5  ;;  %128 = vmatmul.msk.f32.vlgmr.msra.gmra.mxu1 %vm48_vm1, %v43_v6  ;;  %v40_v7 = vld [vmem:[#allocation2] sm:$0xff] }
   0xe   :  { %v41_v8 = vld [vmem:[#allocation2 + $0x8] sm:$0xff] }
  0x8a   :  { %v72_v9 = vpop.f32.mrf.mxu0  ;;  %v75_v10 = vpop.f32.mrf.mxu1 }
  0x8b   :  { %v78_v11 = vadd.f32 %v72_v9, %v40_v7  ;;  %v79_v12 = vadd.f32 %v75_v10, %v41_v8 }
  0x8d   :  { %81 = vst.msk [vmem:[#allocation2] sm:$0xff] %vm37_vm0, %v78_v11 }
  0x8e   :  { %82 = vst.msk [vmem:[#allocation2 + $0x8] sm:$0xff] %vm37_vm0, %v79_v12 }
  0x94   :  { %v86_v14 = vld [vmem:[#allocation2] sm:$0xff] }
  0x95   :  { %v92_v15 = vadd.f32 %v139_v13, %v86_v14  ;;  %v87_v16 = vld [vmem:[#allocation2 + $0x8] sm:$0xff] }
  0x96   :  { %v93_v17 = vadd.f32 %v139_v13, %v87_v16 }
  0x97   :  { %106 = vrot.lane.b32.xlu1 %v92_v15, %s170_s0  ;;  %94 = vst.msk [vmem:[%s247_s3] sm:$0xff] %vm48_vm1, %v92_v15  ;;  %98 = vrot.lane.b32.xlu0 %v92_v15, %s171_s7 }
  0x98   :  { %95 = vst.msk [vmem:[%s247_s3 + $0x8] sm:$0xff] %vm48_vm1, %v93_v17 }
  0x9f   :  { %108 = vrot.lane.b32.xlu1 %v93_v17, %s170_s0  ;;  %100 = vrot.lane.b32.xlu0 %v93_v17, %s171_s7 }
 0x109   :  { %v107_v18 = vpop.permute.xlu1 %106  ;;  %v99_v19 = vpop.permute.xlu0 %98 }
 0x10a   :  { %112 = vst.msk [vmem:[%s249_s5] sm:$0xff] %vm48_vm1, %v107_v18 }
 0x10b   :  { %104 = vst.msk [vmem:[%s248_s4] sm:$0xff] %vm48_vm1, %v99_v19 }
 0x111   :  { %v109_v20 = vpop.permute.xlu1 %108  ;;  %v101_v21 = vpop.permute.xlu0 %100 }
 0x112   :  { %113 = vst.msk [vmem:[%s249_s5 + $0x8] sm:$0xff] %vm48_vm1, %v109_v20 }
 0x113   :  { %105 = vst.msk [vmem:[%s248_s4 + $0x8] sm:$0xff] %vm48_vm1, %v101_v21 }
 0x114   :  { %126 = vsyncpa [#allocation4], 1 }

// kernel: decoder_layer_forward.15
= control target key start
LH: loop header
LB: loop body
LE: loop exit
PB: predicated region body
PF: predicated region fallthrough
CT: control target
= control target key end

     0   :  { %vm18_vm0 = vcmask 261120   ;;  %v88_v2 = vmov 0.0   ;;  %s144_s1 = inlined_call_operand.vmem [shape: f32[32,32], index: 1, kind: input, shape index: {}]   ;;  %s145_s2 = inlined_call_operand.vmem [shape: f32[1,32], index: 2, kind: input, shape index: {}]   ;;  %s146_s0 = inlined_call_operand.vmem [shape: f32[16,32], index: 0, kind: input, shape index: {}]   ;;  %s147_s3 = inlined_call_operand.vmem [shape: f32[16,32], index: 3, kind: output, shape index: {}]  }
   0x1   :  { %v28_v0 = vld [vmem:[%s144_s1 + $0x18] sm:$0xff]  ;;  %v27_v1 = vld [vmem:[%s144_s1 + $0x10] sm:$0xff]  ;;  %19 = vst.msk [vmem:[#allocation2] sm:$0xff] %vm18_vm0, %v88_v2  ;;  %v26_v3 = vld [vmem:[%s144_s1 + $0x8] sm:$0xff] }
   0x2   :  { %48 = vmatpush.msra.mxu0 %v28_v0  ;;  %82 = vmatpush.msra.mxu1 %v28_v0  ;;  %20 = vst.msk [vmem:[#allocation2 + $0x8] sm:$0xff] %vm18_vm0, %v88_v2  ;;  %v25_v4 = vld [vmem:[%s144_s1] sm:$0xff]  ;;  %v24_v6 = vld [vmem:[%s146_s0 + $0x8] sm:$0xff] }
   0x3   :  { %v23_v5 = vld [vmem:[%s146_s0] sm:$0xff] }
   0x4   :  { %49 = vmatpush.msra.mxu0 %v27_v1  ;;  %83 = vmatpush.msra.mxu1 %v27_v1  ;;  %v87_v13 = vld [vmem:[%s145_s2] ss:$0 sm:$0xff] }
   0x6   :  { %50 = vmatpush.msra.mxu0 %v26_v3  ;;  %84 = vmatpush.msra.mxu1 %v26_v3 }
   0x8   :  { %51 = vmatpush.msra.mxu0 %v25_v4  ;;  %85 = vmatpush.msra.mxu1 %v25_v4  ;;  %v21_v7 = vld [vmem:[#allocation2] sm:$0xff] }
   0x9   :  { %80 = vmatmul.msk.f32.vlgmr.msra.gmra.mxu0 %vm18_vm0, %v23_v5  ;;  %81 = vmatmul.msk.f32.vlgmr.msra.gmra.mxu1 %vm18_vm0, %v24_v6  ;;  %v22_v8 = vld [vmem:[#allocation2 + $0x8] sm:$0xff] }
  0x86   :  { %v53_v9 = vpop.f32.mrf.mxu0  ;;  %v56_v10 = vpop.f32.mrf.mxu1 }
  0x87   :  { %v59_v11 = vadd.f32 %v53_v9, %v21_v7  ;;  %v60_v12 = vadd.f32 %v56_v10, %v22_v8 }
  0x89   :  { %61 = vst.msk [vmem:[#allocation2] sm:$0xff] %vm18_vm0, %v59_v11 }
  0x8a   :  { %62 = vst.msk [vmem:[#allocation2 + $0x8] sm:$0xff] %vm18_vm0, %v60_v12 }
  0x90   :  { %v66_v14 = vld [vmem:[#allocation2] sm:$0xff] }
  0x91   :  { %v72_v15 = vadd.f32 %v87_v13, %v66_v14  ;;  %v67_v16 = vld [vmem:[#allocation2 + $0x8] sm:$0xff] }
  0x92   :  { %v73_v17 = vadd.f32 %v87_v13, %v67_v16 }
  0x93   :  { %74 = vst.msk [vmem:[%s147_s3] sm:$0xff] %vm18_vm0, %v72_v15 }
  0x94   :  { %75 = vst.msk [vmem:[%s147_s3 + $0x8] sm:$0xff] %vm18_vm0, %v73_v17 }

// kernel: decoder_layer_forward.16
= control target key start
LH: loop header
LB: loop body
LE: loop exit
PB: predicated region body
PF: predicated region fallthrough
CT: control target
= control target key end

     0   :  { %9 = vsyncpa [#allocation3], 0  ;;  %s244_s0 = inlined_call_operand.vmem [shape: f32[16,32], index: 0, kind: input, shape index: {}]   ;;  %s245_s1 = inlined_call_operand.vmem [shape: f32[16,32], index: 1, kind: input, shape index: {}]   ;;  %s246_s2 = inlined_call_operand.hbm [shape: f32[1,32], index: 2, kind: input, shape index: {}]   ;;  %s247_s3 = inlined_call_operand.hbm [shape: f32[1,32], index: 3, kind: input, shape index: {}]   ;;  %s248_s4 = inlined_call_operand.vmem [shape: f32[16,32], index: 4, kind: output, shape index: {}]  }
   0x1   :  { %s20_s17 = sshll.u32 %s246_s2, 4  ;;  %s21_s17 = int_to_ptr.hbm [resolvable:$true] %s20_s17 }
   0x2   :  { %10 = vsyncpa [#allocation5], 0  ;;  %s186_s18 = smov [#allocation2]   ;;  %s31_s22 = sshll.u32 %s247_s3, 4  ;;  %s32_s22 = int_to_ptr.hbm [resolvable:$true] %s31_s22 }
   0x3   :  { %s22_s19 = sshll.u32 %s186_s18, 4  ;;  %s187_s23 = smov [#allocation4]   ;;  %s23_s19 = int_to_ptr.vmem [resolvable:$true] %s22_s19 }
   0x4   :  { %25 = dma.hbm_to_vmem [thread:$0]  %s21_s17, 16, %s23_s19, [#allocation3]  }
   0x5   :  { %s33_s24 = sshll.u32 %s187_s23, 4  ;;  %s34_s24 = int_to_ptr.vmem [resolvable:$true] %s33_s24 }
   0x6   :  { %36 = dma.hbm_to_vmem [thread:$0]  %s32_s22, 16, %s34_s24, [#allocation5]  }
   0x7   :  { %182 = dma.done.wait [#allocation3], 16  }
   0x8   :  { %183 = vsyncadd [#allocation3], 4294967280 }
   0x9   :  { %184 = dma.done.wait [#allocation5], 16  }
   0xa   :  { %185 = vsyncadd [#allocation5], 4294967280  ;;  %v45_v0 = vld [vmem:[%s244_s0] sm:$0xff]  ;;  %vm51_vm0 = vcmask 261120   ;;  %v46_v3 = vld [vmem:[%s244_s0 + $0x8] sm:$0xff]  ;;  %v188_v8 = vmov 32.0  }
   0xb   :  { %v47_v1 = vld [vmem:[%s245_s1] sm:$0xff]  ;;  %v48_v4 = vld [vmem:[%s245_s1 + $0x8] sm:$0xff]  ;;  %128 = vrcp.f32 %v188_v8 }
   0xc   :  { %v49_v2 = vadd.f32 %v47_v1, %v45_v0  ;;  %v50_v6 = vadd.f32 %v48_v4, %v46_v3  ;;  %v126_v39 = vld [vmem:[#allocation2] ss:$0 sm:$0xff]  ;;  %v127_v42 = vld [vmem:[#allocation4] ss:$0 sm:$0xff] }
   0xe   :  { %v52_v5 = vsel %vm51_vm0, %v49_v2, 0.0  ;;  %v55_v7 = vsel %vm51_vm0, %v50_v6, 0.0 }
   0xf   :  { %53 = vadd.xlane.f32.xlu0 %v52_v5 }
  0x11   :  { %v129_v9 = vpop.eup %128 }
  0x12   :  { %v59_v10 = vmul.f32 32.0, %v129_v9  ;;  %vm63_vm1 = vweird.f32 %v129_v9 }
  0x14   :  { %v60_v11 = vsub.f32 1.0, %v59_v10 }
  0x16   :  { %v61_v12 = vmul.f32 %v129_v9, %v60_v11 }
  0x17   :  { %56 = vadd.xlane.f32.xlu0 %v55_v7 }
  0x18   :  { %v62_v13 = vadd.f32 %v129_v9, %v61_v12 }
  0x1a   :  { %v64_v14 = vsel %vm63_vm1, %v129_v9, %v62_v13 }
  0x82   :  { %v54_v15 = vpop.xlane.xlu0 %53 }
  0x83   :  { %v65_v16 = vmul.f32 %v64_v14, %v54_v15 }
  0x85   :  { %v67_v17 = vsub.f32 %v49_v2, %v65_v16 }
  0x87   :  { %v69_v18 = vmul.f32 %v67_v17, %v67_v17 }
  0x89   :  { %v71_v19 = vsel %vm51_vm0, %v69_v18, 0.0 }
  0x8a   :  { %72 = vadd.xlane.f32.xlu1 %v71_v19  ;;  %v57_v20 = vpop.xlane.xlu0 %56 }
  0x8b   :  { %v66_v21 = vmul.f32 %v64_v14, %v57_v20 }
  0x8d   :  { %v68_v22 = vsub.f32 %v50_v6, %v66_v21 }
  0x8f   :  { %v70_v23 = vmul.f32 %v68_v22, %v68_v22 }
  0x91   :  { %v74_v24 = vsel %vm51_vm0, %v70_v23, 0.0 }
  0x92   :  { %75 = vadd.xlane.f32.xlu1 %v74_v24 }
  0xfd   :  { %v73_v25 = vpop.xlane.xlu1 %72 }
  0xfe   :  { %v77_v26 = vmul.f32 %v73_v25, %v64_v14 }
 0x100   :  { %v79_v27 = vadd.f32 1e-12, %v77_v26 }
 0x102   :  { %130 = vrsqrt.f32 %v79_v27  ;;  %vm87_vm3 = vweird.f32 %v79_v27 }
 0x105   :  { %v76_v28 = vpop.xlane.xlu1 %75 }
 0x106   :  { %v78_v29 = vmul.f32 %v76_v28, %v64_v14 }
 0x108   :  { %v131_v30 = vpop.eup %130  ;;  %v80_v31 = vadd.f32 1e-12, %v78_v29 }
 0x109   :  { %v82_v32 = vmul.f32 %v131_v30, %v79_v27  ;;  %vm88_vm2 = vweird.f32 %v131_v30 }
 0x10a   :  { %132 = vrsqrt.f32 %v80_v31  ;;  %vm89_vm4 = vmor %vm87_vm3, %vm88_vm2  ;;  %vm97_vm6 = vweird.f32 %v80_v31 }
 0x10b   :  { %v83_v33 = vmul.f32 %v131_v30, %v82_v32 }
 0x10d   :  { %v84_v34 = vmul.f32 0.5, %v83_v33 }
 0x10f   :  { %v85_v35 = vsub.f32 1.5, %v84_v34 }
 0x110   :  { %v133_v36 = vpop.eup %132 }
 0x111   :  { %v86_v37 = vmul.f32 %v131_v30, %v85_v35  ;;  %v92_v38 = vmul.f32 %v133_v36, %v80_v31  ;;  %vm98_vm5 = vweird.f32 %v133_v36 }
 0x112   :  { %vm99_vm7 = vmor %vm97_vm6, %vm98_vm5 }
 0x113   :  { %v90_v40 = vsel %vm89_vm4, %v131_v30, %v86_v37  ;;  %v93_v41 = vmul.f32 %v133_v36, %v92_v38 }
 0x114   :  { %v101_v43 = vmul.f32 %v90_v40, %v67_v17 }
 0x115   :  { %v94_v44 = vmul.f32 0.5, %v93_v41 }
 0x116   :  { %v107_v45 = vmul.f32 %v126_v39, %v101_v43 }
 0x117   :  { %v95_v46 = vsub.f32 1.5, %v94_v44 }
 0x118   :  { %v113_v47 = vadd.f32 %v127_v42, %v107_v45 }
 0x119   :  { %v96_v48 = vmul.f32 %v133_v36, %v95_v46 }
 0x11a   :  { %115 = vst.msk [vmem:[%s248_s4] sm:$0xff] %vm51_vm0, %v113_v47 }
 0x11b   :  { %v100_v49 = vsel %vm99_vm7, %v133_v36, %v96_v48 }
 0x11c   :  { %v102_v50 = vmul.f32 %v100_v49, %v68_v22 }
 0x11e   :  { %v108_v51 = vmul.f32 %v126_v39, %v102_v50 }
 0x120   :  { %v114_v52 = vadd.f32 %v127_v42, %v108_v51 }
 0x122   :  { %116 = vst.msk [vmem:[%s248_s4 + $0x8] sm:$0xff] %vm51_vm0, %v114_v52 }
 0x123   :  { %121 = vsyncpa [#allocation3], 1 }
 0x124   :  { %122 = vsyncpa [#allocation5], 1 }

// kernel: decoder_layer_forward.14
= control target key start
LH: loop header
LB: loop body
LE: loop exit
PB: predicated region body
PF: predicated region fallthrough
CT: control target
= control target key end

     0   :  { %s1394_s0 = inlined_call_operand.vmem [shape: f32[2,8,32], index: 0, kind: input, shape index: {}]   ;;  %s1395_s1 = inlined_call_operand.vmem [shape: f32[2,8,32], index: 1, kind: input, shape index: {}]   ;;  %s1396_s2 = inlined_call_operand.vmem [shape: f32[2,8,32], index: 2, kind: input, shape index: {}]   ;;  %s1397_s3 = inlined_call_operand.vmem [shape: f32[2,8,8], index: 3, kind: input, shape index: {}]   ;;  %s1398_s4 = inlined_call_operand.vmem [shape: f32[8,8], index: 4, kind: input, shape index: {}]   ;;  %s1399_s5 = inlined_call_operand.hbm [shape: f32[4], index: 5, kind: input, shape index: {}]   ;;  %s1400_s6 = inlined_call_operand.vmem [shape: f32[2,8,32], index: 6, kind: output, shape index: {0}]   ;;  %s1401_s7 = inlined_call_operand.hbm [shape: f32[2,4,8,8], index: 7, kind: output, shape index: {1}]  }
   0x1   :  { %1403 = sst [smem:[#allocation8_spill]] %s1394_s0 }
   0x2   :  { %13 = vsyncpa [#allocation4], 0 }
   0x3   :  { %14 = vsyncpa [#allocation3], 0 }
   0x4   :  { %16 = vsyncpa [#allocation3 + $0x1], 0  ;;  %s1168_s24 = smov 0   ;;  %s1170_s25 = smov 0  }
   0x5   :  { %s1172_s26 = smov 0   ;;  %s1174_s27 = smov 0  }
   0x6 LB: > { %s1189_s28 = sadd.s32 4294967295, %s1118_s27   ;;  %s896_s29 = sadd.s32 4294967294, %s1118_s27   ;;  %s1118_s27 = sphi %s1174_s27, %s1411_s27   ;;  %s1114_s26 = sphi %s1172_s26, %s1410_s26   ;;  %s1110_s25 = sphi %s1170_s25, %s1409_s25   ;;  %s1106_s24 = sphi %s1168_s24, %s1408_s24  }
   0x7   : > { %s1193_s30 = sadd.s32 1, %s1118_s27   ;;  %s201_s8 = sadd.s32 1, %s1114_s26 }
   0x8   : > { %s198_s9 = ssub.s32 %s1118_s27, %s1193_s30  ;;  %p211_p0 = scmp.ne.s32.totalorder %s1114_s26, %s1110_s25 }
   0x9   : > { %p199_p1 = scmp.eq.s32.totalorder %s198_s9, 0  ;;  %p212_p2 = scmp.eq.s32.totalorder %s1189_s28, 1 }
   0xa   : > { %p217_p3 = scmp.ne.s32.totalorder %s1110_s25, %s1106_s24  ;;  %p218_p4 = scmp.eq.s32.totalorder %s896_s29, 1 }
   0xb   : > { %s1204_s10 = scalar_select %p199_p1, %s1114_s26, %s201_s8  }
   0xc   : > { %p1206_p5 = por %p212_p2, %p211_p0  ;;  %p1210_p6 = por %p218_p4, %p217_p3 }
   0xd   : > { %p897_p7 = scmp.ge.s32.totalorder %s1118_s27, 1  ;;  %p225_p8 = scmp.lt.s32.totalorder %s1118_s27, 3 }
   0xe   : > { %p946_p9 = scmp.eq.s32.totalorder %s1189_s28, 0  ;;  %s240_s15 = sshll.u32 %s1399_s5, 4  ;;  %s241_s15 = int_to_ptr.hbm [resolvable:$true] %s240_s15 }
   0xf   : > { %p226_p10 = pnand %p897_p7, %p225_p8  ;;  %s1120_s16 = smov [#allocation2]  }
  0x11   : > { %p938_p11 = pneg %p226_p10  ;;  %281 = sbr.rel (%p226_p10) target bundleno = 1634 (0x662), region = 44 }
  0x13   : > { %p939_p12 = pnand %p946_p9, %p938_p11 }
  0x15   : > { %941 = dma.hbm_to_smem (!%p939_p12), %s241_s15, 16, %s1120_s16, [#allocation4]  }
  0x16   : > { %1097 = dma.done.wait (%p946_p9), [#allocation4], 16  }
  0x17   : > { %1099 = vsyncadd (%p946_p9), [#allocation4], 4294967280 }
  0x18   : > { %288 = sfence }
  0x19   : > { %p330_p13 = scmp.lt.s32.totalorder %s1189_s28, 1  ;;  %vm356_vm0 = vcmask 64512   ;;  %s1406_s0 = sld [smem:[#allocation8_spill]]  ;;  %v1261_v21 = vld [vmem:[%s1398_s4] sm:$0xff] }
  0x1a   : > { %s1121_s14 = smov 120   ;;  %s1122_s15 = smov 112  }
  0x1b   : > { %s331_s17 = scalar_select %p330_p13, %s1189_s28, 1 }
  0x1c   : > { %s1123_s16 = smov 104   ;;  %s923_s19 = sld [smem:[#allocation2 + $0x3]] }
  0x1d   : > { %s1222_s18 = sshll.u32 %s331_s17, 3  ;;  %s397_s17 = sld [smem:[#allocation2]] }
  0x1e   : > { %s337_s21 = scalar_lea.vmem %s1395_s1, %s1222_s18  ;;  %s345_s13 = scalar_lea.vmem %s1397_s3, %s1222_s18 }
  0x1f   : > { %v1228_v0 = vld [vmem:[%s337_s21] sm:$0xff]  ;;  %s333_s29 = scalar_lea.vmem %s1406_s0, %s1222_s18  ;;  %s341_s23 = scalar_lea.vmem %s1396_s2, %s1222_s18 }
  0x20   : > { %908 = vmatpush.xpose.msk.msra.mxu0 %vm356_vm0, %v1228_v0  ;;  %v350_v1 = vld [vmem:[%s333_s29] sm:$0xff]  ;;  %445 = vrot.lane.b32.xlu2 %v1228_v0, %s1121_s14  ;;  %s327_s29 = sand.u32 1, %s1110_s25  }
  0x21   : > { %v1241_v2 = vld [vmem:[%s345_s13] sm:$0xff]  ;;  %s902_s8 = sshll.u32 %s327_s29, 5  ;;  %s913_s13 = sld [smem:[#allocation2 + $0x1]] }
  0x22   : > { %vm354_vm1 = vcmp.gt.f32.partialorder %v1241_v2, 0.0  ;;  %v1281_v45 = vld [vmem:[%s341_s23] sm:$0xff]  ;;  %s1290_s9 = scalar_lea.vmem [#allocation5], %s902_s8  ;;  %s744_s8 = scalar_lea.sflag [#allocation3], %s327_s29 }
  0x23   : > { %909 = vmatmul.msk.f32.vlgmr.msra.gmra.mxu0 %vm356_vm0, %v350_v1  ;;  %v398_v17 = vstv %s397_s17  ;;  %437 = vmatpush.msra.mxu1 %v1281_v45  ;;  %s918_s17 = sld [smem:[#allocation2 + $0x2]]  ;;  %s759_s22 = sshll.u32 %s1290_s9, 4  ;;  %s760_s22 = int_to_ptr.vmem [resolvable:$true] %s759_s22 }
  0x27   : > { %v486_v56 = vstv %s913_s13 }
  0x28   : > { %443 = vrot.lane.b32.xlu2 %v350_v1, %s1121_s14 }
  0x30   : > { %536 = vrot.lane.b32.xlu2 %v350_v1, %s1122_s15 }
  0x38   : > { %628 = vrot.lane.b32.xlu2 %v350_v1, %s1123_s16 }
  0x7a   : > { %v446_v12 = vpop.permute.xlu2 %445 }
  0x7b   : > { %911 = vmatpush.xpose.msk.msra.mxu2 %vm356_vm0, %v446_v12 }
  0x82   : > { %v444_v13 = vpop.permute.xlu2 %443 }
  0x83   : > { %912 = vmatmul.msk.f32.vlgmr.msra.gmra.mxu2 %vm356_vm0, %v444_v13 }
  0x8a   : > { %v537_v38 = vpop.permute.xlu2 %536 }
  0x92   : > { %v629_v39 = vpop.permute.xlu2 %628 }
  0xa0   : > { %v380_v3 = vpop.f32.mrf.mxu0 }
  0xa1   : > { %v383_v4 = vmul.f32 0.35355338, %v380_v3 }
  0xa3   : > { %v384_v5 = vsel %vm354_vm1, %v383_v4, -1e+32 }
  0xa4   : > { %v385_v6 = vsel %vm356_vm0, %v384_v5, -inf }
  0xa5   : > { %386 = vmax.xlane.f32.xlu0 %v385_v6 }
 0x106   : > { %v468_v29 = vpop.f32.mrf.mxu2 }
 0x107   : > { %v1267_v30 = vmul.f32 0.35355338, %v468_v29 }
 0x109   : > { %v472_v31 = vsel %vm354_vm1, %v1267_v30, -1e+32 }
 0x10a   : > { %v473_v32 = vsel %vm356_vm0, %v472_v31, -inf }
 0x10b   : > { %474 = vmax.xlane.f32.xlu2 %v473_v32  ;;  %v579_v32 = vstv %s918_s17 }
 0x118   : > { %v387_v7 = vpop.xlane.xlu0 %386 }
 0x119   : > { %v388_v8 = vsub.f32 %v384_v5, %v387_v7 }
 0x11b   : > { %v389_v9 = vmul.f32 1.442695, %v388_v8 }
 0x11d   : > { %989 = vpow2.f32 %v389_v9 }
 0x123   : > { %v990_v10 = vpop.eup %989 }
 0x124   : > { %v391_v11 = vsel %vm356_vm0, %v990_v10, 0.0 }
 0x125   : > { %392 = vadd.xlane.f32.xlu0 %v391_v11 }
 0x139   : > { %538 = vrot.lane.b32.xlu0 %v1228_v0, %s1122_s15 }
 0x17e   : > { %v475_v40 = vpop.xlane.xlu2 %474 }
 0x17f   : > { %v476_v41 = vsub.f32 %v472_v31, %v475_v40 }
 0x181   : > { %v477_v42 = vmul.f32 1.442695, %v476_v41 }
 0x198   : > { %v393_v14 = vpop.xlane.xlu0 %392 }
 0x199   : > { %991 = vrcp.f32 %v393_v14 }
 0x19f   : > { %v992_v15 = vpop.eup %991 }
 0x1a0   : > { %v395_v16 = vmul.f32 %v992_v15, %v990_v10 }
 0x1a2   : > { %v396_v18 = vmul.f32 %v395_v16, %v1241_v2 }
 0x1a4   : > { %v399_v19 = vmul.f32 %v398_v17, %v396_v18 }
 0x1a6   : > { %v400_v20 = vadd.f32 1.0, %v399_v19 }
 0x1a8   : > { %993 = vrcp.f32 %v400_v20 }
 0x1ab   : > { %v539_v46 = vpop.permute.xlu0 %538 }
 0x1ac   : > { %916 = vmatpush.xpose.msk.msrb.mxu1 %vm356_vm0, %v539_v46 }
 0x1ae   : > { %v994_v22 = vpop.eup %993 }
 0x1af   : > { %v402_v23 = vmul.f32 %v994_v22, %v1261_v21 }
 0x1b1   : > { %v403_v24 = vmul.f32 1.442695, %v402_v23 }
 0x1b3   : > { %995 = vpow2.f32 %v403_v24 }
 0x1b9   : > { %v996_v25 = vpop.eup %995 }
 0x1ba   : > { %v405_v26 = vmul.f32 %v996_v25, %v383_v4 }
 0x1bc   : > { %v406_v27 = vsel %vm354_vm1, %v405_v26, -1e+32 }
 0x1bd   : > { %v407_v28 = vsel %vm356_vm0, %v406_v27, -inf }
 0x1be   : > { %408 = vmax.xlane.f32.xlu1 %v407_v28 }
 0x231   : > { %v409_v33 = vpop.xlane.xlu1 %408 }
 0x232   : > { %v410_v34 = vsub.f32 %v406_v27, %v409_v33 }
 0x234   : > { %v411_v35 = vmul.f32 1.442695, %v410_v34 }
 0x236   : > { %997 = vpow2.f32 %v411_v35 }
 0x237   : > { %999 = vpow2.f32 %v477_v42 }
 0x23c   : > { %v998_v36 = vpop.eup %997 }
 0x23d   : > { %v413_v37 = vsel %vm356_vm0, %v998_v36, 0.0  ;;  %v1000_v43 = vpop.eup %999 }
 0x23e   : > { %414 = vadd.xlane.f32.xlu1 %v413_v37  ;;  %v479_v44 = vsel %vm356_vm0, %v1000_v43, 0.0 }
 0x23f   : > { %480 = vadd.xlane.f32.xlu2 %v479_v44 }
 0x257   : > { %630 = vrot.lane.b32.xlu1 %v1228_v0, %s1123_s16 }
 0x2b1   : > { %v415_v47 = vpop.xlane.xlu1 %414 }
 0x2b2   : > { %1001 = vrcp.f32 %v415_v47  ;;  %v481_v52 = vpop.xlane.xlu2 %480 }
 0x2b3   : > { %1003 = vrcp.f32 %v481_v52 }
 0x2b8   : > { %v1002_v48 = vpop.eup %1001 }
 0x2b9   : > { %v417_v49 = vmul.f32 %v1002_v48, %v998_v36  ;;  %v1004_v53 = vpop.eup %1003 }
 0x2ba   : > { %v483_v54 = vmul.f32 %v1004_v53, %v1000_v43 }
 0x2bb   : > { %v418_v50 = vmul.f32 %v417_v49, %v1241_v2 }
 0x2bc   : > { %v484_v55 = vmul.f32 %v483_v54, %v1241_v2 }
 0x2bd   : > { %910 = vmatmul.msk.f32.vlgmr.msra.gmra.mxu1 %vm356_vm0, %v418_v50  ;;  %442 = vst.msk [vmem:[%s1290_s9] sm:$0xff] %vm356_vm0, %v418_v50 }
 0x2be   : > { %v487_v57 = vmul.f32 %v486_v56, %v484_v55 }
 0x2c0   : > { %v488_v58 = vadd.f32 1.0, %v487_v57 }
 0x2c2   : > { %1005 = vrcp.f32 %v488_v58 }
 0x2c5   : > { %917 = vmatmul.msk.f32.vlgmr.msrb.gmra.mxu1 %vm356_vm0, %v537_v38 }
 0x2c8   : > { %v1006_v60 = vpop.eup %1005 }
 0x2c9   : > { %v631_v51 = vpop.permute.xlu1 %630  ;;  %v490_v61 = vmul.f32 %v1006_v60, %v1261_v21 }
 0x2ca   : > { %921 = vmatpush.xpose.msk.msrb.mxu0 %vm356_vm0, %v631_v51 }
 0x2cb   : > { %v491_v63 = vmul.f32 1.442695, %v490_v61 }
 0x2cd   : > { %922 = vmatmul.msk.f32.vlgmr.msrb.gmra.mxu0 %vm356_vm0, %v629_v39  ;;  %1007 = vpow2.f32 %v491_v63  ;;  %v671_v39 = vstv %s923_s19 }
 0x2d3   : > { %v1008_v6 = vpop.eup %1007 }
 0x2d4   : > { %v493_v9 = vmul.f32 %v1008_v6, %v1267_v30 }
 0x2d6   : > { %v494_v10 = vsel %vm354_vm1, %v493_v9, -1e+32 }
 0x2d7   : > { %v495_v11 = vsel %vm356_vm0, %v494_v10, -inf }
 0x33a   : > { %v1298_v59 = vpop.f32.mrf.mxu1 }
 0x342   : > { %v561_v62 = vpop.f32.mrf.mxu1 }
 0x343   : > { %v1301_v0 = vmul.f32 0.35355338, %v561_v62 }
 0x345   : > { %v565_v1 = vsel %vm354_vm1, %v1301_v0, -1e+32 }
 0x346   : > { %v566_v3 = vsel %vm356_vm0, %v565_v1, -inf }
 0x347   : > { %567 = vmax.xlane.f32.xlu0 %v566_v3 }
 0x34a   : > { %v653_v4 = vpop.f32.mrf.mxu0 }
 0x34b   : > { %v1307_v5 = vmul.f32 0.35355338, %v653_v4 }
 0x34d   : > { %v657_v7 = vsel %vm354_vm1, %v1307_v5, -1e+32 }
 0x34e   : > { %v658_v8 = vsel %vm356_vm0, %v657_v7, -inf }
 0x34f   : > { %659 = vmax.xlane.f32.xlu1 %v658_v8 }
 0x357   : > { %496 = vmax.xlane.f32.xlu1 %v495_v11 }
 0x3ba   : > { %v568_v12 = vpop.xlane.xlu0 %567 }
 0x3bb   : > { %v569_v13 = vsub.f32 %v565_v1, %v568_v12 }
 0x3bd   : > { %v570_v14 = vmul.f32 1.442695, %v569_v13 }
 0x3bf   : > { %1009 = vpow2.f32 %v570_v14 }
 0x3c2   : > { %v660_v15 = vpop.xlane.xlu1 %659 }
 0x3c3   : > { %v661_v16 = vsub.f32 %v657_v7, %v660_v15 }
 0x3c5   : > { %v1010_v17 = vpop.eup %1009  ;;  %v662_v18 = vmul.f32 1.442695, %v661_v16 }
 0x3c6   : > { %v572_v19 = vsel %vm356_vm0, %v1010_v17, 0.0 }
 0x3c7   : > { %1011 = vpow2.f32 %v662_v18  ;;  %573 = vadd.xlane.f32.xlu0 %v572_v19 }
 0x3ca   : > { %v497_v20 = vpop.xlane.xlu1 %496 }
 0x3cb   : > { %v498_v22 = vsub.f32 %v494_v10, %v497_v20 }
 0x3cd   : > { %v1012_v23 = vpop.eup %1011  ;;  %v499_v24 = vmul.f32 1.442695, %v498_v22 }
 0x3ce   : > { %v664_v25 = vsel %vm356_vm0, %v1012_v23, 0.0 }
 0x3cf   : > { %1013 = vpow2.f32 %v499_v24  ;;  %665 = vadd.xlane.f32.xlu2 %v664_v25 }
 0x3d5   : > { %v1014_v26 = vpop.eup %1013 }
 0x3d6   : > { %v501_v27 = vsel %vm356_vm0, %v1014_v26, 0.0 }
 0x3d7   : > { %502 = vadd.xlane.f32.xlu1 %v501_v27 }
 0x3f0   : > { %508 = vrot.lane.b32.xlu1 %v1281_v45, %s1121_s14  ;;  %s1402_s14 = smov 8  }
 0x43a   : > { %v574_v28 = vpop.xlane.xlu0 %573 }
 0x43b   : > { %1015 = vrcp.f32 %v574_v28 }
 0x441   : > { %v1016_v29 = vpop.eup %1015 }
 0x442   : > { %v576_v30 = vmul.f32 %v1016_v29, %v1010_v17  ;;  %v666_v31 = vpop.xlane.xlu2 %665 }
 0x443   : > { %1017 = vrcp.f32 %v666_v31 }
 0x444   : > { %v577_v33 = vmul.f32 %v576_v30, %v1241_v2 }
 0x446   : > { %v580_v34 = vmul.f32 %v579_v32, %v577_v33 }
 0x448   : > { %v581_v35 = vadd.f32 1.0, %v580_v34 }
 0x449   : > { %v1018_v36 = vpop.eup %1017 }
 0x44a   : > { %1019 = vrcp.f32 %v581_v35  ;;  %v668_v37 = vmul.f32 %v1018_v36, %v1012_v23  ;;  %v503_v38 = vpop.xlane.xlu1 %502 }
 0x44b   : > { %1021 = vrcp.f32 %v503_v38 }
 0x44c   : > { %v669_v40 = vmul.f32 %v668_v37, %v1241_v2 }
 0x44e   : > { %v672_v41 = vmul.f32 %v671_v39, %v669_v40 }
 0x450   : > { %v1020_v42 = vpop.eup %1019  ;;  %v673_v43 = vadd.f32 1.0, %v672_v41 }
 0x451   : > { %v1022_v44 = vpop.eup %1021  ;;  %v583_v46 = vmul.f32 %v1020_v42, %v1261_v21 }
 0x452   : > { %1023 = vrcp.f32 %v673_v43  ;;  %v505_v47 = vmul.f32 %v1022_v44, %v1014_v26 }
 0x453   : > { %v584_v48 = vmul.f32 1.442695, %v583_v46 }
 0x454   : > { %v506_v49 = vmul.f32 %v505_v47, %v1241_v2 }
 0x455   : > { %1025 = vpow2.f32 %v584_v48 }
 0x456   : > { %915 = vst.msk [vmem:[%s1290_s9 + $0x8] sm:$0xff] %vm356_vm0, %v506_v49 }
 0x458   : > { %v1024_v50 = vpop.eup %1023 }
 0x459   : > { %v675_v51 = vmul.f32 %v1024_v50, %v1261_v21 }
 0x45b   : > { %v1026_v52 = vpop.eup %1025  ;;  %v676_v53 = vmul.f32 1.442695, %v675_v51 }
 0x45c   : > { %v586_v54 = vmul.f32 %v1026_v52, %v1301_v0 }
 0x45d   : > { %1027 = vpow2.f32 %v676_v53 }
 0x45e   : > { %v587_v55 = vsel %vm354_vm1, %v586_v54, -1e+32 }
 0x45f   : > { %v588_v56 = vsel %vm356_vm0, %v587_v55, -inf }
 0x460   : > { %589 = vmax.xlane.f32.xlu0 %v588_v56 }
 0x462   : > { %v509_v57 = vpop.permute.xlu1 %508 }
 0x463   : > { %v1028_v58 = vpop.eup %1027  ;;  %529 = vmatpush.msra.mxu3 %v509_v57 }
 0x464   : > { %914 = vmatmul.msk.f32.vlgmr.msra.gmra.mxu3 %vm356_vm0, %v506_v49  ;;  %v678_v60 = vmul.f32 %v1028_v58, %v1307_v5 }
 0x466   : > { %v679_v21 = vsel %vm354_vm1, %v678_v60, -1e+32 }
 0x467   : > { %v680_v61 = vsel %vm356_vm0, %v679_v21, -inf }
 0x468   : > { %681 = vmax.xlane.f32.xlu2 %v680_v61 }
 0x4d3   : > { %v590_v62 = vpop.xlane.xlu0 %589 }
 0x4d4   : > { %v591_v63 = vsub.f32 %v587_v55, %v590_v62 }
 0x4d6   : > { %v592_v0 = vmul.f32 1.442695, %v591_v63 }
 0x4d8   : > { %1029 = vpow2.f32 %v592_v0 }
 0x4db   : > { %v682_v1 = vpop.xlane.xlu2 %681 }
 0x4dc   : > { %v683_v3 = vsub.f32 %v679_v21, %v682_v1 }
 0x4de   : > { %v1030_v4 = vpop.eup %1029  ;;  %v684_v6 = vmul.f32 1.442695, %v683_v3 }
 0x4df   : > { %v594_v7 = vsel %vm356_vm0, %v1030_v4, 0.0 }
 0x4e0   : > { %1031 = vpow2.f32 %v684_v6  ;;  %595 = vadd.xlane.f32.xlu0 %v594_v7 }
 0x4e6   : > { %v1032_v5 = vpop.eup %1031 }
 0x4e7   : > { %v686_v8 = vsel %vm356_vm0, %v1032_v5, 0.0  ;;  %v531_v9 = vpop.f32.mrf.mxu3 }
 0x4e8   : > { %687 = vadd.xlane.f32.xlu2 %v686_v8 }
 0x4f4   : > { %600 = vrot.lane.b32.xlu0 %v1281_v45, %s1122_s15  ;;  %s931_s15 = sshll.u32 %s1189_s28, 5  ;;  %s1072_s28 = scalar_lea.hbm %s1401_s7, 64 }
 0x4f5   : > { %s758_s21 = scalar_lea.hbm %s1401_s7, %s931_s15 }
 0x4f6   : > { %s761_s23 = sshll.u32 %s758_s21, 4  ;;  %s762_s23 = int_to_ptr.hbm [resolvable:$true] %s761_s23 }
 0x4f7   : > { %s1066_s13 = sshra.s32 %s762_s23, 4  ;;  %s1067_s13 = int_to_ptr.hbm [resolvable:$true] %s1066_s13 }
 0x4f8   : > { %s1068_s17 = scalar_lea.hbm %s1067_s13, 32  ;;  %p1073_p3 = scmp.lt.s32.totalorder %s1067_s13, %s1401_s7 }
 0x4f9   : > { %p1069_p0 = scmp.ne.s32.totalorder %s1067_s13, %s1068_s17  ;;  %p1074_p4 = scmp.lt.s32.totalorder %s1072_s28, %s1068_s17 }
 0x4fb   : > { %p1070_p1 = pnand %p1069_p0, %p1206_p5  ;;  %p1075_p7 = por %p1074_p4, %p1073_p3 }
 0x4fc   : > { %721 = vrot.lane.b32.xlu0 %v531_v9, %s1402_s14 }
 0x4fd   : > { %p1071_p2 = pneg %p1070_p1 }
 0x4ff   : > { %p1076_p8 = pnand %p1075_p7, %p1071_p2 }
 0x500   : > { %692 = vrot.lane.b32.xlu2 %v1281_v45, %s1123_s16 }
 0x553   : > { %v596_v10 = vpop.xlane.xlu0 %595 }
 0x554   : > { %1033 = vrcp.f32 %v596_v10 }
 0x55a   : > { %v1034_v11 = vpop.eup %1033 }
 0x55b   : > { %v598_v12 = vmul.f32 %v1034_v11, %v1030_v4  ;;  %v688_v13 = vpop.xlane.xlu2 %687 }
 0x55c   : > { %1035 = vrcp.f32 %v688_v13 }
 0x55d   : > { %v599_v14 = vmul.f32 %v598_v12, %v1241_v2 }
 0x55f   : > { %920 = vst.msk [vmem:[%s1290_s9 + $0x10] sm:$0xff] %vm356_vm0, %v599_v14 }
 0x562   : > { %v1036_v15 = vpop.eup %1035 }
 0x563   : > { %v690_v16 = vmul.f32 %v1036_v15, %v1032_v5  ;;  %v693_v17 = vpop.permute.xlu2 %692 }
 0x564   : > { %713 = vmatpush.msrb.mxu2 %v693_v17 }
 0x565   : > { %v691_v45 = vmul.f32 %v690_v16, %v1241_v2 }
 0x566   : > { %v601_v18 = vpop.permute.xlu0 %600 }
 0x567   : > { %621 = vmatpush.msrb.mxu3 %v601_v18  ;;  %924 = vmatmul.msk.f32.vlgmr.msrb.gmra.mxu2 %vm356_vm0, %v691_v45  ;;  %925 = vst.msk [vmem:[%s1290_s9 + $0x18] sm:$0xff] %vm356_vm0, %v691_v45 }
 0x568   : > { %919 = vmatmul.msk.f32.vlgmr.msrb.gmra.mxu3 %vm356_vm0, %v599_v14 }
 0x569   : > { %1079 = shalt.err (!%p1076_p8)
}
 0x56a   : > { %s1125_s29 = smov 128   ;;  %s1407_s9 = smov 8   ;;  %vm733_vm2 = vcmask 130048   ;;  %vm735_vm3 = vcmask 195584   ;;  %vm737_vm4 = vcmask 261120  }
 0x56b   : > { %936 = dma.vmem_to_hbm [thread:$0]  (%p1206_p5), %s760_s22, 512, %s762_s23, %s744_s8, %s1125_s29, %s1125_s29, %s1407_s9  }
 0x56c   : > { %s1126_s15 = smov 24   ;;  %s1127_s14 = smov 16  }
 0x56d   : > { %s349_s21 = scalar_lea.vmem %s1400_s6, %s1222_s18 }
 0x56e   : > { %v722_v20 = vpop.permute.xlu0 %721 }
 0x56f   : > { %v732_v22 = vsel %vm356_vm0, %v1298_v59, %v722_v20 }
 0x5ea   : > { %v715_v2 = vpop.f32.mrf.mxu2 }
 0x5eb   : > { %729 = vrot.lane.b32.xlu2 %v715_v2, %s1126_s15  ;;  %v623_v19 = vpop.f32.mrf.mxu3 }
 0x5ec   : > { %725 = vrot.lane.b32.xlu1 %v623_v19, %s1127_s14 }
 0x645   : > { %v730_v24 = vpop.permute.xlu2 %729 }
 0x65e   : > { %v726_v23 = vpop.permute.xlu1 %725 }
 0x65f   : > { %v734_v25 = vsel %vm733_vm2, %v732_v22, %v726_v23 }
 0x660   : > { %v736_v26 = vsel %vm735_vm3, %v734_v25, %v730_v24 }
 0x661   : > { %738 = vst.msk [vmem:[%s349_s21] sm:$0xff] %vm737_vm4, %v736_v26 }
 0x662 PF: > { %p948_p5 = scmp.ge.s32.totalorder %s1118_s27, 2  ;;  %s783_s11 = sand.u32 1, %s1106_s24  }
 0x663   : > { %s784_s22 = scalar_lea.sflag [#allocation3], %s783_s11 }
 0x664   : > { %p943_p9 = pnand %p948_p5, %p1210_p6 }
 0x666   : > { %p944_p10 = pneg %p943_p9 }
 0x668   : > { %1101 = dma.done.wait (%p944_p10), %s784_s22, 512  }
 0x669   : > { %1103 = vsyncadd (%p944_p10), %s784_s22, 4294966784  ;;  %p19_p11 = scmp.ge.s32.totalorder %s1193_s30, 4   ;;  %s1408_s24 = smov %s1110_s25 }
 0x66a   : > { %s1409_s25 = smov %s1114_s26  ;;  %s1410_s26 = smov %s1204_s10 }
 0x66b   : > { %s1411_s27 = smov %s1193_s30  ;;  %21 = sbr.rel (!%p19_p11) target bundleno = 6 (0x6), region = 108 }
 0x670   :  { %790 = vsyncpa [#allocation3], 1 }
 0x671   :  { %792 = vsyncpa [#allocation3 + $0x1], 1 }
 0x672   :  { %793 = vsyncpa [#allocation4], 1 }
 0x673   :  { %795 = vsyncpa [#allocation4 + $0x1], 1 }

// kernel: decoder_layer_forward.18
= control target key start
LH: loop header
LB: loop body
LE: loop exit
PB: predicated region body
PF: predicated region fallthrough
CT: control target
= control target key end

     0   :  { %8 = vsyncpa [#allocation4], 0  ;;  %s130_s15 = smov [#allocation3]   ;;  %s187_s0 = inlined_call_operand.vmem [shape: f32[16,32], index: 0, kind: input, shape index: {}]   ;;  %s188_s1 = inlined_call_operand.vmem [shape: f32[32,32], index: 1, kind: input, shape index: {}]   ;;  %s189_s2 = inlined_call_operand.hbm [shape: f32[1,32], index: 2, kind: input, shape index: {}]   ;;  %s190_s3 = inlined_call_operand.vmem [shape: f32[16,32], index: 3, kind: output, shape index: {}]  }
   0x1   :  { %s18_s14 = sshll.u32 %s189_s2, 4  ;;  %s20_s16 = sshll.u32 %s130_s15, 4  ;;  %s19_s14 = int_to_ptr.hbm [resolvable:$true] %s18_s14  ;;  %s21_s16 = int_to_ptr.vmem [resolvable:$true] %s20_s16 }
   0x2   :  { %23 = dma.hbm_to_vmem [thread:$0]  %s19_s14, 16, %s21_s16, [#allocation4]  }
   0x3   :  { %128 = dma.done.wait [#allocation4], 16  }
   0x4   :  { %129 = vsyncadd [#allocation4], 4294967280  ;;  %vm32_vm0 = vcmask 261120   ;;  %v131_v0 = vmov 0.0   ;;  %v42_v1 = vld [vmem:[%s188_s1 + $0x18] sm:$0xff]  ;;  %v41_v2 = vld [vmem:[%s188_s1 + $0x10] sm:$0xff] }
   0x5   :  { %33 = vst.msk [vmem:[#allocation2] sm:$0xff] %vm32_vm0, %v131_v0  ;;  %62 = vmatpush.msra.mxu0 %v42_v1  ;;  %97 = vmatpush.msra.mxu1 %v42_v1  ;;  %v40_v3 = vld [vmem:[%s188_s1 + $0x8] sm:$0xff]  ;;  %v39_v4 = vld [vmem:[%s188_s1] sm:$0xff]  ;;  %v103_v13 = vld [vmem:[#allocation3] ss:$0 sm:$0xff] }
   0x6   :  { %34 = vst.msk [vmem:[#allocation2 + $0x8] sm:$0xff] %vm32_vm0, %v131_v0  ;;  %v37_v5 = vld [vmem:[%s187_s0] sm:$0xff]  ;;  %v38_v6 = vld [vmem:[%s187_s0 + $0x8] sm:$0xff] }
   0x7   :  { %63 = vmatpush.msra.mxu0 %v41_v2  ;;  %98 = vmatpush.msra.mxu1 %v41_v2 }
   0x9   :  { %64 = vmatpush.msra.mxu0 %v40_v3  ;;  %99 = vmatpush.msra.mxu1 %v40_v3 }
   0xb   :  { %65 = vmatpush.msra.mxu0 %v39_v4  ;;  %100 = vmatpush.msra.mxu1 %v39_v4 }
   0xc   :  { %95 = vmatmul.msk.f32.vlgmr.msra.gmra.mxu0 %vm32_vm0, %v37_v5  ;;  %96 = vmatmul.msk.f32.vlgmr.msra.gmra.mxu1 %vm32_vm0, %v38_v6  ;;  %v35_v7 = vld [vmem:[#allocation2] sm:$0xff] }
   0xd   :  { %v36_v8 = vld [vmem:[#allocation2 + $0x8] sm:$0xff] }
  0x89   :  { %v67_v9 = vpop.f32.mrf.mxu0  ;;  %v70_v10 = vpop.f32.mrf.mxu1 }
  0x8a   :  { %v73_v11 = vadd.f32 %v67_v9, %v35_v7  ;;  %v74_v12 = vadd.f32 %v70_v10, %v36_v8 }
  0x8c   :  { %75 = vst.msk [vmem:[#allocation2] sm:$0xff] %vm32_vm0, %v73_v11 }
  0x8d   :  { %76 = vst.msk [vmem:[#allocation2 + $0x8] sm:$0xff] %vm32_vm0, %v74_v12 }
  0x93   :  { %v80_v14 = vld [vmem:[#allocation2] sm:$0xff] }
  0x94   :  { %v86_v15 = vadd.f32 %v103_v13, %v80_v14  ;;  %v81_v16 = vld [vmem:[#allocation2 + $0x8] sm:$0xff] }
  0x95   :  { %v87_v17 = vadd.f32 %v103_v13, %v81_v16 }
  0x96   :  { %88 = vst.msk [vmem:[%s190_s3] sm:$0xff] %vm32_vm0, %v86_v15 }
  0x97   :  { %89 = vst.msk [vmem:[%s190_s3 + $0x8] sm:$0xff] %vm32_vm0, %v87_v17 }
  0x98   :  { %94 = vsyncpa [#allocation4], 1 }

// kernel: decoder_layer_forward.22
= control target key start
LH: loop header
LB: loop body
LE: loop exit
PB: predicated region body
PF: predicated region fallthrough
CT: control target
= control target key end

     0   :  { %vm23_vm0 = vcmask 261120   ;;  %v102_v8 = vmov 32.0   ;;  %s158_s0 = inlined_call_operand.vmem [shape: f32[16,32], index: 0, kind: input, shape index: {}]   ;;  %s159_s1 = inlined_call_operand.vmem [shape: f32[16,32], index: 1, kind: input, shape index: {}]   ;;  %s160_s2 = inlined_call_operand.vmem [shape: f32[1,32], index: 2, kind: input, shape index: {}]   ;;  %s161_s3 = inlined_call_operand.vmem [shape: f32[1,32], index: 3, kind: input, shape index: {}]   ;;  %s162_s4 = inlined_call_operand.vmem [shape: f32[16,32], index: 4, kind: output, shape index: {}]  }
   0x1   :  { %v17_v0 = vld [vmem:[%s158_s0] sm:$0xff]  ;;  %v18_v3 = vld [vmem:[%s158_s0 + $0x8] sm:$0xff]  ;;  %96 = vrcp.f32 %v102_v8 }
   0x2   :  { %v19_v1 = vld [vmem:[%s159_s1] sm:$0xff]  ;;  %v20_v4 = vld [vmem:[%s159_s1 + $0x8] sm:$0xff] }
   0x3   :  { %v21_v2 = vadd.f32 %v19_v1, %v17_v0  ;;  %v22_v6 = vadd.f32 %v20_v4, %v18_v3  ;;  %v94_v39 = vld [vmem:[%s160_s2] ss:$0 sm:$0xff] }
   0x4   :  { %v95_v42 = vld [vmem:[%s161_s3] ss:$0 sm:$0xff] }
   0x5   :  { %v24_v5 = vsel %vm23_vm0, %v21_v2, 0.0  ;;  %v27_v7 = vsel %vm23_vm0, %v22_v6, 0.0 }
   0x6   :  { %25 = vadd.xlane.f32.xlu0 %v24_v5 }
   0x7   :  { %v97_v9 = vpop.eup %96 }
   0x8   :  { %v31_v10 = vmul.f32 32.0, %v97_v9  ;;  %vm35_vm1 = vweird.f32 %v97_v9 }
   0xa   :  { %v32_v11 = vsub.f32 1.0, %v31_v10 }
   0xc   :  { %v33_v12 = vmul.f32 %v97_v9, %v32_v11 }
   0xe   :  { %28 = vadd.xlane.f32.xlu0 %v27_v7  ;;  %v34_v13 = vadd.f32 %v97_v9, %v33_v12 }
  0x10   :  { %v36_v14 = vsel %vm35_vm1, %v97_v9, %v34_v13 }
  0x79   :  { %v26_v15 = vpop.xlane.xlu0 %25 }
  0x7a   :  { %v37_v16 = vmul.f32 %v36_v14, %v26_v15 }
  0x7c   :  { %v39_v17 = vsub.f32 %v21_v2, %v37_v16 }
  0x7e   :  { %v41_v18 = vmul.f32 %v39_v17, %v39_v17 }
  0x80   :  { %v43_v19 = vsel %vm23_vm0, %v41_v18, 0.0 }
  0x81   :  { %44 = vadd.xlane.f32.xlu1 %v43_v19  ;;  %v29_v20 = vpop.xlane.xlu0 %28 }
  0x82   :  { %v38_v21 = vmul.f32 %v36_v14, %v29_v20 }
  0x84   :  { %v40_v22 = vsub.f32 %v22_v6, %v38_v21 }
  0x86   :  { %v42_v23 = vmul.f32 %v40_v22, %v40_v22 }
  0x88   :  { %v46_v24 = vsel %vm23_vm0, %v42_v23, 0.0 }
  0x89   :  { %47 = vadd.xlane.f32.xlu1 %v46_v24 }
  0xf4   :  { %v45_v25 = vpop.xlane.xlu1 %44 }
  0xf5   :  { %v49_v26 = vmul.f32 %v45_v25, %v36_v14 }
  0xf7   :  { %v51_v27 = vadd.f32 1e-12, %v49_v26 }
  0xf9   :  { %98 = vrsqrt.f32 %v51_v27  ;;  %vm59_vm3 = vweird.f32 %v51_v27 }
  0xfc   :  { %v48_v28 = vpop.xlane.xlu1 %47 }
  0xfd   :  { %v50_v29 = vmul.f32 %v48_v28, %v36_v14 }
  0xff   :  { %v99_v30 = vpop.eup %98  ;;  %v52_v31 = vadd.f32 1e-12, %v50_v29 }
 0x100   :  { %v54_v32 = vmul.f32 %v99_v30, %v51_v27  ;;  %vm60_vm2 = vweird.f32 %v99_v30 }
 0x101   :  { %100 = vrsqrt.f32 %v52_v31  ;;  %vm61_vm4 = vmor %vm59_vm3, %vm60_vm2  ;;  %vm69_vm6 = vweird.f32 %v52_v31 }
 0x102   :  { %v55_v33 = vmul.f32 %v99_v30, %v54_v32 }
 0x104   :  { %v56_v34 = vmul.f32 0.5, %v55_v33 }
 0x106   :  { %v57_v35 = vsub.f32 1.5, %v56_v34 }
 0x107   :  { %v101_v36 = vpop.eup %100 }
 0x108   :  { %v58_v37 = vmul.f32 %v99_v30, %v57_v35  ;;  %v64_v38 = vmul.f32 %v101_v36, %v52_v31  ;;  %vm70_vm5 = vweird.f32 %v101_v36 }
 0x109   :  { %vm71_vm7 = vmor %vm69_vm6, %vm70_vm5 }
 0x10a   :  { %v62_v40 = vsel %vm61_vm4, %v99_v30, %v58_v37  ;;  %v65_v41 = vmul.f32 %v101_v36, %v64_v38 }
 0x10b   :  { %v73_v43 = vmul.f32 %v62_v40, %v39_v17 }
 0x10c   :  { %v66_v44 = vmul.f32 0.5, %v65_v41 }
 0x10d   :  { %v79_v45 = vmul.f32 %v94_v39, %v73_v43 }
 0x10e   :  { %v67_v46 = vsub.f32 1.5, %v66_v44 }
 0x10f   :  { %v85_v47 = vadd.f32 %v95_v42, %v79_v45 }
 0x110   :  { %v68_v48 = vmul.f32 %v101_v36, %v67_v46 }
 0x111   :  { %87 = vst.msk [vmem:[%s162_s4] sm:$0xff] %vm23_vm0, %v85_v47 }
 0x112   :  { %v72_v49 = vsel %vm71_vm7, %v101_v36, %v68_v48 }
 0x113   :  { %v74_v50 = vmul.f32 %v72_v49, %v40_v22 }
 0x115   :  { %v80_v51 = vmul.f32 %v94_v39, %v74_v50 }
 0x117   :  { %v86_v52 = vadd.f32 %v95_v42, %v80_v51 }
 0x119   :  { %88 = vst.msk [vmem:[%s162_s4 + $0x8] sm:$0xff] %vm23_vm0, %v86_v52 }

// kernel: decoder_layer_forward.23
= control target key start
LH: loop header
LB: loop body
LE: loop exit
PB: predicated region body
PF: predicated region fallthrough
CT: control target
= control target key end

     0   :  { %vm15_vm0 = vcmask 523264   ;;  %v81_v2 = vmov 0.0   ;;  %vm26_vm1 = vcmask 261120   ;;  %s127_s1 = inlined_call_operand.vmem [shape: f32[32,64], index: 1, kind: input, shape index: {}]   ;;  %s128_s0 = inlined_call_operand.vmem [shape: f32[16,32], index: 0, kind: input, shape index: {}]   ;;  %s129_s2 = inlined_call_operand.vmem [shape: f32[16,64], index: 2, kind: output, shape index: {}]  }
   0x1   :  { %v25_v0 = vld [vmem:[%s127_s1 + $0x18] sm:$0xff]  ;;  %v24_v1 = vld [vmem:[%s127_s1 + $0x10] sm:$0xff]  ;;  %16 = vst.msk [vmem:[#allocation2] sm:$0xff] %vm15_vm0, %v81_v2  ;;  %v23_v3 = vld [vmem:[%s127_s1 + $0x8] sm:$0xff] }
   0x2   :  { %45 = vmatpush.msra.mxu0 %v25_v0  ;;  %76 = vmatpush.msra.mxu1 %v25_v0  ;;  %17 = vst.msk [vmem:[#allocation2 + $0x8] sm:$0xff] %vm15_vm0, %v81_v2  ;;  %v22_v4 = vld [vmem:[%s127_s1] sm:$0xff]  ;;  %v21_v6 = vld [vmem:[%s128_s0 + $0x8] sm:$0xff] }
   0x3   :  { %v20_v5 = vld [vmem:[%s128_s0] sm:$0xff] }
   0x4   :  { %46 = vmatpush.msra.mxu0 %v24_v1  ;;  %77 = vmatpush.msra.mxu1 %v24_v1 }
   0x6   :  { %47 = vmatpush.msra.mxu0 %v23_v3  ;;  %78 = vmatpush.msra.mxu1 %v23_v3 }
   0x8   :  { %48 = vmatpush.msra.mxu0 %v22_v4  ;;  %79 = vmatpush.msra.mxu1 %v22_v4  ;;  %v18_v7 = vld [vmem:[#allocation2] sm:$0xff] }
   0x9   :  { %74 = vmatmul.msk.f32.vlgmr.msra.gmra.mxu0 %vm26_vm1, %v20_v5  ;;  %75 = vmatmul.msk.f32.vlgmr.msra.gmra.mxu1 %vm26_vm1, %v21_v6  ;;  %v19_v8 = vld [vmem:[#allocation2 + $0x8] sm:$0xff] }
  0x86   :  { %v50_v9 = vpop.f32.mrf.mxu0  ;;  %v53_v10 = vpop.f32.mrf.mxu1 }
  0x87   :  { %v56_v11 = vadd.f32 %v50_v9, %v18_v7  ;;  %v57_v12 = vadd.f32 %v53_v10, %v19_v8 }
  0x89   :  { %59 = vst.msk [vmem:[#allocation2] sm:$0xff] %vm15_vm0, %v56_v11 }
  0x8a   :  { %60 = vst.msk [vmem:[#allocation2 + $0x8] sm:$0xff] %vm15_vm0, %v57_v12 }
  0x90   :  { %v64_v13 = vld [vmem:[#allocation2] sm:$0xff] }
  0x91   :  { %v66_v14 = vmax.f32 %v64_v13, 0.0  ;;  %v65_v15 = vld [vmem:[#allocation2 + $0x8] sm:$0xff] }
  0x92   :  { %v67_v16 = vmax.f32 %v65_v15, 0.0 }
  0x93   :  { %68 = vst.msk [vmem:[%s129_s2] sm:$0xff] %vm15_vm0, %v66_v14 }
  0x94   :  { %69 = vst.msk [vmem:[%s129_s2 + $0x8] sm:$0xff] %vm15_vm0, %v67_v16 }

// kernel: decoder_layer_forward.20
= control target key start
LH: loop header
LB: loop body
LE: loop exit
PB: predicated region body
PF: predicated region fallthrough
CT: control target
= control target key end

     0   :  { %11 = vsyncpa [#allocation3], 0  ;;  %s966_s21 = smov 0   ;;  %s1099_s0 = inlined_call_operand.vmem [shape: f32[2,8,32], index: 0, kind: input, shape index: {}]   ;;  %s1100_s1 = inlined_call_operand.vmem [shape: f32[2,8,32], index: 1, kind: input, shape index: {}]   ;;  %s1101_s2 = inlined_call_operand.vmem [shape: f32[2,8,32], index: 2, kind: input, shape index: {}]   ;;  %s1102_s3 = inlined_call_operand.vmem [shape: f32[2,8,8], index: 3, kind: input, shape index: {}]   ;;  %s1103_s4 = inlined_call_operand.vmem [shape: f32[8,8], index: 4, kind: input, shape index: {}]   ;;  %s1104_s5 = inlined_call_operand.vmem [shape: f32[4], index: 5, kind: input, shape index: {}]   ;;  %s1105_s6 = inlined_call_operand.vmem [shape: f32[2,8,32], index: 6, kind: output, shape index: {}]  }
   0x1 LB: > { %s795_s22 = sadd.s32 4294967295, %s922_s21   ;;  %p797_p0 = scmp.ge.s32.totalorder %s922_s21, 1  ;;  %s922_s21 = sphi %s966_s21, %s17_s21  }
   0x2   : > { %p194_p1 = scmp.lt.s32.totalorder %s922_s21, 3  ;;  %s209_s25 = sshll.u32 %s1104_s5, 4  ;;  %s210_s25 = int_to_ptr.vmem [resolvable:$true] %s209_s25 }
   0x3   : > { %p832_p3 = scmp.eq.s32.totalorder %s795_s22, 0  ;;  %s924_s26 = smov [#allocation2]  }
   0x4   : > { %p195_p2 = pnand %p797_p0, %p194_p1 }
   0x6   : > { %p828_p4 = pneg %p195_p2  ;;  %250 = sbr.rel (%p195_p2) target bundleno = 1622 (0x656), region = 44 }
   0x8   : > { %p829_p5 = pnand %p832_p3, %p828_p4 }
   0xa   : > { %831 = dma.vmem_to_smem (!%p829_p5), %s210_s25, 16, %s924_s26, [#allocation3]  }
   0xb   : > { %917 = dma.done.wait (%p832_p3), [#allocation3], 16  }
   0xc   : > { %919 = vsyncadd (%p832_p3), [#allocation3], 4294967280 }
   0xd   : > { %257 = sfence }
   0xe   : > { %p292_p6 = scmp.lt.s32.totalorder %s795_s22, 1  ;;  %vm318_vm0 = vcmask 64512   ;;  %s925_s13 = smov 120   ;;  %v1016_v21 = vld [vmem:[%s1103_s4] sm:$0xff]  ;;  %vm688_vm2 = vcmask 130048   ;;  %vm690_vm3 = vcmask 195584  }
   0xf   : > { %s926_s14 = smov 112   ;;  %s927_s15 = smov 104   ;;  %vm692_vm4 = vcmask 261120  }
  0x10   : > { %s1107_s22 = smov (!%p292_p6, %s795_s22), 1  ;;  %s359_s16 = sld [smem:[#allocation2]] }
  0x11   : > { %s977_s27 = sshll.u32 %s1107_s22, 3  ;;  %s812_s23 = sld [smem:[#allocation2 + $0x1]] }
  0x12   : > { %s299_s30 = scalar_lea.vmem %s1100_s1, %s977_s27  ;;  %s295_s9 = scalar_lea.vmem %s1099_s0, %s977_s27 }
  0x13   : > { %v983_v0 = vld [vmem:[%s299_s30] sm:$0xff]  ;;  %s307_s12 = scalar_lea.vmem %s1102_s3, %s977_s27  ;;  %s303_s22 = scalar_lea.vmem %s1101_s2, %s977_s27 }
  0x14   : > { %807 = vmatpush.xpose.msk.msra.mxu0 %vm318_vm0, %v983_v0  ;;  %v312_v1 = vld [vmem:[%s295_s9] sm:$0xff]  ;;  %406 = vrot.lane.b32.xlu2 %v983_v0, %s925_s13  ;;  %s816_s24 = sld [smem:[#allocation2 + $0x2]]  ;;  %s928_s26 = smov 8  }
  0x15   : > { %v996_v2 = vld [vmem:[%s307_s12] sm:$0xff]  ;;  %s820_s25 = sld [smem:[#allocation2 + $0x3]]  ;;  %s929_s28 = smov 24  }
  0x16   : > { %vm316_vm1 = vcmp.gt.f32.partialorder %v996_v2, 0.0  ;;  %v360_v17 = vstv %s359_s16  ;;  %v1033_v45 = vld [vmem:[%s303_s22] sm:$0xff]  ;;  %s930_s29 = smov 16   ;;  %s311_s8 = scalar_lea.vmem %s1105_s6, %s977_s27 }
  0x17   : > { %808 = vmatmul.msk.f32.vlgmr.msra.gmra.mxu0 %vm318_vm0, %v312_v1  ;;  %399 = vmatpush.msra.mxu1 %v1033_v45  ;;  %v447_v56 = vstv %s812_s23 }
  0x1c   : > { %404 = vrot.lane.b32.xlu2 %v312_v1, %s925_s13 }
  0x24   : > { %495 = vrot.lane.b32.xlu2 %v312_v1, %s926_s14 }
  0x2c   : > { %585 = vrot.lane.b32.xlu2 %v312_v1, %s927_s15 }
  0x6e   : > { %v407_v12 = vpop.permute.xlu2 %406 }
  0x6f   : > { %810 = vmatpush.xpose.msk.msra.mxu2 %vm318_vm0, %v407_v12 }
  0x76   : > { %v405_v13 = vpop.permute.xlu2 %404 }
  0x77   : > { %811 = vmatmul.msk.f32.vlgmr.msra.gmra.mxu2 %vm318_vm0, %v405_v13 }
  0x7e   : > { %v496_v38 = vpop.permute.xlu2 %495 }
  0x86   : > { %v586_v39 = vpop.permute.xlu2 %585 }
  0x94   : > { %v342_v3 = vpop.f32.mrf.mxu0 }
  0x95   : > { %v345_v4 = vmul.f32 0.35355338, %v342_v3 }
  0x97   : > { %v346_v5 = vsel %vm316_vm1, %v345_v4, -1e+32 }
  0x98   : > { %v347_v6 = vsel %vm318_vm0, %v346_v5, -inf }
  0x99   : > { %348 = vmax.xlane.f32.xlu0 %v347_v6 }
  0xfa   : > { %v429_v29 = vpop.f32.mrf.mxu2 }
  0xfb   : > { %v432_v30 = vmul.f32 0.35355338, %v429_v29 }
  0xfd   : > { %v433_v31 = vsel %vm316_vm1, %v432_v30, -1e+32 }
  0xfe   : > { %v434_v32 = vsel %vm318_vm0, %v433_v31, -inf }
  0xff   : > { %435 = vmax.xlane.f32.xlu2 %v434_v32  ;;  %v538_v32 = vstv %s816_s24 }
 0x10c   : > { %v349_v7 = vpop.xlane.xlu0 %348 }
 0x10d   : > { %v350_v8 = vsub.f32 %v346_v5, %v349_v7 }
 0x10f   : > { %v351_v9 = vmul.f32 1.442695, %v350_v8 }
 0x111   : > { %849 = vpow2.f32 %v351_v9 }
 0x117   : > { %v850_v10 = vpop.eup %849 }
 0x118   : > { %v353_v11 = vsel %vm318_vm0, %v850_v10, 0.0 }
 0x119   : > { %354 = vadd.xlane.f32.xlu0 %v353_v11 }
 0x12d   : > { %497 = vrot.lane.b32.xlu0 %v983_v0, %s926_s14 }
 0x172   : > { %v436_v40 = vpop.xlane.xlu2 %435 }
 0x173   : > { %v437_v41 = vsub.f32 %v433_v31, %v436_v40 }
 0x175   : > { %v438_v42 = vmul.f32 1.442695, %v437_v41 }
 0x18c   : > { %v355_v14 = vpop.xlane.xlu0 %354 }
 0x18d   : > { %851 = vrcp.f32 %v355_v14 }
 0x193   : > { %v852_v15 = vpop.eup %851 }
 0x194   : > { %v357_v16 = vmul.f32 %v852_v15, %v850_v10 }
 0x196   : > { %v358_v18 = vmul.f32 %v357_v16, %v996_v2 }
 0x198   : > { %v361_v19 = vmul.f32 %v360_v17, %v358_v18 }
 0x19a   : > { %v362_v20 = vadd.f32 1.0, %v361_v19 }
 0x19c   : > { %853 = vrcp.f32 %v362_v20 }
 0x19f   : > { %v498_v46 = vpop.permute.xlu0 %497 }
 0x1a0   : > { %814 = vmatpush.xpose.msk.msrb.mxu1 %vm318_vm0, %v498_v46 }
 0x1a2   : > { %v854_v22 = vpop.eup %853 }
 0x1a3   : > { %v364_v23 = vmul.f32 %v854_v22, %v1016_v21 }
 0x1a5   : > { %v365_v24 = vmul.f32 1.442695, %v364_v23 }
 0x1a7   : > { %855 = vpow2.f32 %v365_v24 }
 0x1ad   : > { %v856_v25 = vpop.eup %855 }
 0x1ae   : > { %v367_v26 = vmul.f32 %v856_v25, %v345_v4 }
 0x1b0   : > { %v368_v27 = vsel %vm316_vm1, %v367_v26, -1e+32 }
 0x1b1   : > { %v369_v28 = vsel %vm318_vm0, %v368_v27, -inf }
 0x1b2   : > { %370 = vmax.xlane.f32.xlu1 %v369_v28 }
 0x225   : > { %v371_v33 = vpop.xlane.xlu1 %370 }
 0x226   : > { %v372_v34 = vsub.f32 %v368_v27, %v371_v33 }
 0x228   : > { %v373_v35 = vmul.f32 1.442695, %v372_v34 }
 0x22a   : > { %857 = vpow2.f32 %v373_v35 }
 0x22b   : > { %859 = vpow2.f32 %v438_v42 }
 0x230   : > { %v858_v36 = vpop.eup %857 }
 0x231   : > { %v375_v37 = vsel %vm318_vm0, %v858_v36, 0.0  ;;  %v860_v43 = vpop.eup %859 }
 0x232   : > { %376 = vadd.xlane.f32.xlu1 %v375_v37  ;;  %v440_v44 = vsel %vm318_vm0, %v860_v43, 0.0 }
 0x233   : > { %441 = vadd.xlane.f32.xlu2 %v440_v44 }
 0x24b   : > { %587 = vrot.lane.b32.xlu1 %v983_v0, %s927_s15 }
 0x2a5   : > { %v377_v47 = vpop.xlane.xlu1 %376 }
 0x2a6   : > { %861 = vrcp.f32 %v377_v47  ;;  %v442_v52 = vpop.xlane.xlu2 %441 }
 0x2a7   : > { %863 = vrcp.f32 %v442_v52 }
 0x2ac   : > { %v862_v48 = vpop.eup %861 }
 0x2ad   : > { %v379_v49 = vmul.f32 %v862_v48, %v858_v36  ;;  %v864_v53 = vpop.eup %863 }
 0x2ae   : > { %v444_v54 = vmul.f32 %v864_v53, %v860_v43 }
 0x2af   : > { %v380_v50 = vmul.f32 %v379_v49, %v996_v2 }
 0x2b0   : > { %v445_v55 = vmul.f32 %v444_v54, %v996_v2 }
 0x2b1   : > { %809 = vmatmul.msk.f32.vlgmr.msra.gmra.mxu1 %vm318_vm0, %v380_v50 }
 0x2b2   : > { %v448_v57 = vmul.f32 %v447_v56, %v445_v55 }
 0x2b4   : > { %v449_v58 = vadd.f32 1.0, %v448_v57 }
 0x2b6   : > { %865 = vrcp.f32 %v449_v58 }
 0x2b9   : > { %815 = vmatmul.msk.f32.vlgmr.msrb.gmra.mxu1 %vm318_vm0, %v496_v38  ;;  %v628_v38 = vstv %s820_s25 }
 0x2bc   : > { %v866_v60 = vpop.eup %865 }
 0x2bd   : > { %v588_v51 = vpop.permute.xlu1 %587  ;;  %v451_v61 = vmul.f32 %v866_v60, %v1016_v21 }
 0x2be   : > { %818 = vmatpush.xpose.msk.msrb.mxu0 %vm318_vm0, %v588_v51 }
 0x2bf   : > { %v452_v63 = vmul.f32 1.442695, %v451_v61 }
 0x2c1   : > { %819 = vmatmul.msk.f32.vlgmr.msrb.gmra.mxu0 %vm318_vm0, %v586_v39  ;;  %867 = vpow2.f32 %v452_v63 }
 0x2c7   : > { %v868_v6 = vpop.eup %867 }
 0x2c8   : > { %v454_v9 = vmul.f32 %v868_v6, %v432_v30 }
 0x2ca   : > { %v455_v10 = vsel %vm316_vm1, %v454_v9, -1e+32 }
 0x2cb   : > { %v456_v11 = vsel %vm318_vm0, %v455_v10, -inf }
 0x32e   : > { %v1043_v59 = vpop.f32.mrf.mxu1 }
 0x336   : > { %v520_v62 = vpop.f32.mrf.mxu1 }
 0x337   : > { %v1046_v0 = vmul.f32 0.35355338, %v520_v62 }
 0x339   : > { %v524_v1 = vsel %vm316_vm1, %v1046_v0, -1e+32 }
 0x33a   : > { %v525_v3 = vsel %vm318_vm0, %v524_v1, -inf }
 0x33b   : > { %526 = vmax.xlane.f32.xlu0 %v525_v3 }
 0x33e   : > { %v610_v4 = vpop.f32.mrf.mxu0 }
 0x33f   : > { %v1052_v5 = vmul.f32 0.35355338, %v610_v4 }
 0x341   : > { %v614_v7 = vsel %vm316_vm1, %v1052_v5, -1e+32 }
 0x342   : > { %v615_v8 = vsel %vm318_vm0, %v614_v7, -inf }
 0x343   : > { %616 = vmax.xlane.f32.xlu1 %v615_v8 }
 0x34b   : > { %457 = vmax.xlane.f32.xlu1 %v456_v11 }
 0x3ae   : > { %v527_v12 = vpop.xlane.xlu0 %526 }
 0x3af   : > { %v528_v13 = vsub.f32 %v524_v1, %v527_v12 }
 0x3b1   : > { %v529_v14 = vmul.f32 1.442695, %v528_v13 }
 0x3b3   : > { %869 = vpow2.f32 %v529_v14 }
 0x3b6   : > { %v617_v15 = vpop.xlane.xlu1 %616 }
 0x3b7   : > { %v618_v16 = vsub.f32 %v614_v7, %v617_v15 }
 0x3b9   : > { %v870_v17 = vpop.eup %869  ;;  %v619_v18 = vmul.f32 1.442695, %v618_v16 }
 0x3ba   : > { %v531_v19 = vsel %vm318_vm0, %v870_v17, 0.0 }
 0x3bb   : > { %871 = vpow2.f32 %v619_v18  ;;  %532 = vadd.xlane.f32.xlu0 %v531_v19 }
 0x3be   : > { %v458_v20 = vpop.xlane.xlu1 %457 }
 0x3bf   : > { %v459_v22 = vsub.f32 %v455_v10, %v458_v20 }
 0x3c1   : > { %v872_v23 = vpop.eup %871  ;;  %v460_v24 = vmul.f32 1.442695, %v459_v22 }
 0x3c2   : > { %v621_v25 = vsel %vm318_vm0, %v872_v23, 0.0 }
 0x3c3   : > { %873 = vpow2.f32 %v460_v24  ;;  %622 = vadd.xlane.f32.xlu2 %v621_v25 }
 0x3c9   : > { %v874_v26 = vpop.eup %873 }
 0x3ca   : > { %v462_v27 = vsel %vm318_vm0, %v874_v26, 0.0 }
 0x3cb   : > { %463 = vadd.xlane.f32.xlu1 %v462_v27 }
 0x3e4   : > { %469 = vrot.lane.b32.xlu1 %v1033_v45, %s925_s13 }
 0x42e   : > { %v533_v28 = vpop.xlane.xlu0 %532 }
 0x42f   : > { %875 = vrcp.f32 %v533_v28 }
 0x435   : > { %v876_v29 = vpop.eup %875 }
 0x436   : > { %v535_v30 = vmul.f32 %v876_v29, %v870_v17  ;;  %v623_v31 = vpop.xlane.xlu2 %622 }
 0x437   : > { %877 = vrcp.f32 %v623_v31 }
 0x438   : > { %v536_v33 = vmul.f32 %v535_v30, %v996_v2 }
 0x43a   : > { %v539_v34 = vmul.f32 %v538_v32, %v536_v33 }
 0x43c   : > { %v540_v35 = vadd.f32 1.0, %v539_v34 }
 0x43d   : > { %v878_v36 = vpop.eup %877 }
 0x43e   : > { %879 = vrcp.f32 %v540_v35  ;;  %v625_v37 = vmul.f32 %v878_v36, %v872_v23  ;;  %v464_v43 = vpop.xlane.xlu1 %463 }
 0x440   : > { %v626_v39 = vmul.f32 %v625_v37, %v996_v2 }
 0x442   : > { %v629_v40 = vmul.f32 %v628_v38, %v626_v39 }
 0x444   : > { %v880_v41 = vpop.eup %879  ;;  %v630_v42 = vadd.f32 1.0, %v629_v40 }
 0x445   : > { %v542_v44 = vmul.f32 %v880_v41, %v1016_v21 }
 0x446   : > { %881 = vrcp.f32 %v630_v42 }
 0x447   : > { %v543_v46 = vmul.f32 1.442695, %v542_v44  ;;  %883 = vrcp.f32 %v464_v43 }
 0x449   : > { %885 = vpow2.f32 %v543_v46 }
 0x44c   : > { %v882_v47 = vpop.eup %881 }
 0x44d   : > { %v632_v48 = vmul.f32 %v882_v47, %v1016_v21  ;;  %v884_v49 = vpop.eup %883 }
 0x44e   : > { %v466_v54 = vmul.f32 %v884_v49, %v874_v26 }
 0x44f   : > { %v886_v50 = vpop.eup %885  ;;  %v633_v51 = vmul.f32 1.442695, %v632_v48 }
 0x450   : > { %v545_v52 = vmul.f32 %v886_v50, %v1046_v0  ;;  %v467_v57 = vmul.f32 %v466_v54, %v996_v2 }
 0x451   : > { %887 = vpow2.f32 %v633_v51 }
 0x452   : > { %v546_v53 = vsel %vm316_vm1, %v545_v52, -1e+32 }
 0x453   : > { %v547_v55 = vsel %vm318_vm0, %v546_v53, -inf }
 0x454   : > { %548 = vmax.xlane.f32.xlu0 %v547_v55 }
 0x456   : > { %v470_v56 = vpop.permute.xlu1 %469 }
 0x457   : > { %v888_v58 = vpop.eup %887  ;;  %490 = vmatpush.msra.mxu3 %v470_v56 }
 0x458   : > { %813 = vmatmul.msk.f32.vlgmr.msra.gmra.mxu3 %vm318_vm0, %v467_v57  ;;  %v635_v21 = vmul.f32 %v888_v58, %v1052_v5 }
 0x45a   : > { %v636_v60 = vsel %vm316_vm1, %v635_v21, -1e+32 }
 0x45b   : > { %v637_v61 = vsel %vm318_vm0, %v636_v60, -inf }
 0x45c   : > { %638 = vmax.xlane.f32.xlu2 %v637_v61 }
 0x4c7   : > { %v549_v62 = vpop.xlane.xlu0 %548 }
 0x4c8   : > { %v550_v63 = vsub.f32 %v546_v53, %v549_v62 }
 0x4ca   : > { %v551_v0 = vmul.f32 1.442695, %v550_v63 }
 0x4cc   : > { %889 = vpow2.f32 %v551_v0 }
 0x4cf   : > { %v639_v1 = vpop.xlane.xlu2 %638 }
 0x4d0   : > { %v640_v3 = vsub.f32 %v636_v60, %v639_v1 }
 0x4d2   : > { %v890_v4 = vpop.eup %889  ;;  %v641_v6 = vmul.f32 1.442695, %v640_v3 }
 0x4d3   : > { %v553_v7 = vsel %vm318_vm0, %v890_v4, 0.0 }
 0x4d4   : > { %891 = vpow2.f32 %v641_v6  ;;  %554 = vadd.xlane.f32.xlu0 %v553_v7 }
 0x4da   : > { %v892_v8 = vpop.eup %891 }
 0x4db   : > { %v643_v5 = vsel %vm318_vm0, %v892_v8, 0.0  ;;  %v492_v9 = vpop.f32.mrf.mxu3 }
 0x4dc   : > { %644 = vadd.xlane.f32.xlu2 %v643_v5 }
 0x4e8   : > { %559 = vrot.lane.b32.xlu0 %v1033_v45, %s926_s14 }
 0x4f0   : > { %676 = vrot.lane.b32.xlu0 %v492_v9, %s928_s26 }
 0x4f4   : > { %649 = vrot.lane.b32.xlu2 %v1033_v45, %s927_s15 }
 0x547   : > { %v555_v10 = vpop.xlane.xlu0 %554 }
 0x548   : > { %893 = vrcp.f32 %v555_v10 }
 0x54e   : > { %v894_v12 = vpop.eup %893 }
 0x54f   : > { %v645_v11 = vpop.xlane.xlu2 %644  ;;  %v557_v14 = vmul.f32 %v894_v12, %v890_v4 }
 0x550   : > { %895 = vrcp.f32 %v645_v11 }
 0x551   : > { %v558_v19 = vmul.f32 %v557_v14, %v996_v2 }
 0x556   : > { %v896_v13 = vpop.eup %895 }
 0x557   : > { %v647_v15 = vmul.f32 %v896_v13, %v892_v8  ;;  %v650_v16 = vpop.permute.xlu2 %649 }
 0x558   : > { %670 = vmatpush.msrb.mxu2 %v650_v16 }
 0x559   : > { %v648_v17 = vmul.f32 %v647_v15, %v996_v2 }
 0x55a   : > { %v560_v18 = vpop.permute.xlu0 %559 }
 0x55b   : > { %580 = vmatpush.msrb.mxu3 %v560_v18  ;;  %821 = vmatmul.msk.f32.vlgmr.msrb.gmra.mxu2 %vm318_vm0, %v648_v17 }
 0x55c   : > { %817 = vmatmul.msk.f32.vlgmr.msrb.gmra.mxu3 %vm318_vm0, %v558_v19 }
 0x562   : > { %v677_v22 = vpop.permute.xlu0 %676 }
 0x563   : > { %v687_v23 = vsel %vm318_vm0, %v1043_v59, %v677_v22 }
 0x5de   : > { %v672_v45 = vpop.f32.mrf.mxu2 }
 0x5df   : > { %684 = vrot.lane.b32.xlu2 %v672_v45, %s929_s28  ;;  %v582_v20 = vpop.f32.mrf.mxu3 }
 0x5e0   : > { %680 = vrot.lane.b32.xlu1 %v582_v20, %s930_s29 }
 0x639   : > { %v685_v24 = vpop.permute.xlu2 %684 }
 0x652   : > { %v681_v2 = vpop.permute.xlu1 %680 }
 0x653   : > { %v689_v25 = vsel %vm688_vm2, %v687_v23, %v681_v2 }
 0x654   : > { %v691_v26 = vsel %vm690_vm3, %v689_v25, %v685_v24 }
 0x655   : > { %693 = vst.msk [vmem:[%s311_s8] sm:$0xff] %vm692_vm4, %v691_v26 }
 0x656 PF: > { %s17_s21 = sadd.s32 1, %s922_s21  }
 0x657   : > { %p14_p7 = scmp.ge.s32.totalorder %s17_s21, 4  }
 0x659   :  { %16 = sbr.rel (!%p14_p7) target bundleno = 1 (0x1), region = 88 }
 0x65e   :  { %713 = vsyncpa [#allocation3], 1 }
 0x65f   :  { %715 = vsyncpa [#allocation3 + $0x1], 1 }

// kernel: decoder_layer_forward.24
= control target key start
LH: loop header
LB: loop body
LE: loop exit
PB: predicated region body
PF: predicated region fallthrough
CT: control target
= control target key end

     0   :  { %vm15_vm0 = vcmask 261120   ;;  %v87_v2 = vmov 0.0   ;;  %vm30_vm1 = vcmask 523264   ;;  %s145_s1 = inlined_call_operand.vmem [shape: f32[64,32], index: 1, kind: input, shape index: {}]   ;;  %s146_s0 = inlined_call_operand.vmem [shape: f32[16,64], index: 0, kind: input, shape index: {}]   ;;  %s147_s2 = inlined_call_operand.vmem [shape: f32[16,32], index: 2, kind: output, shape index: {}]  }
   0x1   :  { %v29_v0 = vld [vmem:[%s145_s1 + $0x38] sm:$0xff]  ;;  %v28_v1 = vld [vmem:[%s145_s1 + $0x30] sm:$0xff]  ;;  %16 = vst.msk [vmem:[#allocation2] sm:$0xff] %vm15_vm0, %v87_v2  ;;  %v27_v3 = vld [vmem:[%s145_s1 + $0x28] sm:$0xff] }
   0x2   :  { %45 = vmatpush.msra.mxu0 %v29_v0  ;;  %78 = vmatpush.msra.mxu1 %v29_v0  ;;  %17 = vst.msk [vmem:[#allocation2 + $0x8] sm:$0xff] %vm15_vm0, %v87_v2  ;;  %v26_v4 = vld [vmem:[%s145_s1 + $0x20] sm:$0xff]  ;;  %v25_v5 = vld [vmem:[%s145_s1 + $0x18] sm:$0xff]  ;;  %v24_v6 = vld [vmem:[%s145_s1 + $0x10] sm:$0xff] }
   0x3   :  { %v23_v7 = vld [vmem:[%s145_s1 + $0x8] sm:$0xff]  ;;  %v22_v8 = vld [vmem:[%s145_s1] sm:$0xff] }
   0x4   :  { %46 = vmatpush.msra.mxu0 %v28_v1  ;;  %79 = vmatpush.msra.mxu1 %v28_v1  ;;  %v20_v9 = vld [vmem:[%s146_s0] sm:$0xff]  ;;  %v21_v10 = vld [vmem:[%s146_s0 + $0x8] sm:$0xff] }
   0x6   :  { %47 = vmatpush.msra.mxu0 %v27_v3  ;;  %80 = vmatpush.msra.mxu1 %v27_v3 }
   0x8   :  { %48 = vmatpush.msra.mxu0 %v26_v4  ;;  %81 = vmatpush.msra.mxu1 %v26_v4  ;;  %v18_v11 = vld [vmem:[#allocation2] sm:$0xff] }
   0x9   :  { %v19_v12 = vld [vmem:[#allocation2 + $0x8] sm:$0xff] }
   0xa   :  { %49 = vmatpush.msra.mxu0 %v25_v5  ;;  %82 = vmatpush.msra.mxu1 %v25_v5 }
   0xc   :  { %50 = vmatpush.msra.mxu0 %v24_v6  ;;  %83 = vmatpush.msra.mxu1 %v24_v6 }
   0xe   :  { %51 = vmatpush.msra.mxu0 %v23_v7  ;;  %84 = vmatpush.msra.mxu1 %v23_v7 }
  0x10   :  { %52 = vmatpush.msra.mxu0 %v22_v8  ;;  %85 = vmatpush.msra.mxu1 %v22_v8 }
  0x11   :  { %76 = vmatmul.msk.f32.vlgmr.msra.gmra.mxu0 %vm30_vm1, %v20_v9  ;;  %77 = vmatmul.msk.f32.vlgmr.msra.gmra.mxu1 %vm30_vm1, %v21_v10 }
  0x8e   :  { %v54_v13 = vpop.f32.mrf.mxu0  ;;  %v57_v14 = vpop.f32.mrf.mxu1 }
  0x8f   :  { %v60_v15 = vadd.f32 %v54_v13, %v18_v11  ;;  %v61_v16 = vadd.f32 %v57_v14, %v19_v12 }
  0x91   :  { %63 = vst.msk [vmem:[#allocation2] sm:$0xff] %vm15_vm0, %v60_v15 }
  0x92   :  { %64 = vst.msk [vmem:[#allocation2 + $0x8] sm:$0xff] %vm15_vm0, %v61_v16 }
  0x98   :  { %v68_v17 = vld [vmem:[#allocation2] sm:$0xff] }
  0x99   :  { %70 = vst.msk [vmem:[%s147_s2] sm:$0xff] %vm15_vm0, %v68_v17  ;;  %v69_v18 = vld [vmem:[#allocation2 + $0x8] sm:$0xff] }
  0x9a   :  { %71 = vst.msk [vmem:[%s147_s2 + $0x8] sm:$0xff] %vm15_vm0, %v69_v18 }

// kernel: decoder_layer_forward.25
= control target key start
LH: loop header
LB: loop body
LE: loop exit
PB: predicated region body
PF: predicated region fallthrough
CT: control target
= control target key end

     0   :  { %vm24_vm0 = vcmask 261120   ;;  %s202_s0 = inlined_call_operand.vmem [shape: f32[16,32], index: 0, kind: input, shape index: {}]   ;;  %s203_s1 = inlined_call_operand.vmem [shape: f32[16,32], index: 1, kind: input, shape index: {}]   ;;  %s204_s2 = inlined_call_operand.vmem [shape: f32[1,32], index: 2, kind: input, shape index: {}]   ;;  %s205_s3 = inlined_call_operand.vmem [shape: f32[1,32], index: 3, kind: input, shape index: {}]   ;;  %s206_s4 = inlined_call_operand.hbm [shape: f32[16,32], index: 4, kind: output, shape index: {}]  }
   0x1   :  { %v18_v0 = vld [vmem:[%s202_s0] sm:$0xff] }
   0x2   :  { %v20_v1 = vld [vmem:[%s203_s1] sm:$0xff] }
   0x3   :  { %v22_v2 = vadd.f32 %v20_v1, %v18_v0 }
   0x4   :  { %9 = vsyncpa [#allocation3], 0  ;;  %v19_v3 = vld [vmem:[%s202_s0 + $0x8] sm:$0xff]  ;;  %v146_v8 = vmov 32.0   ;;  %v112_v39 = vld [vmem:[%s204_s2] ss:$0 sm:$0xff] }
   0x5   :  { %v21_v4 = vld [vmem:[%s203_s1 + $0x8] sm:$0xff]  ;;  %v25_v5 = vsel %vm24_vm0, %v22_v2, 0.0  ;;  %114 = vrcp.f32 %v146_v8  ;;  %v113_v43 = vld [vmem:[%s205_s3] ss:$0 sm:$0xff]  ;;  %s147_s2 = smov [#allocation2]   ;;  %s96_s28 = sshll.u32 %s206_s4, 4  ;;  %s97_s28 = int_to_ptr.hbm [resolvable:$true] %s96_s28 }
   0x6   :  { %26 = vadd.xlane.f32.xlu0 %v25_v5  ;;  %v23_v6 = vadd.f32 %v21_v4, %v19_v3  ;;  %s94_s25 = sshll.u32 %s147_s2, 4  ;;  %s148_s3 = smov 128   ;;  %s95_s25 = int_to_ptr.vmem [resolvable:$true] %s94_s25 }
   0x7   :  { %s149_s29 = smov 8  }
   0x8   :  { %v28_v7 = vsel %vm24_vm0, %v23_v6, 0.0 }
   0xb   :  { %v115_v9 = vpop.eup %114 }
   0xc   :  { %v32_v10 = vmul.f32 32.0, %v115_v9  ;;  %vm36_vm1 = vweird.f32 %v115_v9 }
   0xe   :  { %29 = vadd.xlane.f32.xlu0 %v28_v7  ;;  %v33_v11 = vsub.f32 1.0, %v32_v10 }
  0x10   :  { %v34_v12 = vmul.f32 %v115_v9, %v33_v11 }
  0x12   :  { %v35_v13 = vadd.f32 %v115_v9, %v34_v12 }
  0x14   :  { %v37_v14 = vsel %vm36_vm1, %v115_v9, %v35_v13 }
  0x79   :  { %v27_v15 = vpop.xlane.xlu0 %26 }
  0x7a   :  { %v38_v16 = vmul.f32 %v37_v14, %v27_v15 }
  0x7c   :  { %v40_v17 = vsub.f32 %v22_v2, %v38_v16 }
  0x7e   :  { %v42_v18 = vmul.f32 %v40_v17, %v40_v17 }
  0x80   :  { %v44_v19 = vsel %vm24_vm0, %v42_v18, 0.0 }
  0x81   :  { %45 = vadd.xlane.f32.xlu1 %v44_v19  ;;  %v30_v20 = vpop.xlane.xlu0 %29 }
  0x82   :  { %v39_v21 = vmul.f32 %v37_v14, %v30_v20 }
  0x84   :  { %v41_v22 = vsub.f32 %v23_v6, %v39_v21 }
  0x86   :  { %v43_v23 = vmul.f32 %v41_v22, %v41_v22 }
  0x88   :  { %v47_v24 = vsel %vm24_vm0, %v43_v23, 0.0 }
  0x89   :  { %48 = vadd.xlane.f32.xlu1 %v47_v24 }
  0xf4   :  { %v46_v25 = vpop.xlane.xlu1 %45 }
  0xf5   :  { %v50_v26 = vmul.f32 %v46_v25, %v37_v14 }
  0xf7   :  { %v52_v27 = vadd.f32 1e-12, %v50_v26 }
  0xf9   :  { %116 = vrsqrt.f32 %v52_v27  ;;  %vm60_vm3 = vweird.f32 %v52_v27 }
  0xfc   :  { %v49_v28 = vpop.xlane.xlu1 %48 }
  0xfd   :  { %v51_v29 = vmul.f32 %v49_v28, %v37_v14 }
  0xff   :  { %v117_v30 = vpop.eup %116  ;;  %v53_v31 = vadd.f32 1e-12, %v51_v29 }
 0x100   :  { %v55_v32 = vmul.f32 %v117_v30, %v52_v27  ;;  %vm61_vm2 = vweird.f32 %v117_v30 }
 0x101   :  { %118 = vrsqrt.f32 %v53_v31  ;;  %vm62_vm4 = vmor %vm60_vm3, %vm61_vm2  ;;  %vm70_vm6 = vweird.f32 %v53_v31 }
 0x102   :  { %v56_v33 = vmul.f32 %v117_v30, %v55_v32 }
 0x104   :  { %v57_v34 = vmul.f32 0.5, %v56_v33 }
 0x106   :  { %v58_v35 = vsub.f32 1.5, %v57_v34 }
 0x107   :  { %v119_v36 = vpop.eup %118 }
 0x108   :  { %v59_v37 = vmul.f32 %v117_v30, %v58_v35  ;;  %v65_v38 = vmul.f32 %v119_v36, %v53_v31  ;;  %vm71_vm5 = vweird.f32 %v119_v36 }
 0x109   :  { %vm72_vm7 = vmor %vm70_vm6, %vm71_vm5 }
 0x10a   :  { %v63_v40 = vsel %vm62_vm4, %v117_v30, %v59_v37  ;;  %v66_v41 = vmul.f32 %v119_v36, %v65_v38 }
 0x10b   :  { %v74_v42 = vmul.f32 %v63_v40, %v40_v17 }
 0x10c   :  { %v67_v44 = vmul.f32 0.5, %v66_v41 }
 0x10d   :  { %v80_v45 = vmul.f32 %v112_v39, %v74_v42 }
 0x10e   :  { %v68_v46 = vsub.f32 1.5, %v67_v44 }
 0x10f   :  { %v86_v47 = vadd.f32 %v113_v43, %v80_v45 }
 0x110   :  { %v69_v48 = vmul.f32 %v119_v36, %v68_v46 }
 0x111   :  { %88 = vst.msk [vmem:[#allocation2] sm:$0xff] %vm24_vm0, %v86_v47 }
 0x112   :  { %v73_v49 = vsel %vm72_vm7, %v119_v36, %v69_v48 }
 0x113   :  { %v75_v50 = vmul.f32 %v73_v49, %v41_v22 }
 0x115   :  { %v81_v51 = vmul.f32 %v112_v39, %v75_v50 }
 0x117   :  { %v87_v52 = vadd.f32 %v113_v43, %v81_v51 }
 0x119   :  { %89 = vst.msk [vmem:[#allocation2 + $0x8] sm:$0xff] %vm24_vm0, %v87_v52 }
 0x11a   :  { %102 = dma.vmem_to_hbm [thread:$0]  %s95_s25, 256, %s97_s28, [#allocation3], %s148_s3, %s148_s3, %s149_s29  }
 0x11b   :  { %144 = dma.done.wait [#allocation3], 256  }
 0x11c   :  { %145 = vsyncadd [#allocation3], 4294967040 }
 0x11d   :  { %107 = vsyncpa [#allocation3], 1 }

</bundles_post_ra>
